<compile_context>
chip_gen: v7x
topology: tpu7x:2x2x1
jax: 0.10.0
libtpu: 0.0.40
codegen_flags: <defaults>
</compile_context>

<pallas_src>
import jax
import jax.numpy as jnp
from jax import lax
from jax.experimental import pallas as pl
from jax.experimental.pallas import tpu as pltpu


def _act(x):
    return x * jax.nn.sigmoid(x)          # SiLU


def _round_up(v, m):
    return (v + m - 1) // m * m


def _pick_tile_h(h, target):
    """Largest even divisor of h that is <= max(target, 2)."""
    target = max(target, 2)
    best = None
    for d in range(2, min(target, h) + 1, 2):
        if h % d == 0:
            best = d
    return best if best is not None else h


# ------------------------------- Pallas kernel -------------------------------

def _basic_block_kernel(xtop_ref, xcur_ref, xbot_ref,
                        w3_ref, b3_ref, wc_ref, bc_ref, o_ref):
    i = pl.program_id(1)
    n_h = pl.num_programs(1)
    th, wp, cp = xcur_ref.shape          # rows per tile, W+2, padded C
    w = wp - 2
    chp = w3_ref.shape[1]                # padded hidden channels

    xc = xcur_ref[...]                                            # (th,   wp, cp)
    top = jnp.where(i > 0, xtop_ref[...], 0.0)                    # (2,    wp, cp)
    bot = jnp.where(i + 1 < n_h, xbot_ref[...], 0.0)              # (2,    wp, cp)
    xbig = jnp.concatenate([top, xc, bot], axis=0)                # (th+4, wp, cp)

    # ---- RepConv: 3x3 conv (1x1 branch pre-folded into the centre tap),
    # evaluated for th+2 rows (1-row halo each side for the second conv),
    # as ONE wide-K matmul:  ((th+2)*w, 9*cp) @ (9*cp, chp)
    taps1 = [xbig[ky:ky + th + 2, kx:kx + w, :].reshape((th + 2) * w, cp)
             for ky in range(3) for kx in range(3)]
    a1 = jnp.concatenate(taps1, axis=1)
    y = jnp.dot(a1, w3_ref[...], preferred_element_type=jnp.float32) + b3_ref[...]
    y = _act(y).reshape(th + 2, w, chp)

    # y rows that lie outside the image are the second conv's zero padding.
    y_top = jnp.where(i > 0, y[0:1], 0.0)
    y_bot = jnp.where(i + 1 < n_h, y[th + 1:th + 2], 0.0)
    y = jnp.concatenate([y_top, y[1:th + 1], y_bot], axis=0)      # (th+2, w, chp)

    zcol = jnp.zeros((th + 2, 1, chp), jnp.float32)
    ypad = jnp.concatenate([zcol, y, zcol], axis=1)               # (th+2, wp, chp)

    # ---- second 3x3 conv + SiLU, again one wide-K matmul.
    taps2 = [ypad[ky:ky + th, kx:kx + w, :].reshape(th * w, chp)
             for ky in range(3) for kx in range(3)]
    a2 = jnp.concatenate(taps2, axis=1)
    z = jnp.dot(a2, wc_ref[...], preferred_element_type=jnp.float32) + bc_ref[...]
    z = _act(z)

    # ---- residual add with the original x tile (valid W columns).
    res = xc[:, 1:w + 1, :].reshape(th * w, cp)
    o_ref[...] = (res + z).reshape(th, w, cp).astype(o_ref.dtype)


# ------------------------------ wrapper / packing -----------------------------

def _pack_params(params, c, chid, cp, chp):
    w3, b3 = params["rep_dense"]   # (3,3,c,chid), (1,chid)
    w1, b1 = params["rep_1x1"]     # (c,chid),     (1,chid)
    wc, bc = params["conv1"]       # (3,3,chid,c), (1,c)
    w3p = jnp.zeros((3, 3, cp, chp), jnp.float32).at[:, :, :c, :chid].set(w3)
    w3p = w3p.at[1, 1, :c, :chid].add(w1)        # RepVGG: fold 1x1 into centre tap
    b3p = jnp.zeros((1, chp), jnp.float32).at[:, :chid].set(b3 + b1)
    wcp = jnp.zeros((3, 3, chp, cp), jnp.float32).at[:, :, :chid, :c].set(wc)
    bcp = jnp.zeros((1, cp), jnp.float32).at[:, :c].set(bc)
    return w3p.reshape(9 * cp, chp), b3p, wcp.reshape(9 * chp, cp), bcp


def basic_block_3x3_reverse(params, x_nchw, *, max_tile_h=8):
    x = jnp.transpose(x_nchw, (0, 2, 3, 1))          # NCHW -> NHWC
    n, h, w, c = x.shape
    chid = params["rep_dense"][0].shape[-1]
    if h % 2 != 0:
        # TODO(synk): odd H would need full-height tiles or element-offset halos.
        raise ValueError("H must be even for the 2-row halo BlockSpecs")
    cp = _round_up(c, 128)
    chp = _round_up(chid, 128)
    th = _pick_tile_h(h, max_tile_h)
    n_h = h // th
    wp = w + 2
    hh = th // 2                                     # halo blocks are 2 rows each

    # zero-pad W by 1 on each side (3x3 conv halo) and channels to the lane width.
    xp = jnp.pad(x, ((0, 0), (0, 0), (1, 1), (0, cp - c)))
    w3f, b3p, wcf, bcp = _pack_params(params, c, chid, cp, chp)

    in_specs = [
        # 2-row halo above the tile (clamped; zero-masked in-kernel at i == 0)
        pl.BlockSpec((None, 2, wp, cp),
                     lambda b, i: (b, jnp.maximum(i * hh - 1, 0), 0, 0)),
        # the row tile itself
        pl.BlockSpec((None, th, wp, cp), lambda b, i: (b, i, 0, 0)),
        # 2-row halo below the tile (clamped; zero-masked at i == last)
        pl.BlockSpec((None, 2, wp, cp),
                     lambda b, i: (b, jnp.minimum((i + 1) * hh, h // 2 - 1), 0, 0)),
        # weights / biases: constant index maps -> fetched once, stay resident
        pl.BlockSpec((9 * cp, chp), lambda b, i: (0, 0)),
        pl.BlockSpec((1, chp), lambda b, i: (0, 0)),
        pl.BlockSpec((9 * chp, cp), lambda b, i: (0, 0)),
        pl.BlockSpec((1, cp), lambda b, i: (0, 0)),
    ]
    out_spec = pl.BlockSpec((None, th, w, cp), lambda b, i: (b, i, 0, 0))

    out = pl.pallas_call(
        _basic_block_kernel,
        grid=(n, n_h),
        in_specs=in_specs,
        out_specs=out_spec,
        out_shape=jax.ShapeDtypeStruct((n, h, w, cp), x.dtype),
        compiler_params=pltpu.CompilerParams(
            dimension_semantics=("parallel", "parallel")),
    )(xp, xp, xp, w3f, b3p, wcf, bcp)

    out = out[:, :, :, :c]
    return jnp.transpose(out, (0, 3, 1, 2))          # NHWC -> NCHW


# --------------------------- deterministic parameters --------------------------

def _init_conv_bn(key, cin, cout, k):
    """Conv(no bias) + BatchNorm(eval, running stats) folded into (weight, bias)."""
    k1, k2, k3, k4, k5 = jax.random.split(key, 5)
    wgt = jax.random.normal(k1, (cout, cin, k, k), jnp.float32)
    wgt = wgt * (1.0 / (cin * k * k)) ** 0.5
    gamma = jax.random.uniform(k2, (cout,), jnp.float32, 0.5, 1.5)
    beta = jax.random.normal(k3, (cout,), jnp.float32) * 0.1
    mean = jax.random.normal(k4, (cout,), jnp.float32) * 0.1
    var = jax.random.uniform(k5, (cout,), jnp.float32, 0.5, 1.5)
    scale = gamma / jnp.sqrt(var + 1e-5)
    w_f = wgt * scale[:, None, None, None]
    b_f = (beta - mean * scale).reshape(1, cout)
    if k == 1:
        return w_f[:, :, 0, 0].T, b_f                    # (cin, cout)
    return jnp.transpose(w_f, (2, 3, 1, 0)), b_f         # (kh, kw, cin, cout) HWIO


def init_basic_block_params(key, ch_in, ch_hidden_ratio=1.0):
    ch_hidden = int(ch_in * ch_hidden_ratio)
    k0, k1, k2 = jax.random.split(key, 3)
    return {
        "rep_dense": _init_conv_bn(k0, ch_in, ch_hidden, 3),   # RepConv 3x3 branch
        "rep_1x1": _init_conv_bn(k1, ch_in, ch_hidden, 1),     # RepConv 1x1 branch
        "conv1": _init_conv_bn(k2, ch_hidden, ch_in, 3),       # ConvBNAct 3x3
    }


# ------------------------------ pure-JAX reference -----------------------------

def _ref_conv3(x, w, b):
    y = lax.conv_general_dilated(x, w, (1, 1), "SAME",
                                 dimension_numbers=("NHWC", "HWIO", "NHWC"))
    return y + b.reshape(1, 1, 1, -1)


def _ref_conv1(x, w, b):
    return jnp.einsum("nhwc,co->nhwo", x, w) + b.reshape(1, 1, 1, -1)


def basic_block_ref(params, x_nchw):
    x = jnp.transpose(x_nchw, (0, 2, 3, 1))
    y = _act(_ref_conv3(x, *params["rep_dense"]) + _ref_conv1(x, *params["rep_1x1"]))
    y = _act(_ref_conv3(y, *params["conv1"]))
    out = x + y
    return jnp.transpose(out, (0, 3, 1, 2))


# ----------------------------------- main --------------------------------------

if __name__ == "__main__":
    key = jax.random.PRNGKey(0)
    kx, kp = jax.random.split(key)

    N, C, H, W = 2, 8, 16, 16
    x = jax.random.normal(kx, (N, C, H, W), jnp.float32)
    params = init_basic_block_params(kp, C, ch_hidden_ratio=1.0)

    out = jax.jit(basic_block_3x3_reverse)(params, x)
    out = jax.block_until_ready(out)

    ref = basic_block_ref(params, x)
    assert out.shape == (N, C, H, W), out.shape
    max_err = float(jnp.max(jnp.abs(out - ref)))
    assert jnp.allclose(out, ref, atol=1e-3, rtol=1e-3), max_err

    print("KERNEL_OK")
</pallas_src>

<mosaic_0001>
module attributes {stable_mosaic.version = 11 : i64} {
  func.func @_basic_block_kernel(%arg0: i32, %arg1: i32, %arg2: memref<1x2x18x128xf32, #tpu.memory_space<vmem>>, %arg3: memref<1x8x18x128xf32, #tpu.memory_space<vmem>>, %arg4: memref<1x2x18x128xf32, #tpu.memory_space<vmem>>, %arg5: memref<1152x128xf32, #tpu.memory_space<vmem>>, %arg6: memref<1x128xf32, #tpu.memory_space<vmem>>, %arg7: memref<1152x128xf32, #tpu.memory_space<vmem>>, %arg8: memref<1x128xf32, #tpu.memory_space<vmem>>, %arg9: memref<1x8x16x128xf32, #tpu.memory_space<vmem>>) attributes {dimension_semantics = [#tpu.dimension_semantics<parallel>, #tpu.dimension_semantics<parallel>], iteration_bounds = array<i64: 2, 2>, scalar_prefetch = 0 : i64, scratch_operands = 0 : i64, tpu.core_type = #tpu.core_type<tc>, window_params = [{transform_indices = @transform_0, window_bounds = array<i64: 1, 2, 18, 128>}, {transform_indices = @transform_1, window_bounds = array<i64: 1, 8, 18, 128>}, {transform_indices = @transform_2, window_bounds = array<i64: 1, 2, 18, 128>}, {pipeline_mode = #tpu.pipeline_mode<synchronous>, transform_indices = @transform_3, window_bounds = array<i64: 1152, 128>}, {pipeline_mode = #tpu.pipeline_mode<synchronous>, transform_indices = @transform_4, window_bounds = array<i64: 1, 128>}, {pipeline_mode = #tpu.pipeline_mode<synchronous>, transform_indices = @transform_5, window_bounds = array<i64: 1152, 128>}, {pipeline_mode = #tpu.pipeline_mode<synchronous>, transform_indices = @transform_6, window_bounds = array<i64: 1, 128>}, {transform_indices = @transform_7, window_bounds = array<i64: 1, 8, 16, 128>}]} {
    %c0 = arith.constant 0 : index
    %c0_0 = arith.constant 0 : index
    %c0_1 = arith.constant 0 : index
    %c0_2 = arith.constant 0 : index
    %0 = vector.load %arg3[%c0, %c0_0, %c0_1, %c0_2] : memref<1x8x18x128xf32, #tpu.memory_space<vmem>>, vector<1x8x18x128xf32>
    %1 = vector.shape_cast %0 : vector<1x8x18x128xf32> to vector<8x18x128xf32>
    %c0_i32 = arith.constant 0 : i32
    %2 = arith.cmpi sgt, %arg1, %c0_i32 : i32
    %c0_3 = arith.constant 0 : index
    %c0_4 = arith.constant 0 : index
    %c0_5 = arith.constant 0 : index
    %c0_6 = arith.constant 0 : index
    %3 = vector.load %arg2[%c0_3, %c0_4, %c0_5, %c0_6] : memref<1x2x18x128xf32, #tpu.memory_space<vmem>>, vector<1x2x18x128xf32>
    %4 = vector.shape_cast %3 : vector<1x2x18x128xf32> to vector<2x18x128xf32>
    %cst = arith.constant 0.000000e+00 : f32
    %5 = vector.broadcast %cst : f32 to vector<2x18x128xf32>
    %6 = arith.select %2, %4, %5 : vector<2x18x128xf32>
    %c1_i32 = arith.constant 1 : i32
    %7 = arith.addi %arg1, %c1_i32 : i32
    %c2_i32 = arith.constant 2 : i32
    %8 = arith.cmpi slt, %7, %c2_i32 : i32
    %c0_7 = arith.constant 0 : index
    %c0_8 = arith.constant 0 : index
    %c0_9 = arith.constant 0 : index
    %c0_10 = arith.constant 0 : index
    %9 = vector.load %arg4[%c0_7, %c0_8, %c0_9, %c0_10] : memref<1x2x18x128xf32, #tpu.memory_space<vmem>>, vector<1x2x18x128xf32>
    %10 = vector.shape_cast %9 : vector<1x2x18x128xf32> to vector<2x18x128xf32>
    %cst_11 = arith.constant 0.000000e+00 : f32
    %11 = vector.broadcast %cst_11 : f32 to vector<2x18x128xf32>
    %12 = arith.select %8, %10, %11 : vector<2x18x128xf32>
    %13 = tpu.concatenate %6, %1, %12 in 0 : vector<2x18x128xf32>, vector<8x18x128xf32>, vector<2x18x128xf32> -> vector<12x18x128xf32>
    %14 = vector.extract_strided_slice %13 {offsets = [0, 0, 0], sizes = [10, 16, 128], strides = [1, 1, 1]} : vector<12x18x128xf32> to vector<10x16x128xf32>
    %15 = vector.shape_cast %14 : vector<10x16x128xf32> to vector<160x128xf32>
    %16 = vector.extract_strided_slice %13 {offsets = [0, 1, 0], sizes = [10, 16, 128], strides = [1, 1, 1]} : vector<12x18x128xf32> to vector<10x16x128xf32>
    %17 = vector.shape_cast %16 : vector<10x16x128xf32> to vector<160x128xf32>
    %18 = vector.extract_strided_slice %13 {offsets = [0, 2, 0], sizes = [10, 16, 128], strides = [1, 1, 1]} : vector<12x18x128xf32> to vector<10x16x128xf32>
    %19 = vector.shape_cast %18 : vector<10x16x128xf32> to vector<160x128xf32>
    %20 = vector.extract_strided_slice %13 {offsets = [1, 0, 0], sizes = [10, 16, 128], strides = [1, 1, 1]} : vector<12x18x128xf32> to vector<10x16x128xf32>
    %21 = vector.shape_cast %20 : vector<10x16x128xf32> to vector<160x128xf32>
    %22 = vector.extract_strided_slice %13 {offsets = [1, 1, 0], sizes = [10, 16, 128], strides = [1, 1, 1]} : vector<12x18x128xf32> to vector<10x16x128xf32>
    %23 = vector.shape_cast %22 : vector<10x16x128xf32> to vector<160x128xf32>
    %24 = vector.extract_strided_slice %13 {offsets = [1, 2, 0], sizes = [10, 16, 128], strides = [1, 1, 1]} : vector<12x18x128xf32> to vector<10x16x128xf32>
    %25 = vector.shape_cast %24 : vector<10x16x128xf32> to vector<160x128xf32>
    %26 = vector.extract_strided_slice %13 {offsets = [2, 0, 0], sizes = [10, 16, 128], strides = [1, 1, 1]} : vector<12x18x128xf32> to vector<10x16x128xf32>
    %27 = vector.shape_cast %26 : vector<10x16x128xf32> to vector<160x128xf32>
    %28 = vector.extract_strided_slice %13 {offsets = [2, 1, 0], sizes = [10, 16, 128], strides = [1, 1, 1]} : vector<12x18x128xf32> to vector<10x16x128xf32>
    %29 = vector.shape_cast %28 : vector<10x16x128xf32> to vector<160x128xf32>
    %30 = vector.extract_strided_slice %13 {offsets = [2, 2, 0], sizes = [10, 16, 128], strides = [1, 1, 1]} : vector<12x18x128xf32> to vector<10x16x128xf32>
    %31 = vector.shape_cast %30 : vector<10x16x128xf32> to vector<160x128xf32>
    %32 = tpu.concatenate %15, %17, %19, %21, %23, %25, %27, %29, %31 in 1 : vector<160x128xf32>, vector<160x128xf32>, vector<160x128xf32>, vector<160x128xf32>, vector<160x128xf32>, vector<160x128xf32>, vector<160x128xf32>, vector<160x128xf32>, vector<160x128xf32> -> vector<160x1152xf32>
    %c0_12 = arith.constant 0 : index
    %c0_13 = arith.constant 0 : index
    %33 = vector.load %arg5[%c0_12, %c0_13] : memref<1152x128xf32, #tpu.memory_space<vmem>>, vector<1152x128xf32>
    %cst_14 = arith.constant dense<0.000000e+00> : vector<160x128xf32>
    %34 = tpu.matmul %32, %33, %cst_14 {dimension_numbers = #tpu.dot_dimension_numbers<[1], [0], [0], [1], [0, 0, 1, 1], [], []>} : vector<160x1152xf32>, vector<1152x128xf32>, vector<160x128xf32> -> vector<160x128xf32>
    %c0_15 = arith.constant 0 : index
    %c0_16 = arith.constant 0 : index
    %35 = vector.load %arg6[%c0_15, %c0_16] : memref<1x128xf32, #tpu.memory_space<vmem>>, vector<1x128xf32>
    %36 = vector.broadcast %35 : vector<1x128xf32> to vector<160x128xf32>
    %37 = arith.addf %34, %36 : vector<160x128xf32>
    %38 = arith.negf %37 : vector<160x128xf32>
    %39 = math.exp %38 : vector<160x128xf32>
    %cst_17 = arith.constant 1.000000e+00 : f32
    %40 = vector.broadcast %cst_17 : f32 to vector<160x128xf32>
    %41 = arith.addf %40, %39 : vector<160x128xf32>
    %42 = arith.divf %40, %41 : vector<160x128xf32>
    %43 = arith.mulf %37, %42 : vector<160x128xf32>
    %44 = vector.shape_cast %43 : vector<160x128xf32> to vector<10x16x128xf32>
    %c0_i32_18 = arith.constant 0 : i32
    %45 = arith.cmpi sgt, %arg1, %c0_i32_18 : i32
    %46 = vector.extract_strided_slice %44 {offsets = [0, 0, 0], sizes = [1, 16, 128], strides = [1, 1, 1]} : vector<10x16x128xf32> to vector<1x16x128xf32>
    %cst_19 = arith.constant 0.000000e+00 : f32
    %47 = vector.broadcast %cst_19 : f32 to vector<1x16x128xf32>
    %48 = arith.select %45, %46, %47 : vector<1x16x128xf32>
    %c1_i32_20 = arith.constant 1 : i32
    %49 = arith.addi %arg1, %c1_i32_20 : i32
    %c2_i32_21 = arith.constant 2 : i32
    %50 = arith.cmpi slt, %49, %c2_i32_21 : i32
    %51 = vector.extract_strided_slice %44 {offsets = [9, 0, 0], sizes = [1, 16, 128], strides = [1, 1, 1]} : vector<10x16x128xf32> to vector<1x16x128xf32>
    %cst_22 = arith.constant 0.000000e+00 : f32
    %52 = vector.broadcast %cst_22 : f32 to vector<1x16x128xf32>
    %53 = arith.select %50, %51, %52 : vector<1x16x128xf32>
    %54 = vector.extract_strided_slice %44 {offsets = [1, 0, 0], sizes = [8, 16, 128], strides = [1, 1, 1]} : vector<10x16x128xf32> to vector<8x16x128xf32>
    %55 = tpu.concatenate %48, %54, %53 in 0 : vector<1x16x128xf32>, vector<8x16x128xf32>, vector<1x16x128xf32> -> vector<10x16x128xf32>
    %cst_23 = arith.constant 0.000000e+00 : f32
    %56 = vector.broadcast %cst_23 : f32 to vector<10x1x128xf32>
    %57 = tpu.concatenate %56, %55, %56 in 1 : vector<10x1x128xf32>, vector<10x16x128xf32>, vector<10x1x128xf32> -> vector<10x18x128xf32>
    %58 = vector.extract_strided_slice %57 {offsets = [0, 0, 0], sizes = [8, 16, 128], strides = [1, 1, 1]} : vector<10x18x128xf32> to vector<8x16x128xf32>
    %59 = vector.shape_cast %58 : vector<8x16x128xf32> to vector<128x128xf32>
    %60 = vector.extract_strided_slice %57 {offsets = [0, 1, 0], sizes = [8, 16, 128], strides = [1, 1, 1]} : vector<10x18x128xf32> to vector<8x16x128xf32>
    %61 = vector.shape_cast %60 : vector<8x16x128xf32> to vector<128x128xf32>
    %62 = vector.extract_strided_slice %57 {offsets = [0, 2, 0], sizes = [8, 16, 128], strides = [1, 1, 1]} : vector<10x18x128xf32> to vector<8x16x128xf32>
    %63 = vector.shape_cast %62 : vector<8x16x128xf32> to vector<128x128xf32>
    %64 = vector.extract_strided_slice %57 {offsets = [1, 0, 0], sizes = [8, 16, 128], strides = [1, 1, 1]} : vector<10x18x128xf32> to vector<8x16x128xf32>
    %65 = vector.shape_cast %64 : vector<8x16x128xf32> to vector<128x128xf32>
    %66 = vector.extract_strided_slice %57 {offsets = [1, 1, 0], sizes = [8, 16, 128], strides = [1, 1, 1]} : vector<10x18x128xf32> to vector<8x16x128xf32>
    %67 = vector.shape_cast %66 : vector<8x16x128xf32> to vector<128x128xf32>
    %68 = vector.extract_strided_slice %57 {offsets = [1, 2, 0], sizes = [8, 16, 128], strides = [1, 1, 1]} : vector<10x18x128xf32> to vector<8x16x128xf32>
    %69 = vector.shape_cast %68 : vector<8x16x128xf32> to vector<128x128xf32>
    %70 = vector.extract_strided_slice %57 {offsets = [2, 0, 0], sizes = [8, 16, 128], strides = [1, 1, 1]} : vector<10x18x128xf32> to vector<8x16x128xf32>
    %71 = vector.shape_cast %70 : vector<8x16x128xf32> to vector<128x128xf32>
    %72 = vector.extract_strided_slice %57 {offsets = [2, 1, 0], sizes = [8, 16, 128], strides = [1, 1, 1]} : vector<10x18x128xf32> to vector<8x16x128xf32>
    %73 = vector.shape_cast %72 : vector<8x16x128xf32> to vector<128x128xf32>
    %74 = vector.extract_strided_slice %57 {offsets = [2, 2, 0], sizes = [8, 16, 128], strides = [1, 1, 1]} : vector<10x18x128xf32> to vector<8x16x128xf32>
    %75 = vector.shape_cast %74 : vector<8x16x128xf32> to vector<128x128xf32>
    %76 = tpu.concatenate %59, %61, %63, %65, %67, %69, %71, %73, %75 in 1 : vector<128x128xf32>, vector<128x128xf32>, vector<128x128xf32>, vector<128x128xf32>, vector<128x128xf32>, vector<128x128xf32>, vector<128x128xf32>, vector<128x128xf32>, vector<128x128xf32> -> vector<128x1152xf32>
    %c0_24 = arith.constant 0 : index
    %c0_25 = arith.constant 0 : index
    %77 = vector.load %arg7[%c0_24, %c0_25] : memref<1152x128xf32, #tpu.memory_space<vmem>>, vector<1152x128xf32>
    %cst_26 = arith.constant dense<0.000000e+00> : vector<128x128xf32>
    %78 = tpu.matmul %76, %77, %cst_26 {dimension_numbers = #tpu.dot_dimension_numbers<[1], [0], [0], [1], [0, 0, 1, 1], [], []>} : vector<128x1152xf32>, vector<1152x128xf32>, vector<128x128xf32> -> vector<128x128xf32>
    %c0_27 = arith.constant 0 : index
    %c0_28 = arith.constant 0 : index
    %79 = vector.load %arg8[%c0_27, %c0_28] : memref<1x128xf32, #tpu.memory_space<vmem>>, vector<1x128xf32>
    %80 = vector.broadcast %79 : vector<1x128xf32> to vector<128x128xf32>
    %81 = arith.addf %78, %80 : vector<128x128xf32>
    %82 = arith.negf %81 : vector<128x128xf32>
    %83 = math.exp %82 : vector<128x128xf32>
    %cst_29 = arith.constant 1.000000e+00 : f32
    %84 = vector.broadcast %cst_29 : f32 to vector<128x128xf32>
    %85 = arith.addf %84, %83 : vector<128x128xf32>
    %86 = arith.divf %84, %85 : vector<128x128xf32>
    %87 = arith.mulf %81, %86 : vector<128x128xf32>
    %88 = vector.extract_strided_slice %1 {offsets = [0, 1, 0], sizes = [8, 16, 128], strides = [1, 1, 1]} : vector<8x18x128xf32> to vector<8x16x128xf32>
    %89 = vector.shape_cast %88 : vector<8x16x128xf32> to vector<128x128xf32>
    %90 = arith.addf %89, %87 : vector<128x128xf32>
    %91 = vector.shape_cast %90 : vector<128x128xf32> to vector<8x16x128xf32>
    %c0_30 = arith.constant 0 : index
    %c0_31 = arith.constant 0 : index
    %c0_32 = arith.constant 0 : index
    %c0_33 = arith.constant 0 : index
    %92 = vector.load %arg9[%c0_30, %c0_31, %c0_32, %c0_33] : memref<1x8x16x128xf32, #tpu.memory_space<vmem>>, vector<1x8x16x128xf32>
    %93 = vector.shape_cast %92 : vector<1x8x16x128xf32> to vector<8x16x128xf32>
    %94 = vector.shape_cast %91 : vector<8x16x128xf32> to vector<1x8x16x128xf32>
    tpu.vector_store %arg9[%c0_30, %c0_31, %c0_32, %c0_33], %94 {strides = array<i32>} : memref<1x8x16x128xf32, #tpu.memory_space<vmem>>, vector<1x8x16x128xf32>,
    return
  }
  func.func @transform_0(%arg0: i32, %arg1: i32) -> (i32, i32, i32, i32) {
    %c4_i32 = arith.constant 4 : i32
    %0 = arith.muli %arg1, %c4_i32 : i32
    %c1_i32 = arith.constant 1 : i32
    %1 = arith.subi %0, %c1_i32 : i32
    %c0_i32 = arith.constant 0 : i32
    %2 = arith.maxsi %1, %c0_i32 : i32
    %c0_i32_0 = arith.constant 0 : i32
    %c0_i32_1 = arith.constant 0 : i32
    %c0_i32_2 = arith.constant 0 : i32
    return %arg0, %2, %c0_i32_0, %c0_i32_1 : i32, i32, i32, i32
  }
  func.func @transform_1(%arg0: i32, %arg1: i32) -> (i32, i32, i32, i32) {
    %c0_i32 = arith.constant 0 : i32
    %c0_i32_0 = arith.constant 0 : i32
    %c0_i32_1 = arith.constant 0 : i32
    return %arg0, %arg1, %c0_i32, %c0_i32_0 : i32, i32, i32, i32
  }
  func.func @transform_2(%arg0: i32, %arg1: i32) -> (i32, i32, i32, i32) {
    %c1_i32 = arith.constant 1 : i32
    %0 = arith.addi %arg1, %c1_i32 : i32
    %c4_i32 = arith.constant 4 : i32
    %1 = arith.muli %0, %c4_i32 : i32
    %c7_i32 = arith.constant 7 : i32
    %2 = arith.minsi %1, %c7_i32 : i32
    %c0_i32 = arith.constant 0 : i32
    %c0_i32_0 = arith.constant 0 : i32
    %c0_i32_1 = arith.constant 0 : i32
    return %arg0, %2, %c0_i32, %c0_i32_0 : i32, i32, i32, i32
  }
  func.func @transform_3(%arg0: i32, %arg1: i32) -> (i32, i32) {
    %c0_i32 = arith.constant 0 : i32
    %c0_i32_0 = arith.constant 0 : i32
    %c0_i32_1 = arith.constant 0 : i32
    return %c0_i32, %c0_i32_0 : i32, i32
  }
  func.func @transform_4(%arg0: i32, %arg1: i32) -> (i32, i32) {
    %c0_i32 = arith.constant 0 : i32
    %c0_i32_0 = arith.constant 0 : i32
    %c0_i32_1 = arith.constant 0 : i32
    return %c0_i32, %c0_i32_0 : i32, i32
  }
  func.func @transform_5(%arg0: i32, %arg1: i32) -> (i32, i32) {
    %c0_i32 = arith.constant 0 : i32
    %c0_i32_0 = arith.constant 0 : i32
    %c0_i32_1 = arith.constant 0 : i32
    return %c0_i32, %c0_i32_0 : i32, i32
  }
  func.func @transform_6(%arg0: i32, %arg1: i32) -> (i32, i32) {
    %c0_i32 = arith.constant 0 : i32
    %c0_i32_0 = arith.constant 0 : i32
    %c0_i32_1 = arith.constant 0 : i32
    return %c0_i32, %c0_i32_0 : i32, i32
  }
  func.func @transform_7(%arg0: i32, %arg1: i32) -> (i32, i32, i32, i32) {
    %c0_i32 = arith.constant 0 : i32
    %c0_i32_0 = arith.constant 0 : i32
    %c0_i32_1 = arith.constant 0 : i32
    return %arg0, %arg1, %c0_i32, %c0_i32_0 : i32, i32, i32, i32
  }
}

</mosaic_0001>

<bundles_post_ra>
// kernel: basic_block_3x3_reverse.1
= control target key start
LH: loop header
LB: loop body
LE: loop exit
PB: predicated region body
PF: predicated region fallthrough
CT: control target
= control target key end

     0   :  { %s4698_s24 = smov 0   ;;  %s4700_s25 = smov 0   ;;  %s7266_s0 = inlined_call_operand.vmem [shape: f32[2,16,18,128], index: 0, kind: input, shape index: {}, may-alias: {0,1,2}]   ;;  %s7267_s1 = inlined_call_operand.vmem [shape: f32[2,16,18,128], index: 1, kind: input, shape index: {}, may-alias: {0,1,2}]   ;;  %s7268_s2 = inlined_call_operand.vmem [shape: f32[2,16,18,128], index: 2, kind: input, shape index: {}, may-alias: {0,1,2}]   ;;  %s7269_s3 = inlined_call_operand.vmem [shape: f32[1152,128], index: 3, kind: input, shape index: {}]   ;;  %s7270_s4 = inlined_call_operand.vmem [shape: f32[1,128], index: 4, kind: input, shape index: {}]   ;;  %s7271_s5 = inlined_call_operand.vmem [shape: f32[1152,128], index: 5, kind: input, shape index: {}]   ;;  %s7272_s6 = inlined_call_operand.vmem [shape: f32[1,128], index: 6, kind: input, shape index: {}]   ;;  %s7273_s7 = inlined_call_operand.vmem [shape: f32[2,16,16,128], index: 7, kind: output, shape index: {}]  }
   0x1   :  { %s4702_s26 = smov 0   ;;  %s4704_s27 = smov 0  }
   0x2   :  { %s4706_s28 = smov 0  }
   0x3 LB: > { %s26_s29 = sadd.s32 1, %s4647_s26  ;;  %s29_s30 = sadd.s32 1, %s4651_s27  ;;  %s4655_s28 = sphi %s4706_s28, %s17_s28   ;;  %s4651_s27 = sphi %s4704_s27, %s7349_s27   ;;  %s4647_s26 = sphi %s4702_s26, %s7348_s26   ;;  %s4643_s25 = sphi %s4700_s25, %s7347_s25   ;;  %s4639_s24 = sphi %s4698_s24, %s7346_s24  }
   0x4   : > { %p27_p0 = scmp.ge.s32.totalorder %s26_s29, 2  ;;  %p3272_p1 = scmp.ge.s32.totalorder %s4655_s28, 1 }
   0x5   : > { %p327_p2 = scmp.lt.s32.totalorder %s4655_s28, 5 }
   0x6   : > { %s7351_s29 = smov (%p27_p0, %s26_s29), 0  ;;  %s7353_s30 = smov (!%p27_p0, %s29_s30), %s4651_s27 }
   0x7   : > { %p328_p3 = pnand %p3272_p1, %p327_p2  ;;  %p31_p4 = scmp.ge.s32.totalorder %s7353_s30, 2 }
   0x9   : > { %s7355_s30 = smov (%p31_p4, %s7353_s30), 0  ;;  %331 = sbr.rel (%p328_p3) target bundleno = 1112 (0x458), region = 48 }
  0x10   : > { %v720_v0 = vld [vmem:[%s7269_s3] sm:$0xff]  ;;  %v721_v1 = vld [vmem:[%s7269_s3 + $0x8] sm:$0xff]  ;;  %v722_v2 = vld [vmem:[%s7269_s3 + $0x10] sm:$0xff]  ;;  %s3273_s14 = sshll.u32 %s4639_s24, 2  ;;  %p402_p5 = scmp.lt.s32.totalorder %s4643_s25, 1  ;;  %v7274_v3 = vmov 0.0|0.0  }
  0x11   : > { %3898 = vmatprep.subr.bf16.mxu0 %v7274_v3  ;;  %v3899_v4 = vpack.c.bf16 %v721_v1, %v720_v0  ;;  %v723_v5 = vld [vmem:[%s7269_s3 + $0x18] sm:$0xff]  ;;  %s3274_s17 = sadd.s32 4294967295, %s3273_s14  ;;  %s3277_s18 = sshll.u32 %s4639_s24, 3  ;;  %v724_v7 = vld [vmem:[%s7269_s3 + $0x20] sm:$0xff]  ;;  %v725_v8 = vld [vmem:[%s7269_s3 + $0x28] sm:$0xff]  ;;  %v7297_v22 = vmov 0 }
  0x12   : > { %p399_p6 = scmp.gt.s32.totalorder %s3274_s17, 0  ;;  %p4750_p7 = scmp.lt.s32.totalorder %s3277_s18, 15  ;;  %v3902_v6 = vpack.c.bf16 %v723_v5, %v722_v2  ;;  %v3905_v9 = vpack.c.bf16 %v725_v8, %v724_v7  ;;  %v726_v10 = vld [vmem:[%s7269_s3 + $0x30] sm:$0xff]  ;;  %v727_v11 = vld [vmem:[%s7269_s3 + $0x38] sm:$0xff]  ;;  %v728_v13 = vld [vmem:[%s7269_s3 + $0x40] sm:$0xff]  ;;  %vm544_vm1 = vcmask 1046528  }
  0x13   : > { %3900 = vmatpush1.bf16.msra.mxu0 %v3899_v4  ;;  %s7357_s25 = smov (!%p402_p5, %s4643_s25), 1  ;;  %v3908_v12 = vpack.c.bf16 %v727_v11, %v726_v10  ;;  %v729_v14 = vld [vmem:[%s7269_s3 + $0x48] sm:$0xff]  ;;  %p481_p9 = scmp.gt.s32.totalorder %s4639_s24, 0  ;;  %v730_v16 = vld [vmem:[%s7269_s3 + $0x50] sm:$0xff]  ;;  %v731_v17 = vld [vmem:[%s7269_s3 + $0x58] sm:$0xff]  ;;  %vm615_vm2 = vcmask 1045504  }
  0x14   : > { %3901 = vmatprep.subr.bf16.mxu0 %v7274_v3  ;;  %s7359_s17 = smov (!%p399_p6, %s3274_s17), 0  ;;  %s4762_s9 = smul.u32 48, %s7357_s25  ;;  %v3911_v15 = vpack.c.bf16 %v729_v14, %v728_v13  ;;  %v3914_v21 = vpack.c.bf16 %v731_v17, %v730_v16  ;;  %v732_v23 = vld [vmem:[%s7269_s3 + $0x60] sm:$0xff]  ;;  %v733_v24 = vld [vmem:[%s7269_s3 + $0x68] sm:$0xff]  ;;  %v734_v31 = vld [vmem:[%s7269_s3 + $0x70] sm:$0xff]  ;;  %vm1860_vm4 = vcmask 1040384  }
  0x15   : > { %s3275_s8 = sshll.u32 %s7359_s17, 1  ;;  %s3284_s10 = sshll.u32 %s7357_s25, 5  ;;  %v3917_v29 = vpack.c.bf16 %v733_v24, %v732_v23  ;;  %v735_v32 = vld [vmem:[%s7269_s3 + $0x78] sm:$0xff]  ;;  %v736_v34 = vld [vmem:[%s7269_s3 + $0x80] sm:$0xff]  ;;  %v737_v35 = vld [vmem:[%s7269_s3 + $0x88] sm:$0xff] }
  0x16   : > { %p404_p8 = scmp.lt.s32.totalorder %s3275_s8, 15  ;;  %s7361_s18 = smov (!%p4750_p7, %s3277_s18), 15  ;;  %v3920_v33 = vpack.c.bf16 %v735_v32, %v734_v31  ;;  %v3923_v36 = vpack.c.bf16 %v737_v35, %v736_v34  ;;  %v738_v37 = vld [vmem:[%s7269_s3 + $0x90] sm:$0xff]  ;;  %v739_v38 = vld [vmem:[%s7269_s3 + $0x98] sm:$0xff]  ;;  %v740_v51 = vld [vmem:[%s7269_s3 + $0xa0] sm:$0xff] }
  0x17   : > { %3903 = vmatpush1.bf16.msra.mxu0 %v3902_v6  ;;  %s3283_s16 = sshll.u32 %s7361_s18, 1  ;;  %v3926_v45 = vpack.c.bf16 %v739_v38, %v738_v37  ;;  %v741_v52 = vld [vmem:[%s7269_s3 + $0xa8] sm:$0xff]  ;;  %v742_v4 = vld [vmem:[%s7269_s3 + $0xb0] sm:$0xff]  ;;  %v743_v5 = vld [vmem:[%s7269_s3 + $0xb8] sm:$0xff]  ;;  %s497_s21 = sadd.s32 1, %s4639_s24 }
  0x18   : > { %3904 = vmatprep.subr.bf16.mxu0 %v7274_v3  ;;  %s7363_s8 = smov (!%p404_p8, %s3275_s8), 15  ;;  %s4776_s25 = sadd.s32 %s3284_s10, %s3283_s16  ;;  %v3929_v1 = vpack.c.bf16 %v741_v52, %v740_v51  ;;  %v3932_v8 = vpack.c.bf16 %v743_v5, %v742_v4  ;;  %v745_v10 = vld [vmem:[%s7269_s3 + $0xc8] sm:$0xff]  ;;  %v747_v13 = vld [vmem:[%s7269_s3 + $0xd8] sm:$0xff]  ;;  %v752_v24 = vld [vmem:[%s7269_s3 + $0x100] sm:$0xff] }
  0x19   : > { %s4422_s17 = smul.u32 3, %s7363_s8  ;;  %v749_v16 = vld [vmem:[%s7269_s3 + $0xe8] sm:$0xff]  ;;  %v754_v31 = vld [vmem:[%s7269_s3 + $0x110] sm:$0xff]  ;;  %v755_v32 = vld [vmem:[%s7269_s3 + $0x118] sm:$0xff]  ;;  %p5317_p12 = scmp.lt.s32.totalorder %s497_s21, 2 }
  0x1a   : > { %v757_v37 = vld [vmem:[%s7269_s3 + $0x128] sm:$0xff]  ;;  %v764_v4 = vld [vmem:[%s7269_s3 + $0x160] sm:$0xff]  ;;  %vm6105_vm5 = vmneg %vm1860_vm4 }
  0x1b   : > { %3906 = vmatpush1.bf16.msra.mxu0 %v3905_v9  ;;  %s408_s19 = sadd.s32 %s4762_s9, %s4422_s17  ;;  %v744_v9 = vld [vmem:[%s7269_s3 + $0xc0] sm:$0xff]  ;;  %v765_v5 = vld [vmem:[%s7269_s3 + $0x168] sm:$0xff] }
  0x1c   : > { %3907 = vmatprep.subr.bf16.mxu0 %v7274_v3  ;;  %s3276_s11 = sshll.u32 %s408_s19, 3  ;;  %v3935_v11 = vpack.c.bf16 %v745_v10, %v744_v9  ;;  %v3965_v10 = vpack.c.bf16 %v765_v5, %v764_v4 }
  0x1d   : > { %s4790_s8 = scalar_lea.vmem %s7266_s0, %s3276_s11  ;;  %s4424_s11 = smul.u32 3, %s7361_s18 }
  0x1e   : > { %s488_s17 = scalar_select %p481_p9, 1, 0  ;;  %v4800_v18 = vld [vmem:[%s4790_s8] sm:$0xff]  ;;  %v4803_v19 = vld [vmem:[%s4790_s8 + $0x8] sm:$0xff]  ;;  %v484_v41 = vld [vmem:[%s4790_s8 + $0x10] sm:$0x3] }
  0x1f   : > { %3909 = vmatpush1.bf16.msra.mxu0 %v3908_v12  ;;  %s423_s18 = sadd.s32 %s4424_s11, %s4762_s9  ;;  %v4854_v42 = vld [vmem:[%s4790_s8 + $0x18] sm:$0xff]  ;;  %v4857_v43 = vld [vmem:[%s4790_s8 + $0x20] sm:$0xff]  ;;  %v487_v44 = vld [vmem:[%s4790_s8 + $0x28] sm:$0x3]  ;;  %s3391_s11 = sadd.s32 4, %s3273_s14 }
  0x20   : > { %3910 = vmatprep.subr.bf16.mxu0 %v7274_v3  ;;  %v489_v20 = vstv %s488_s17  ;;  %s3278_s22 = sshll.u32 %s423_s18, 3  ;;  %v746_v12 = vld [vmem:[%s7269_s3 + $0xd0] sm:$0xff]  ;;  %p429_p10 = scmp.lt.s32.totalorder %s3391_s11, 7 }
  0x21   : > { %vm4805_vm0 = vcmp.eq.s32.totalorder %v489_v20, 1  ;;  %s4862_s15 = scalar_lea.vmem %s7267_s1, %s3278_s22  ;;  %v3938_v14 = vpack.c.bf16 %v747_v13, %v746_v12  ;;  %v750_v20 = vld [vmem:[%s7269_s3 + $0xf0] sm:$0xff] }
  0x22   : > { %v7298_v22 = vsel %vm4805_vm0, 4294967295, %v7297_v22  ;;  %v491_v25 = vsel %vm4805_vm0, %v4800_v18, 0.0  ;;  %v4822_v26 = vsel %vm4805_vm0, %v4803_v19, 0.0  ;;  %v493_v46 = vsel %vm4805_vm0, %v484_v41, 0.0  ;;  %v4892_v54 = vld [vmem:[%s4862_s15] sm:$0xff]  ;;  %v4897_v57 = vld [vmem:[%s4862_s15 + $0x8] sm:$0xff] }
  0x23   : > { %3912 = vmatpush1.bf16.msra.mxu0 %v3911_v15  ;;  %7299 = vst [vmem:[#allocation2_spill] sm:$0xff] %v7298_v22  ;;  %v545_v27 = vrot.slane %v491_v25, 1  ;;  %v546_v28 = vrot.slane %v4822_v26, 1  ;;  %v616_v39 = vrot.slane %v491_v25, 2  ;;  %v617_v40 = vrot.slane %v4822_v26, 2  ;;  %v748_v15 = vld [vmem:[%s7269_s3 + $0xe0] sm:$0xff] }
  0x24   : > { %3913 = vmatprep.subr.bf16.mxu0 %v7274_v3  ;;  %v4870_v47 = vsel %vm4805_vm0, %v4854_v42, 0.0  ;;  %v4875_v48 = vsel %vm4805_vm0, %v4857_v43, 0.0  ;;  %v619_v50 = vrot.slane %v493_v46, 2  ;;  %v4889_v53 = vsel %vm4805_vm0, %v487_v44, 0.0  ;;  %v4900_v58 = vld [vmem:[%s4862_s15 + $0x10] sm:$0x3] }
  0x25   : > { %v547_v30 = vsel %vm544_vm1, %v545_v27, %v546_v28  ;;  %v4878_v49 = vsel %vm615_vm2, %v616_v39, %v617_v40  ;;  %v621_v55 = vrot.slane %v4870_v47, 2  ;;  %v622_v56 = vrot.slane %v4875_v48, 2  ;;  %v753_v25 = vld [vmem:[%s7269_s3 + $0x108] sm:$0xff]  ;;  %v758_v41 = vld [vmem:[%s7269_s3 + $0x130] sm:$0xff]  ;;  %v5025_v51 = vld [vmem:[%s4862_s15 + $0x20] sm:$0xff]  ;;  %s7365_s11 = smov (!%p429_p10, %s3391_s11), 7 }
  0x26   : > { %935 = vmatprep.mubr.f32.mxu0 %v547_v30  ;;  %v4903_v59 = vsel %vm615_vm2, %v617_v40, %v619_v50  ;;  %v624_v60 = vrot.slane %v4889_v53, 2  ;;  %v626_v61 = vrot.slane %v4892_v54, 2  ;;  %v627_v63 = vrot.slane %v4897_v57, 2  ;;  %v5022_v50 = vld [vmem:[%s4862_s15 + $0x18] sm:$0xff]  ;;  %v5171_v5 = vld [vmem:[%s4862_s15 + $0x80] sm:$0xff]  ;;  %s3280_s14 = sshll.u32 %s7365_s11, 1 }
  0x27   : > { %3915 = vmatpush1.bf16.msra.mxu0 %v3914_v21  ;;  %v4908_v62 = vsel %vm615_vm2, %v621_v55, %v622_v56  ;;  %v629_v0 = vrot.slane %v4900_v58, 2  ;;  %v3941_v17 = vpack.c.bf16 %v749_v16, %v748_v15  ;;  %v751_v21 = vld [vmem:[%s7269_s3 + $0xf8] sm:$0xff]  ;;  %v548_v27 = vrot.slane %v493_v46, 1  ;;  %v5080_v16 = vld [vmem:[%s4862_s15 + $0x40] sm:$0x3]  ;;  %7309 = vst [vmem:[#allocation12_spill] sm:$0xff] %v5171_v5 }
  0x28   : > { %3916 = vmatprep.subr.bf16.mxu0 %v7274_v3  ;;  %v4913_v2 = vsel %vm615_vm2, %v622_v56, %v624_v60  ;;  %v4923_v6 = vsel %vm615_vm2, %v626_v61, %v627_v63  ;;  %v3944_v23 = vpack.c.bf16 %v751_v21, %v750_v20  ;;  %v551_v34 = vrot.slane %v4875_v48, 1  ;;  %v761_v48 = vld [vmem:[%s7269_s3 + $0x148] sm:$0xff]  ;;  %v763_v60 = vld [vmem:[%s7269_s3 + $0x158] sm:$0xff]  ;;  %p434_p11 = scmp.lt.s32.totalorder %s3280_s14, 15 }
  0x29   : > { %v4926_v7 = vsel %vm615_vm2, %v627_v63, %v629_v0  ;;  %3812 = vmatprep.mubr.f32.mxu1 %v4923_v6  ;;  %v549_v30 = vsel %vm544_vm1, %v546_v28, %v548_v27  ;;  %v3950_v26 = vpack.c.bf16 %v755_v32, %v754_v31  ;;  %v553_v35 = vrot.slane %v4889_v53, 1  ;;  %v5044_v61 = vld [vmem:[%s4862_s15 + $0x28] sm:$0x3]  ;;  %v5063_v9 = vld [vmem:[%s4862_s15 + $0x38] sm:$0xff]  ;;  %v5099_v27 = vld [vmem:[%s4862_s15 + $0x50] sm:$0xff] }
  0x2a   : > { %v555_v39 = vrot.slane %v4892_v54, 1  ;;  %v556_v40 = vrot.slane %v4897_v57, 1  ;;  %v558_v46 = vrot.slane %v4900_v58, 1  ;;  %v560_v55 = vrot.slane %v5022_v50, 1  ;;  %v762_v58 = vld [vmem:[%s7269_s3 + $0x150] sm:$0xff]  ;;  %v767_v15 = vld [vmem:[%s7269_s3 + $0x178] sm:$0xff] }
  0x2b   : > { %3918 = vmatpush1.bf16.msra.mxu0 %v3917_v29  ;;  %v3947_v29 = vpack.c.bf16 %v753_v25, %v752_v24  ;;  %v4996_v38 = vsel %vm544_vm1, %v551_v34, %v553_v35  ;;  %v561_v56 = vrot.slane %v5025_v51, 1  ;;  %v3962_v63 = vpack.c.bf16 %v763_v60, %v762_v58  ;;  %v769_v24 = vld [vmem:[%s7269_s3 + $0x188] sm:$0xff]  ;;  %v5168_v4 = vld [vmem:[%s4862_s15 + $0x78] sm:$0xff]  ;;  %s7367_s14 = smov (!%p434_p11, %s3280_s14), 15 }
  0x2c   : > { %3919 = vmatprep.subr.bf16.mxu0 %v7274_v3  ;;  %v5032_v53 = vsel %vm544_vm1, %v556_v40, %v558_v46  ;;  %v566_v13 = vrot.slane %v5063_v9, 1  ;;  %v568_v21 = vrot.slane %v5080_v16, 1  ;;  %v5096_v25 = vld [vmem:[%s4862_s15 + $0x48] sm:$0xff]  ;;  %v571_v32 = vrot.slane %v5099_v27, 1  ;;  %s4425_s22 = smul.u32 3, %s7367_s14 }
  0x2d   : > { %7301 = vst [vmem:[#allocation4_spill] sm:$0xff] %v5032_v53  ;;  %v5049_v0 = vsel %vm544_vm1, %v560_v55, %v561_v56  ;;  %v570_v31 = vrot.slane %v5096_v25, 1  ;;  %v5152_v55 = vld [vmem:[%s4862_s15 + $0x70] sm:$0x3]  ;;  %s505_s23 = scalar_select %p5317_p12, 1, 0 }
  0x2e   : > { %7302 = vst [vmem:[#allocation5_spill] sm:$0xff] %v5049_v0  ;;  %v578_v60 = vrot.slane %v5152_v55, 1  ;;  %s438_s18 = sadd.s32 %s4425_s22, %s4762_s9 }
  0x2f   : > { %3921 = vmatpush1.bf16.msra.mxu0 %v3920_v33  ;;  %v550_v33 = vrot.slane %v4870_v47, 1  ;;  %v760_v47 = vld [vmem:[%s7269_s3 + $0x140] sm:$0xff]  ;;  %s3281_s11 = sshll.u32 %s438_s18, 3  ;;  %s3285_s18 = sshll.u32 %s4776_s25, 3 }
  0x30   : > { %3922 = vmatprep.subr.bf16.mxu0 %v7274_v3  ;;  %v3959_v52 = vpack.c.bf16 %v761_v48, %v760_v47  ;;  %v774_v48 = vld [vmem:[%s7269_s3 + $0x1b0] sm:$0xff]  ;;  %s5357_s16 = scalar_lea.vmem %s7268_s2, %s3281_s11  ;;  %s7197_s17 = scalar_lea.vmem %s7273_s7, %s3285_s18 }
  0x31   : > { %v4981_v28 = vsel %vm544_vm1, %v550_v33, %v551_v34  ;;  %v770_v33 = vld [vmem:[%s7269_s3 + $0x190] sm:$0xff]  ;;  %v771_v34 = vld [vmem:[%s7269_s3 + $0x198] sm:$0xff] }
  0x32   : > { %v3974_v35 = vpack.c.bf16 %v771_v34, %v770_v33  ;;  %v5204_v33 = vld [vmem:[%s4862_s15 + $0x90] sm:$0xff]  ;;  %v5207_v34 = vld [vmem:[%s4862_s15 + $0x98] sm:$0xff] }
  0x33   : > { %3924 = vmatpush1.bf16.msra.mxu0 %v3923_v36  ;;  %v756_v36 = vld [vmem:[%s7269_s3 + $0x120] sm:$0xff]  ;;  %7312 = vst [vmem:[#allocation15_spill] sm:$0xff] %v5204_v33  ;;  %v657_v22 = vrot.slane %v5207_v34, 2 }
  0x34   : > { %3925 = vmatprep.subr.bf16.mxu0 %v7274_v3 }
  0x37   : > { %3927 = vmatpush1.bf16.msra.mxu0 %v3926_v45  ;;  %v5011_v45 = vsel %vm544_vm1, %v555_v39, %v556_v40  ;;  %v773_v39 = vld [vmem:[%s7269_s3 + $0x1a8] sm:$0xff]  ;;  %v5132_v40 = vld [vmem:[%s4862_s15 + $0x60] sm:$0xff] }
  0x38   : > { %3928 = vmatprep.subr.bf16.mxu0 %v7274_v3  ;;  %7300 = vst [vmem:[#allocation3_spill] sm:$0xff] %v5011_v45  ;;  %v575_v46 = vrot.slane %v5132_v40, 1 }
  0x3b   : > { %3930 = vmatpush1.bf16.msra.mxu0 %v3929_v1  ;;  %v563_v1 = vrot.slane %v5044_v61, 1 }
  0x3c   : > { %3931 = vmatprep.subr.bf16.mxu0 %v7274_v3 }
  0x3f   : > { %3933 = vmatpush1.bf16.msra.mxu0 %v3932_v8  ;;  %v5060_v8 = vld [vmem:[%s4862_s15 + $0x30] sm:$0xff] }
  0x40   : > { %3934 = vmatprep.subr.bf16.mxu0 %v7274_v3  ;;  %v565_v12 = vrot.slane %v5060_v8, 1 }
  0x42   : > { %v5085_v20 = vsel %vm544_vm1, %v565_v12, %v566_v13 }
  0x43   : > { %3936 = vmatpush1.bf16.msra.mxu0 %v3935_v11  ;;  %v5068_v11 = vsel %vm544_vm1, %v561_v56, %v563_v1  ;;  %7304 = vst [vmem:[#allocation7_spill] sm:$0xff] %v5085_v20  ;;  %v777_v1 = vld [vmem:[%s7269_s3 + $0x1c8] sm:$0xff] }
  0x44   : > { %3937 = vmatprep.subr.bf16.mxu0 %v7274_v3  ;;  %7303 = vst [vmem:[#allocation6_spill] sm:$0xff] %v5068_v11 }
  0x47   : > { %3939 = vmatpush1.bf16.msra.mxu0 %v3938_v14  ;;  %v766_v14 = vld [vmem:[%s7269_s3 + $0x170] sm:$0xff] }
  0x48   : > { %3940 = vmatprep.subr.bf16.mxu0 %v7274_v3 }
  0x4b   : > { %3942 = vmatpush1.bf16.msra.mxu0 %v3941_v17  ;;  %v3968_v17 = vpack.c.bf16 %v767_v15, %v766_v14  ;;  %v581_v14 = vrot.slane %v5171_v5, 1  ;;  %v778_v15 = vld [vmem:[%s7269_s3 + $0x1d0] sm:$0xff] }
  0x4c   : > { %3943 = vmatprep.subr.bf16.mxu0 %v7274_v3 }
  0x4f   : > { %3945 = vmatpush1.bf16.msra.mxu0 %v3944_v23  ;;  %v768_v23 = vld [vmem:[%s7269_s3 + $0x180] sm:$0xff] }
  0x50   : > { %3946 = vmatprep.subr.bf16.mxu0 %v7274_v3 }
  0x52   : > { %3287 = vmatmul.mubr.msk.f32.vlgmr.msra.gmra.mrb[0].mxu0 %vm4805_vm0, %v4800_v18  ;;  %v3953_v18 = vpack.c.bf16 %v757_v37, %v756_v36  ;;  %v5121_v36 = vsel %vm544_vm1, %v570_v31, %v571_v32  ;;  %v780_v31 = vld [vmem:[%s7269_s3 + $0x1e0] sm:$0xff] }
  0x53   : > { %3948 = vmatpush1.bf16.msra.mxu0 %v3947_v29  ;;  %940 = vmatprep.mubr.f32.mxu0 %v549_v30  ;;  %v3971_v29 = vpack.c.bf16 %v769_v24, %v768_v23  ;;  %v5104_v30 = vsel %vm544_vm1, %v566_v13, %v568_v21  ;;  %7306 = vst [vmem:[#allocation9_spill] sm:$0xff] %v5121_v36  ;;  %v580_v13 = vrot.slane %v5168_v4, 1  ;;  %v5188_v21 = vld [vmem:[%s4862_s15 + $0x88] sm:$0x3] }
  0x54   : > { %3949 = vmatprep.subr.bf16.mxu0 %v7274_v3  ;;  %7305 = vst [vmem:[#allocation8_spill] sm:$0xff] %v5104_v30 }
  0x55   : > { %v5193_v24 = vsel %vm544_vm1, %v580_v13, %v581_v14 }
  0x56   : > { %3288 = vmatmul.mubr.msk.f32.gmra.mrb[2].mxu0 %vm4805_vm0, %v4803_v19  ;;  %v759_v19 = vld [vmem:[%s7269_s3 + $0x138] sm:$0xff]  ;;  %7311 = vst [vmem:[#allocation14_spill] sm:$0xff] %v5193_v24 }
  0x57   : > { %3951 = vmatpush1.bf16.msra.mxu0 %v3950_v26  ;;  %945 = vmatprep.mubr.f32.mxu0 %v4981_v28  ;;  %v3956_v44 = vpack.c.bf16 %v759_v19, %v758_v41  ;;  %v5116_v26 = vld [vmem:[%s4862_s15 + $0x58] sm:$0x3]  ;;  %v5135_v41 = vld [vmem:[%s4862_s15 + $0x68] sm:$0xff] }
  0x58   : > { %3952 = vmatprep.subr.bf16.mxu0 %v7274_v3  ;;  %v573_v37 = vrot.slane %v5116_v26, 1  ;;  %v576_v47 = vrot.slane %v5135_v41, 1 }
  0x5a   : > { %3289 = vmatmul.mubr.msk.f32.gmra.mrb[4].mxu0 %vm4805_vm0, %v4854_v42  ;;  %v5157_v58 = vsel %vm544_vm1, %v575_v46, %v576_v47  ;;  %v5176_v12 = vsel %vm544_vm1, %v576_v47, %v578_v60  ;;  %v783_v46 = vld [vmem:[%s7269_s3 + $0x1f8] sm:$0xff]  ;;  %v5224_v47 = vld [vmem:[%s4862_s15 + $0xa0] sm:$0x3]  ;;  %v5234_v60 = vld [vmem:[%s4862_s15 + $0xa8] sm:$0xff] }
  0x5b   : > { %950 = vmatprep.mubr.f32.mxu0 %v4996_v38  ;;  %3954 = vmatpush1.bf16.msra.mxu0 %v3953_v18  ;;  %v772_v18 = vld [vmem:[%s7269_s3 + $0x1a0] sm:$0xff]  ;;  %7308 = vst [vmem:[#allocation11_spill] sm:$0xff] %v5157_v58  ;;  %7310 = vst [vmem:[#allocation13_spill] sm:$0xff] %v5176_v12 }
  0x5c   : > { %3955 = vmatprep.subr.bf16.mxu0 %v7274_v3  ;;  %v3977_v19 = vpack.c.bf16 %v773_v39, %v772_v18  ;;  %v585_v18 = vrot.slane %v5204_v33, 1  ;;  %v586_v39 = vrot.slane %v5207_v34, 1 }
  0x5e   : > { %3290 = vmatmul.mubr.msk.f32.gmra.mrb[6].mxu0 %vm4805_vm0, %v4857_v43 }
  0x5f   : > { %955 = vmatprep.mubr.f32.mxu0 %v5011_v45  ;;  %3957 = vmatpush1.bf16.msra.mxu0 %v3956_v44  ;;  %v5140_v44 = vsel %vm544_vm1, %v571_v32, %v573_v37  ;;  %v781_v32 = vld [vmem:[%s7269_s3 + $0x1e8] sm:$0xff] }
  0x60   : > { %3958 = vmatprep.subr.bf16.mxu0 %v7274_v3  ;;  %7307 = vst [vmem:[#allocation10_spill] sm:$0xff] %v5140_v44 }
  0x62   : > { %956 = vmatmul.mubr.f32.gmra.mrb[8].mxu0 %v4892_v54 }
  0x63   : > { %960 = vmatprep.mubr.f32.mxu0 %v5032_v53  ;;  %3960 = vmatpush1.bf16.msra.mxu0 %v3959_v52  ;;  %v775_v52 = vld [vmem:[%s7269_s3 + $0x1b8] sm:$0xff] }
  0x64   : > { %3961 = vmatprep.subr.bf16.mxu0 %v7274_v3  ;;  %v3980_v56 = vpack.c.bf16 %v775_v52, %v774_v48  ;;  %v5229_v52 = vsel %vm544_vm1, %v585_v18, %v586_v39  ;;  %v787_v18 = vld [vmem:[%s7269_s3 + $0x218] sm:$0xff] }
  0x65   : > { %7314 = vst [vmem:[#allocation17_spill] sm:$0xff] %v5229_v52 }
  0x66   : > { %961 = vmatmul.mubr.f32.gmra.mrb[10].mxu0 %v4897_v57 }
  0x67   : > { %965 = vmatprep.mubr.f32.mxu0 %v5049_v0  ;;  %3963 = vmatpush1.bf16.msra.mxu0 %v3962_v63  ;;  %v776_v63 = vld [vmem:[%s7269_s3 + $0x1c0] sm:$0xff] }
  0x68   : > { %3964 = vmatprep.subr.bf16.mxu0 %v7274_v3 }
  0x6a   : > { %966 = vmatmul.mubr.f32.gmra.mrb[12].mxu0 %v5022_v50 }
  0x6b   : > { %970 = vmatprep.mubr.f32.mxu0 %v5068_v11  ;;  %3966 = vmatpush1.bf16.msra.mxu0 %v3965_v10  ;;  %v3983_v10 = vpack.c.bf16 %v777_v1, %v776_v63  ;;  %v5237_v63 = vld [vmem:[%s4862_s15 + $0xb0] sm:$0xff] }
  0x6c   : > { %3967 = vmatprep.subr.bf16.mxu0 %v7274_v3  ;;  %v591_v13 = vrot.slane %v5237_v63, 1 }
  0x6e   : > { %971 = vmatmul.mubr.f32.gmra.mrb[14].mxu0 %v5025_v51 }
  0x6f   : > { %975 = vmatprep.mubr.f32.mxu0 %v5085_v20  ;;  %3969 = vmatpush1.bf16.msra.mxu0 %v3968_v17  ;;  %v779_v17 = vld [vmem:[%s7269_s3 + $0x1d8] sm:$0xff] }
  0x70   : > { %3970 = vmatprep.subr.bf16.mxu0 %v7274_v3  ;;  %v3986_v23 = vpack.c.bf16 %v779_v17, %v778_v15 }
  0x72   : > { %976 = vmatmul.mubr.f32.gmra.mrb[16].mxu0 %v5060_v8 }
  0x73   : > { %980 = vmatprep.mubr.f32.mxu0 %v5104_v30  ;;  %3972 = vmatpush1.bf16.msra.mxu0 %v3971_v29  ;;  %v583_v29 = vrot.slane %v5188_v21, 1 }
  0x74   : > { %3973 = vmatprep.subr.bf16.mxu0 %v7274_v3 }
  0x75   : > { %v5212_v37 = vsel %vm544_vm1, %v581_v14, %v583_v29  ;;  %v5250_v14 = vld [vmem:[%s4862_s15 + $0xb8] sm:$0x3]  ;;  %v784_v29 = vld [vmem:[%s7269_s3 + $0x200] sm:$0xff] }
  0x76   : > { %981 = vmatmul.mubr.f32.gmra.mrb[18].mxu0 %v5063_v9  ;;  %7313 = vst [vmem:[#allocation16_spill] sm:$0xff] %v5212_v37  ;;  %v593_v17 = vrot.slane %v5250_v14, 1 }
  0x77   : > { %985 = vmatprep.mubr.f32.mxu0 %v5121_v36  ;;  %3975 = vmatpush1.bf16.msra.mxu0 %v3974_v35  ;;  %v3989_v35 = vpack.c.bf16 %v781_v32, %v780_v31  ;;  %v785_v31 = vld [vmem:[%s7269_s3 + $0x208] sm:$0xff] }
  0x78   : > { %3976 = vmatprep.subr.bf16.mxu0 %v7274_v3  ;;  %v3995_v32 = vpack.c.bf16 %v785_v31, %v784_v29  ;;  %v791_v29 = vld [vmem:[%s7269_s3 + $0x238] sm:$0xff] }
  0x7a   : > { %986 = vmatmul.mubr.f32.gmra.mrb[20].mxu0 %v5096_v25 }
  0x7b   : > { %990 = vmatprep.mubr.f32.mxu0 %v5140_v44  ;;  %3978 = vmatpush1.bf16.msra.mxu0 %v3977_v19  ;;  %v782_v19 = vld [vmem:[%s7269_s3 + $0x1f0] sm:$0xff] }
  0x7c   : > { %3979 = vmatprep.subr.bf16.mxu0 %v7274_v3  ;;  %v3992_v48 = vpack.c.bf16 %v783_v46, %v782_v19  ;;  %v849_v19 = vld [vmem:[%s7269_s3 + $0x408] sm:$0xff] }
  0x7e   : > { %991 = vmatmul.mubr.f32.gmra.mrb[22].mxu0 %v5099_v27 }
  0x7f   : > { %995 = vmatprep.mubr.f32.mxu0 %v5157_v58  ;;  %3981 = vmatpush1.bf16.msra.mxu0 %v3980_v56  ;;  %v588_v56 = vrot.slane %v5224_v47, 1 }
  0x80   : > { %3982 = vmatprep.subr.bf16.mxu0 %v7274_v3 }
  0x81   : > { %v5242_v1 = vsel %vm544_vm1, %v586_v39, %v588_v56  ;;  %v848_v39 = vld [vmem:[%s7269_s3 + $0x400] sm:$0xff]  ;;  %v789_v56 = vld [vmem:[%s7269_s3 + $0x228] sm:$0xff] }
  0x82   : > { %996 = vmatmul.mubr.f32.gmra.mrb[24].mxu0 %v5132_v40  ;;  %7315 = vst [vmem:[#allocation18_spill] sm:$0xff] %v5242_v1  ;;  %v4090_v46 = vpack.c.bf16 %v849_v19, %v848_v39  ;;  %v854_v39 = vld [vmem:[%s7269_s3 + $0x430] sm:$0xff] }
  0x83   : > { %1000 = vmatprep.mubr.f32.mxu0 %v5176_v12  ;;  %3984 = vmatpush1.bf16.msra.mxu0 %v3983_v10  ;;  %v590_v10 = vrot.slane %v5234_v60, 1 }
  0x84   : > { %3985 = vmatprep.subr.bf16.mxu0 %v7274_v3  ;;  %4091 = vmatprep.subr.bf16.mxu1 %v4090_v46 }
  0x85   : > { %v5255_v15 = vsel %vm544_vm1, %v590_v10, %v591_v13  ;;  %4093 = vmatpush3.bf16.msra.mxu1 %v4090_v46 }
  0x86   : > { %1001 = vmatmul.mubr.f32.gmra.mrb[26].mxu0 %v5135_v41  ;;  %7316 = vst [vmem:[#allocation19_spill] sm:$0xff] %v5255_v15 }
  0x87   : > { %1005 = vmatprep.mubr.f32.mxu0 %v5193_v24  ;;  %3987 = vmatpush1.bf16.msra.mxu0 %v3986_v23  ;;  %v5261_v23 = vsel %vm544_vm1, %v591_v13, %v593_v17  ;;  %v790_v17 = vld [vmem:[%s7269_s3 + $0x230] sm:$0xff] }
  0x88   : > { %3988 = vmatprep.subr.bf16.mxu0 %v7274_v3  ;;  %7317 = vst [vmem:[#allocation20_spill] sm:$0xff] %v5261_v23 }
  0x8a   : > { %1006 = vmatmul.mubr.f32.gmra.mrb[28].mxu0 %v5168_v4 }
  0x8b   : > { %1010 = vmatprep.mubr.f32.mxu0 %v5212_v37  ;;  %3990 = vmatpush1.bf16.msra.mxu0 %v3989_v35  ;;  %v786_v35 = vld [vmem:[%s7269_s3 + $0x210] sm:$0xff] }
  0x8c   : > { %3991 = vmatprep.subr.bf16.mxu0 %v7274_v3 }
  0x8e   : > { %1011 = vmatmul.mubr.f32.gmra.mrb[30].mxu0 %v5171_v5 }
  0x8f   : > { %1015 = vmatprep.mubr.f32.mxu0 %v5229_v52  ;;  %3993 = vmatpush1.bf16.msra.mxu0 %v3992_v48  ;;  %v788_v48 = vld [vmem:[%s7269_s3 + $0x220] sm:$0xff] }
  0x90   : > { %3994 = vmatprep.subr.bf16.mxu0 %v7274_v3  ;;  %v4001_v13 = vpack.c.bf16 %v789_v56, %v788_v48  ;;  %v795_v48 = vld [vmem:[%s7269_s3 + $0x258] sm:$0xff]  ;;  %v5359_v56 = vstv %s505_s23 }
  0x91   : > { %vm507_vm3 = vcmp.eq.s32.totalorder %v5359_v56, 1  ;;  %v2170_v56 = vld [vmem:[%s7271_s5 + $0x228] sm:$0xff] }
  0x92   : > { %1016 = vmatmul.mubr.f32.gmra.mrb[32].mxu0 %v5204_v33 }
  0x93   : > { %1020 = vmatprep.mubr.f32.mxu0 %v5242_v1 }
  0x96   : > { %1021 = vmatmul.mubr.f32.gmra.mrb[34].mxu0 %v5207_v34 }
  0x97   : > { %1025 = vmatprep.mubr.f32.mxu0 %v5255_v15 }
  0x9a   : > { %1026 = vmatmul.mubr.f32.gmra.mrb[36].mxu0 %v5234_v60 }
  0x9b   : > { %1030 = vmatprep.mubr.f32.mxu0 %v5261_v23 }
  0x9e   : > { %1031 = vmatmul.mubr.f32.gmra.mrb[38].mxu0 %v5237_v63 }
  0x9f   : > { %3291 = vmatprep.mubr.msk.f32.mxu0 %vm4805_vm0, %v4854_v42  ;;  %v3998_v42 = vpack.c.bf16 %v787_v18, %v786_v35  ;;  %v792_v35 = vld [vmem:[%s7269_s3 + $0x240] sm:$0xff]  ;;  %v793_v18 = vld [vmem:[%s7269_s3 + $0x248] sm:$0xff] }
  0xa0   : > { %v4007_v46 = vpack.c.bf16 %v793_v18, %v792_v35  ;;  %v858_v35 = vld [vmem:[%s7269_s3 + $0x450] sm:$0xff]  ;;  %v859_v18 = vld [vmem:[%s7269_s3 + $0x458] sm:$0xff] }
  0xa2   : > { %1101 = vmatmul.mubr.f32.vlgmr.msra.gmra.mrb[0].mxu0 %v4878_v49  ;;  %v850_v49 = vld [vmem:[%s7269_s3 + $0x410] sm:$0xff] }
  0xa3   : > { %3996 = vmatpush1.bf16.msra.mxu0 %v3995_v32  ;;  %3292 = vmatprep.mubr.msk.f32.mxu0 %vm4805_vm0, %v4857_v43  ;;  %v851_v43 = vld [vmem:[%s7269_s3 + $0x418] sm:$0xff]  ;;  %v4004_v32 = vpack.c.bf16 %v791_v29, %v790_v17  ;;  %v632_v17 = vrot.slane %v5025_v51, 2 }
  0xa4   : > { %3997 = vmatprep.subr.bf16.mxu0 %v7274_v3  ;;  %v4094_v10 = vpack.c.bf16 %v851_v43, %v850_v49  ;;  %v856_v49 = vld [vmem:[%s7269_s3 + $0x440] sm:$0xff]  ;;  %v857_v43 = vld [vmem:[%s7269_s3 + $0x448] sm:$0xff] }
  0xa6   : > { %1106 = vmatmul.mubr.f32.gmra.mrb[2].mxu0 %v4903_v59  ;;  %4095 = vmatprep.subr.bf16.mxu1 %v4094_v10  ;;  %v853_v59 = vld [vmem:[%s7269_s3 + $0x428] sm:$0xff] }
  0xa7   : > { %3999 = vmatpush1.bf16.msra.mxu0 %v3998_v42  ;;  %1110 = vmatprep.mubr.f32.mxu0 %v4892_v54  ;;  %v852_v54 = vld [vmem:[%s7269_s3 + $0x420] sm:$0xff]  ;;  %v794_v42 = vld [vmem:[%s7269_s3 + $0x250] sm:$0xff] }
  0xa8   : > { %4000 = vmatprep.subr.bf16.mxu0 %v7274_v3  ;;  %4097 = vmatpush3.bf16.msra.mxu1 %v4094_v10  ;;  %v4098_v31 = vpack.c.bf16 %v853_v59, %v852_v54  ;;  %v4106_v10 = vpack.c.bf16 %v857_v43, %v856_v49  ;;  %v4010_v29 = vpack.c.bf16 %v795_v48, %v794_v42  ;;  %v796_v54 = vld [vmem:[%s7269_s3 + $0x260] sm:$0xff]  ;;  %v798_v42 = vld [vmem:[%s7269_s3 + $0x270] sm:$0xff]  ;;  %v799_v48 = vld [vmem:[%s7269_s3 + $0x278] sm:$0xff] }
  0xa9   : > { %v5375_v59 = vld [vmem:[%s5357_s16] sm:$0xff] }
  0xaa   : > { %1111 = vmatmul.mubr.f32.gmra.mrb[4].mxu0 %v4908_v62  ;;  %4099 = vmatprep.subr.bf16.mxu1 %v4098_v31 }
  0xab   : > { %1115 = vmatprep.mubr.f32.mxu0 %v4897_v57  ;;  %4002 = vmatpush1.bf16.msra.mxu0 %v4001_v13  ;;  %v855_v57 = vld [vmem:[%s7269_s3 + $0x438] sm:$0xff]  ;;  %v631_v13 = vrot.slane %v5022_v50, 2 }
  0xac   : > { %4003 = vmatprep.subr.bf16.mxu0 %v7274_v3  ;;  %4101 = vmatpush3.bf16.msra.mxu1 %v4098_v31  ;;  %v4102_v19 = vpack.c.bf16 %v855_v57, %v854_v39  ;;  %v5379_v31 = vld [vmem:[%s5357_s16 + $0x8] sm:$0xff]  ;;  %v4110_v39 = vpack.c.bf16 %v859_v18, %v858_v35  ;;  %v634_v57 = vrot.slane %v5044_v61, 2  ;;  %v860_v61 = vld [vmem:[%s7269_s3 + $0x460] sm:$0xff]  ;;  %v636_v18 = vrot.slane %v5060_v8, 2 }
  0xae   : > { %1116 = vmatmul.mubr.f32.gmra.mrb[6].mxu0 %v4913_v2  ;;  %4103 = vmatprep.subr.bf16.mxu1 %v4102_v19  ;;  %v5432_v35 = vsel %vm615_vm2, %v632_v17, %v634_v57  ;;  %v863_v57 = vld [vmem:[%s7269_s3 + $0x478] sm:$0xff] }
  0xaf   : > { %1120 = vmatprep.mubr.f32.mxu0 %v5022_v50  ;;  %4005 = vmatpush1.bf16.msra.mxu0 %v4004_v32  ;;  %v797_v32 = vld [vmem:[%s7269_s3 + $0x268] sm:$0xff]  ;;  %v5388_v50 = vsel %vm507_vm3, %v5375_v59, 0.0 }
  0xb0   : > { %4006 = vmatprep.subr.bf16.mxu0 %v7274_v3  ;;  %4105 = vmatpush3.bf16.msra.mxu1 %v4102_v19  ;;  %v5405_v19 = vsel %vm615_vm2, %v631_v13, %v632_v17  ;;  %v689_v49 = vrot.slane %v5388_v50, 1  ;;  %v501_v13 = vld [vmem:[%s5357_s16 + $0x10] sm:$0x3]  ;;  %v801_v17 = vld [vmem:[%s7269_s3 + $0x288] sm:$0xff] }
  0xb1   : > { %4107 = vmatprep.subr.bf16.mxu1 %v4106_v10 }
  0xb2   : > { %1121 = vmatmul.mubr.f32.gmra.mrb[8].mxu0 %v4923_v6 }
  0xb3   : > { %1125 = vmatprep.mubr.f32.mxu0 %v5025_v51  ;;  %4008 = vmatpush1.bf16.msra.mxu0 %v4007_v46  ;;  %v5393_v51 = vsel %vm507_vm3, %v5379_v31, 0.0  ;;  %v4013_v46 = vpack.c.bf16 %v797_v32, %v796_v54  ;;  %v5428_v32 = vsel %vm507_vm3, %v501_v13, 0.0 }
  0xb4   : > { %4009 = vmatprep.subr.bf16.mxu0 %v7274_v3  ;;  %4109 = vmatpush3.bf16.msra.mxu1 %v4106_v10  ;;  %v690_v43 = vrot.slane %v5393_v51, 1  ;;  %v861_v10 = vld [vmem:[%s7269_s3 + $0x468] sm:$0xff] }
  0xb5   : > { %4111 = vmatprep.subr.bf16.mxu1 %v4110_v39  ;;  %v4114_v54 = vpack.c.bf16 %v861_v10, %v860_v61  ;;  %v7319_v61 = vmov 0.0|0.0   ;;  %v800_v10 = vld [vmem:[%s7269_s3 + $0x280] sm:$0xff] }
  0xb6   : > { %1126 = vmatmul.mubr.f32.gmra.mrb[10].mxu0 %v4926_v7  ;;  %v4019_v13 = vpack.c.bf16 %v801_v17, %v800_v10  ;;  %v804_v10 = vld [vmem:[%s7269_s3 + $0x2a0] sm:$0xff]  ;;  %v805_v17 = vld [vmem:[%s7269_s3 + $0x2a8] sm:$0xff] }
  0xb7   : > { %1130 = vmatprep.mubr.f32.mxu0 %v5060_v8  ;;  %4011 = vmatpush1.bf16.msra.mxu0 %v4010_v29  ;;  %v5424_v29 = vsel %vm544_vm1, %v689_v49, %v690_v43  ;;  %v692_v49 = vrot.slane %v5428_v32, 1  ;;  %v862_v8 = vld [vmem:[%s7269_s3 + $0x470] sm:$0xff] }
  0xb8   : > { %4012 = vmatprep.subr.bf16.mxu0 %v7274_v3  ;;  %4113 = vmatpush3.bf16.msra.mxu1 %v4110_v39  ;;  %v637_v39 = vrot.slane %v5063_v9, 2  ;;  %v4016_v3 = vpack.c.bf16 %v799_v48, %v798_v42  ;;  %v639_v48 = vrot.slane %v5080_v16, 2 }
  0xb9   : > { %4115 = vmatprep.subr.bf16.mxu1 %v4114_v54 }
  0xba   : > { %1131 = vmatmul.mubr.f32.gmra.mrb[12].mxu0 %v5405_v19  ;;  %v5457_v42 = vsel %vm615_vm2, %v636_v18, %v637_v39  ;;  %v5470_v16 = vsel %vm615_vm2, %v637_v39, %v639_v48  ;;  %v642_v18 = vrot.slane %v5099_v27, 2  ;;  %v807_v48 = vld [vmem:[%s7269_s3 + $0x2b8] sm:$0xff] }
  0xbb   : > { %1135 = vmatprep.mubr.f32.mxu0 %v5063_v9  ;;  %4014 = vmatpush1.bf16.msra.mxu0 %v4013_v46  ;;  %v5449_v9 = vsel %vm544_vm1, %v690_v43, %v692_v49  ;;  %v4118_v46 = vpack.c.bf16 %v863_v57, %v862_v8  ;;  %v802_v43 = vld [vmem:[%s7269_s3 + $0x290] sm:$0xff]  ;;  %v644_v8 = vrot.slane %v5116_v26, 2  ;;  %v4025_v57 = vpack.c.bf16 %v805_v17, %v804_v10 }
  0xbc   : > { %4015 = vmatprep.subr.bf16.mxu0 %v7319_v61  ;;  %4117 = vmatpush3.bf16.msra.mxu1 %v4114_v54  ;;  %v803_v54 = vld [vmem:[%s7269_s3 + $0x298] sm:$0xff]  ;;  %v649_v10 = vrot.slane %v5152_v55, 2 }
  0xbd   : > { %4119 = vmatprep.subr.bf16.mxu1 %v4118_v46  ;;  %v4022_v49 = vpack.c.bf16 %v803_v54, %v802_v43  ;;  %v5501_v26 = vsel %vm615_vm2, %v642_v18, %v644_v8  ;;  %v647_v43 = vrot.slane %v5135_v41, 2  ;;  %v651_v8 = vrot.slane %v5168_v4, 2 }
  0xbe   : > { %1136 = vmatmul.mubr.f32.gmra.mrb[14].mxu0 %v5432_v35 }
  0xbf   : > { %1140 = vmatprep.mubr.f32.mxu0 %v5096_v25  ;;  %4017 = vmatpush1.bf16.msra.mxu0 %v4016_v3  ;;  %v641_v3 = vrot.slane %v5096_v25, 2  ;;  %v5534_v55 = vsel %vm615_vm2, %v647_v43, %v649_v10  ;;  %v659_v10 = vrot.slane %v5224_v47, 2  ;;  %v664_v47 = vrot.slane %v5250_v14, 2 }
  0xc0   : > { %4018 = vmatprep.subr.bf16.mxu0 %v7319_v61  ;;  %4121 = vmatpush3.bf16.msra.mxu1 %v4118_v46  ;;  %v806_v46 = vld [vmem:[%s7269_s3 + $0x2b0] sm:$0xff] }
  0xc1   : > { %v5486_v39 = vsel %vm615_vm2, %v641_v3, %v642_v18  ;;  %v4028_v54 = vpack.c.bf16 %v807_v48, %v806_v46  ;;  %v808_v3 = vld [vmem:[%s7269_s3 + $0x2c0] sm:$0xff]  ;;  %v810_v46 = vld [vmem:[%s7269_s3 + $0x2d0] sm:$0xff]  ;;  %v811_v48 = vld [vmem:[%s7269_s3 + $0x2d8] sm:$0xff] }
  0xc2   : > { %1141 = vmatmul.mubr.f32.gmra.mrb[16].mxu0 %v5457_v42 }
  0xc3   : > { %1145 = vmatprep.mubr.f32.mxu0 %v5099_v27  ;;  %4020 = vmatpush1.bf16.msra.mxu0 %v4019_v13  ;;  %v646_v13 = vrot.slane %v5132_v40, 2 }
  0xc4   : > { %4021 = vmatprep.subr.bf16.mxu0 %v7319_v61  ;;  %3813 = vmatmul.mubr.f32.vlgmr.msra.gmra.mrb[0].mxu1 %v4926_v7 }
  0xc5   : > { %3815 = vmatprep.mubr.f32.mxu1 %v5405_v19  ;;  %v5517_v18 = vsel %vm615_vm2, %v646_v13, %v647_v43  ;;  %v654_v13 = vrot.slane %v5188_v21, 2  ;;  %v813_v43 = vld [vmem:[%s7269_s3 + $0x2e8] sm:$0xff] }
  0xc6   : > { %1146 = vmatmul.mubr.f32.gmra.mrb[18].mxu0 %v5470_v16 }
  0xc7   : > { %1150 = vmatprep.mubr.f32.mxu0 %v5132_v40  ;;  %4023 = vmatpush1.bf16.msra.mxu0 %v4022_v49  ;;  %v809_v49 = vld [vmem:[%s7269_s3 + $0x2c8] sm:$0xff] }
  0xc8   : > { %4024 = vmatprep.subr.bf16.mxu0 %v7319_v61  ;;  %3816 = vmatmul.mubr.f32.gmra.mrb[2].mxu1 %v5432_v35  ;;  %v4031_v17 = vpack.c.bf16 %v809_v49, %v808_v3  ;;  %v656_v49 = vrot.slane %v5204_v33, 2 }
  0xc9   : > { %3818 = vmatprep.mubr.f32.mxu1 %v5457_v42 }
  0xca   : > { %1151 = vmatmul.mubr.f32.gmra.mrb[20].mxu0 %v5486_v39 }
  0xcb   : > { %1155 = vmatprep.mubr.f32.mxu0 %v5135_v41  ;;  %4026 = vmatpush1.bf16.msra.mxu0 %v4025_v57  ;;  %v652_v57 = vrot.slane %v5171_v5, 2 }
  0xcc   : > { %4027 = vmatprep.subr.bf16.mxu0 %v7319_v61  ;;  %3819 = vmatmul.mubr.f32.gmra.mrb[4].mxu1 %v5470_v16 }
  0xcd   : > { %3821 = vmatprep.mubr.f32.mxu1 %v5486_v39  ;;  %v5538_v3 = vsel %vm615_vm2, %v651_v8, %v652_v57  ;;  %v5554_v21 = vsel %vm615_vm2, %v652_v57, %v654_v13  ;;  %v5558_v8 = vsel %vm615_vm2, %v656_v49, %v657_v22  ;;  %v815_v57 = vld [vmem:[%s7269_s3 + $0x2f8] sm:$0xff]  ;;  %v696_v49 = vrot.slane %v5388_v50, 2 }
  0xce   : > { %1156 = vmatmul.mubr.f32.gmra.mrb[22].mxu0 %v5501_v26 }
  0xcf   : > { %1160 = vmatprep.mubr.f32.mxu0 %v5168_v4  ;;  %4029 = vmatpush1.bf16.msra.mxu0 %v4028_v54  ;;  %v4034_v54 = vpack.c.bf16 %v811_v48, %v810_v46  ;;  %v661_v46 = vrot.slane %v5234_v60, 2  ;;  %v662_v48 = vrot.slane %v5237_v63, 2 }
  0xd0   : > { %4030 = vmatprep.subr.bf16.mxu0 %v7319_v61  ;;  %3822 = vmatmul.mubr.f32.gmra.mrb[6].mxu1 %v5501_v26 }
  0xd1   : > { %3824 = vmatprep.mubr.f32.mxu1 %v5517_v18 }
  0xd2   : > { %1161 = vmatmul.mubr.f32.gmra.mrb[24].mxu0 %v5517_v18 }
  0xd3   : > { %1165 = vmatprep.mubr.f32.mxu0 %v5171_v5  ;;  %4032 = vmatpush1.bf16.msra.mxu0 %v4031_v17  ;;  %v812_v5 = vld [vmem:[%s7269_s3 + $0x2e0] sm:$0xff] }
  0xd4   : > { %4033 = vmatprep.subr.bf16.mxu0 %v7319_v61  ;;  %3825 = vmatmul.mubr.f32.gmra.mrb[8].mxu1 %v5534_v55  ;;  %v4037_v17 = vpack.c.bf16 %v813_v43, %v812_v5  ;;  %v5574_v5 = vsel %vm615_vm2, %v657_v22, %v659_v10  ;;  %v697_v43 = vrot.slane %v5393_v51, 2  ;;  %v5588_v22 = vsel %vm615_vm2, %v662_v48, %v664_v47  ;;  %v816_v51 = vld [vmem:[%s7269_s3 + $0x300] sm:$0xff]  ;;  %v823_v47 = vld [vmem:[%s7269_s3 + $0x338] sm:$0xff] }
  0xd5   : > { %3827 = vmatprep.mubr.f32.mxu1 %v5538_v3 }
  0xd6   : > { %1166 = vmatmul.mubr.f32.gmra.mrb[26].mxu0 %v5534_v55  ;;  %v5593_v14 = vsel %vm615_vm2, %v696_v49, %v697_v43  ;;  %v826_v49 = vld [vmem:[%s7269_s3 + $0x350] sm:$0xff] }
  0xd7   : > { %1170 = vmatprep.mubr.f32.mxu0 %v5204_v33  ;;  %4035 = vmatpush1.bf16.msra.mxu0 %v4034_v54  ;;  %v814_v33 = vld [vmem:[%s7269_s3 + $0x2f0] sm:$0xff]  ;;  %v5578_v54 = vsel %vm615_vm2, %v661_v46, %v662_v48  ;;  %v819_v46 = vld [vmem:[%s7269_s3 + $0x318] sm:$0xff] }
  0xd8   : > { %4036 = vmatprep.subr.bf16.mxu0 %v7319_v61  ;;  %3828 = vmatmul.mubr.f32.gmra.mrb[10].mxu1 %v5554_v21  ;;  %v4040_v13 = vpack.c.bf16 %v815_v57, %v814_v33  ;;  %v699_v33 = vrot.slane %v5428_v32, 2  ;;  %v817_v32 = vld [vmem:[%s7269_s3 + $0x308] sm:$0xff] }
  0xd9   : > { %3830 = vmatprep.mubr.f32.mxu1 %v5558_v8  ;;  %v4043_v10 = vpack.c.bf16 %v817_v32, %v816_v51  ;;  %v821_v57 = vld [vmem:[%s7269_s3 + $0x328] sm:$0xff]  ;;  %v5671_v32 = vld [vmem:[%s5357_s16 + $0x18] sm:$0xff] }
  0xda   : > { %1171 = vmatmul.mubr.f32.gmra.mrb[28].mxu0 %v5538_v3  ;;  %v5600_v50 = vsel %vm615_vm2, %v697_v43, %v699_v33  ;;  %v827_v43 = vld [vmem:[%s7269_s3 + $0x358] sm:$0xff]  ;;  %v829_v51 = vld [vmem:[%s7269_s3 + $0x368] sm:$0xff] }
  0xdb   : > { %1175 = vmatprep.mubr.f32.mxu0 %v5207_v34  ;;  %4038 = vmatpush1.bf16.msra.mxu0 %v4037_v17  ;;  %v818_v17 = vld [vmem:[%s7269_s3 + $0x310] sm:$0xff]  ;;  %v4058_v33 = vpack.c.bf16 %v827_v43, %v826_v49 }
  0xdc   : > { %4039 = vmatprep.subr.bf16.mxu0 %v7319_v61  ;;  %3831 = vmatmul.mubr.f32.gmra.mrb[12].mxu1 %v5574_v5  ;;  %v4046_v48 = vpack.c.bf16 %v819_v46, %v818_v17 }
  0xdd   : > { %3833 = vmatprep.mubr.f32.mxu1 %v5578_v54 }
  0xde   : > { %1176 = vmatmul.mubr.f32.gmra.mrb[30].mxu0 %v5554_v21 }
  0xdf   : > { %1180 = vmatprep.mubr.f32.mxu0 %v5234_v60  ;;  %4041 = vmatpush1.bf16.msra.mxu0 %v4040_v13  ;;  %v825_v13 = vld [vmem:[%s7269_s3 + $0x348] sm:$0xff] }
  0xe0   : > { %4042 = vmatprep.subr.bf16.mxu0 %v7319_v61  ;;  %3834 = vmatmul.mubr.f32.gmra.mrb[14].mxu1 %v5588_v22 }
  0xe1   : > { %3836 = vmatprep.mubr.f32.mxu1 %v5593_v14 }
  0xe2   : > { %1181 = vmatmul.mubr.f32.gmra.mrb[32].mxu0 %v5558_v8 }
  0xe3   : > { %1185 = vmatprep.mubr.f32.mxu0 %v5237_v63 }
  0xe4   : > { %3837 = vmatmul.mubr.f32.gmra.mrb[16].mxu1 %v5600_v50 }
  0xe6   : > { %1186 = vmatmul.mubr.f32.gmra.mrb[34].mxu0 %v5574_v5 }
  0xe7   : > { %3293 = vmatprep.mubr.msk.f32.mxu0 %vm507_vm3, %v5375_v59 }
  0xea   : > { %1191 = vmatmul.mubr.f32.gmra.mrb[36].mxu0 %v5578_v54 }
  0xeb   : > { %3294 = vmatprep.mubr.msk.f32.mxu0 %vm507_vm3, %v5379_v31 }
  0xee   : > { %1196 = vmatmul.mubr.f32.gmra.mrb[38].mxu0 %v5588_v22 }
  0xef   : > { %1265 = vmatprep.mubr.f32.mxu0 %v4908_v62  ;;  %v820_v62 = vld [vmem:[%s7269_s3 + $0x320] sm:$0xff] }
  0xf2   : > { %1266 = vmatmul.mubr.f32.vlgmr.msra.gmra.mrb[0].mxu0 %v4981_v28  ;;  %v4049_v28 = vpack.c.bf16 %v821_v57, %v820_v62  ;;  %v504_v62 = vld [vmem:[%s5357_s16 + $0x28] sm:$0x3] }
  0xf3   : > { %4044 = vmatpush1.bf16.msra.mxu0 %v4043_v10  ;;  %1270 = vmatprep.mubr.f32.mxu0 %v4913_v2  ;;  %v822_v2 = vld [vmem:[%s7269_s3 + $0x330] sm:$0xff]  ;;  %v5674_v10 = vld [vmem:[%s5357_s16 + $0x20] sm:$0xff] }
  0xf4   : > { %4045 = vmatprep.subr.bf16.mxu0 %v7319_v61  ;;  %v512_v17 = vsel %vm507_vm3, %v5674_v10, 0.0 }
  0xf6   : > { %1271 = vmatmul.mubr.f32.gmra.mrb[2].mxu0 %v4996_v38  ;;  %v4052_v38 = vpack.c.bf16 %v823_v47, %v822_v2  ;;  %v714_v2 = vrot.slane %v512_v17, 2  ;;  %v513_v47 = vsel %vm507_vm3, %v504_v62, 0.0  ;;  %v837_v62 = vld [vmem:[%s7269_s3 + $0x3a8] sm:$0xff] }
  0xf7   : > { %4047 = vmatpush1.bf16.msra.mxu0 %v4046_v48  ;;  %1275 = vmatprep.mubr.f32.mxu0 %v4923_v6  ;;  %v824_v6 = vld [vmem:[%s7269_s3 + $0x340] sm:$0xff]  ;;  %v707_v48 = vrot.slane %v512_v17, 1  ;;  %v709_v43 = vrot.slane %v513_v47, 1  ;;  %v834_v17 = vld [vmem:[%s7269_s3 + $0x390] sm:$0xff] }
  0xf8   : > { %4048 = vmatprep.subr.bf16.mxu0 %v7319_v61 }
  0xfa   : > { %1276 = vmatmul.mubr.f32.gmra.mrb[4].mxu0 %v5011_v45 }
  0xfb   : > { %1280 = vmatprep.mubr.f32.mxu0 %v4926_v7  ;;  %4050 = vmatpush1.bf16.msra.mxu0 %v4049_v28  ;;  %v4055_v7 = vpack.c.bf16 %v825_v13, %v824_v6  ;;  %v831_v6 = vld [vmem:[%s7269_s3 + $0x378] sm:$0xff] }
  0xfc   : > { %4051 = vmatprep.subr.bf16.mxu0 %v7319_v61 }
  0xfe   : > { %1281 = vmatmul.mubr.f32.gmra.mrb[6].mxu0 %v5032_v53 }
  0xff   : > { %1285 = vmatprep.mubr.f32.mxu0 %v5405_v19  ;;  %4053 = vmatpush1.bf16.msra.mxu0 %v4052_v38  ;;  %v828_v19 = vld [vmem:[%s7269_s3 + $0x360] sm:$0xff]  ;;  %v830_v38 = vld [vmem:[%s7269_s3 + $0x370] sm:$0xff] }
 0x100   : > { %4054 = vmatprep.subr.bf16.mxu0 %v7319_v61  ;;  %v4061_v57 = vpack.c.bf16 %v829_v51, %v828_v19  ;;  %v832_v19 = vld [vmem:[%s7269_s3 + $0x380] sm:$0xff]  ;;  %v833_v51 = vld [vmem:[%s7269_s3 + $0x388] sm:$0xff] }
 0x102   : > { %1286 = vmatmul.mubr.f32.gmra.mrb[8].mxu0 %v5049_v0 }
 0x103   : > { %1290 = vmatprep.mubr.f32.mxu0 %v5432_v35  ;;  %4056 = vmatpush1.bf16.msra.mxu0 %v4055_v7  ;;  %v511_v35 = vsel %vm507_vm3, %v5671_v32, 0.0 }
 0x104   : > { %4057 = vmatprep.subr.bf16.mxu0 %v7319_v61  ;;  %v706_v46 = vrot.slane %v511_v35, 1  ;;  %v713_v28 = vrot.slane %v511_v35, 2  ;;  %v5709_v35 = vsel %vm544_vm1, %v707_v48, %v709_v43  ;;  %v847_v43 = vld [vmem:[%s7269_s3 + $0x3f8] sm:$0xff] }
 0x106   : > { %1291 = vmatmul.mubr.f32.gmra.mrb[10].mxu0 %v5068_v11  ;;  %v5695_v13 = vsel %vm544_vm1, %v706_v46, %v707_v48  ;;  %v715_v7 = vsel %vm615_vm2, %v713_v28, %v714_v2  ;;  %v835_v46 = vld [vmem:[%s7269_s3 + $0x398] sm:$0xff] }
 0x107   : > { %1295 = vmatprep.mubr.f32.mxu0 %v5457_v42  ;;  %4059 = vmatpush1.bf16.msra.mxu0 %v4058_v33  ;;  %v716_v42 = vrot.slane %v513_v47, 2  ;;  %v4064_v33 = vpack.c.bf16 %v831_v6, %v830_v38  ;;  %v4070_v48 = vpack.c.bf16 %v835_v46, %v834_v17  ;;  %v839_v28 = vld [vmem:[%s7269_s3 + $0x3b8] sm:$0xff]  ;;  %v841_v47 = vld [vmem:[%s7269_s3 + $0x3c8] sm:$0xff] }
 0x108   : > { %4060 = vmatprep.subr.bf16.mxu0 %v7319_v61  ;;  %3839 = vmatprep.mubr.f32.mxu1 %v715_v7  ;;  %v843_v6 = vld [vmem:[%s7269_s3 + $0x3d8] sm:$0xff]  ;;  %v845_v7 = vld [vmem:[%s7269_s3 + $0x3e8] sm:$0xff] }
 0x109   : > { %v717_v49 = vsel %vm615_vm2, %v714_v2, %v716_v42  ;;  %v2122_v17 = vld [vmem:[%s7271_s5 + $0xa8] sm:$0xff] }
 0x10a   : > { %1296 = vmatmul.mubr.f32.gmra.mrb[12].mxu0 %v5085_v20  ;;  %3840 = vmatmul.mubr.f32.gmra.mrb[18].mxu1 %v717_v49 }
 0x10b   : > { %1300 = vmatprep.mubr.f32.mxu0 %v5470_v16  ;;  %4062 = vmatpush1.bf16.msra.mxu0 %v4061_v57  ;;  %v4067_v16 = vpack.c.bf16 %v833_v51, %v832_v19  ;;  %v2104_v19 = vld [vmem:[%s7271_s5 + $0x18] sm:$0xff] }
 0x10c   : > { %4063 = vmatprep.subr.bf16.mxu0 %v7319_v61 }
 0x10e   : > { %1301 = vmatmul.mubr.f32.gmra.mrb[14].mxu0 %v5104_v30 }
 0x10f   : > { %1305 = vmatprep.mubr.f32.mxu0 %v5486_v39  ;;  %4065 = vmatpush1.bf16.msra.mxu0 %v4064_v33  ;;  %v836_v39 = vld [vmem:[%s7269_s3 + $0x3a0] sm:$0xff] }
 0x110   : > { %4066 = vmatprep.subr.bf16.mxu0 %v7319_v61  ;;  %v4073_v57 = vpack.c.bf16 %v837_v62, %v836_v39  ;;  %v2105_v39 = vld [vmem:[%s7271_s5 + $0x20] sm:$0xff]  ;;  %v2106_v62 = vld [vmem:[%s7271_s5 + $0x28] sm:$0xff] }
 0x112   : > { %1306 = vmatmul.mubr.f32.gmra.mrb[16].mxu0 %v5121_v36 }
 0x113   : > { %1310 = vmatprep.mubr.f32.mxu0 %v5501_v26  ;;  %4068 = vmatpush1.bf16.msra.mxu0 %v4067_v16  ;;  %v838_v26 = vld [vmem:[%s7269_s3 + $0x3b0] sm:$0xff]  ;;  %v2121_v16 = vld [vmem:[%s7271_s5 + $0xa0] sm:$0xff] }
 0x114   : > { %4069 = vmatprep.subr.bf16.mxu0 %v7319_v61  ;;  %v4076_v2 = vpack.c.bf16 %v839_v28, %v838_v26  ;;  %v2123_v26 = vld [vmem:[%s7271_s5 + $0xb0] sm:$0xff]  ;;  %v2124_v28 = vld [vmem:[%s7271_s5 + $0xb8] sm:$0xff] }
 0x116   : > { %1311 = vmatmul.mubr.f32.gmra.mrb[18].mxu0 %v5140_v44 }
 0x117   : > { %1315 = vmatprep.mubr.f32.mxu0 %v5517_v18  ;;  %4071 = vmatpush1.bf16.msra.mxu0 %v4070_v48  ;;  %v840_v18 = vld [vmem:[%s7269_s3 + $0x3c0] sm:$0xff]  ;;  %v4130_v48 = vpack.c.bf16 %v2122_v17, %v2121_v16 }
 0x118   : > { %4072 = vmatprep.subr.bf16.mxu0 %v7319_v61  ;;  %v4079_v38 = vpack.c.bf16 %v841_v47, %v840_v18  ;;  %v2107_v18 = vld [vmem:[%s7271_s5 + $0x30] sm:$0xff]  ;;  %v2108_v47 = vld [vmem:[%s7271_s5 + $0x38] sm:$0xff] }
 0x11a   : > { %1316 = vmatmul.mubr.f32.gmra.mrb[20].mxu0 %v5157_v58 }
 0x11b   : > { %1320 = vmatprep.mubr.f32.mxu0 %v5534_v55  ;;  %4074 = vmatpush1.bf16.msra.mxu0 %v4073_v57  ;;  %v842_v55 = vld [vmem:[%s7269_s3 + $0x3d0] sm:$0xff]  ;;  %v4132_v57 = vpack.c.bf16 %v2106_v62, %v2105_v39 }
 0x11c   : > { %4075 = vmatprep.subr.bf16.mxu0 %v7319_v61  ;;  %v4082_v42 = vpack.c.bf16 %v843_v6, %v842_v55  ;;  %v2125_v6 = vld [vmem:[%s7271_s5 + $0xc0] sm:$0xff] }
 0x11e   : > { %1321 = vmatmul.mubr.f32.gmra.mrb[22].mxu0 %v5176_v12 }
 0x11f   : > { %1325 = vmatprep.mubr.f32.mxu0 %v5538_v3  ;;  %4077 = vmatpush1.bf16.msra.mxu0 %v4076_v2  ;;  %v844_v3 = vld [vmem:[%s7269_s3 + $0x3e0] sm:$0xff]  ;;  %v4134_v2 = vpack.c.bf16 %v2124_v28, %v2123_v26 }
 0x120   : > { %4078 = vmatprep.subr.bf16.mxu0 %v7319_v61  ;;  %v4085_v49 = vpack.c.bf16 %v845_v7, %v844_v3 }
 0x122   : > { %1326 = vmatmul.mubr.f32.gmra.mrb[24].mxu0 %v5193_v24 }
 0x123   : > { %1330 = vmatprep.mubr.f32.mxu0 %v5554_v21  ;;  %4080 = vmatpush1.bf16.msra.mxu0 %v4079_v38  ;;  %v846_v21 = vld [vmem:[%s7269_s3 + $0x3f0] sm:$0xff]  ;;  %v4136_v38 = vpack.c.bf16 %v2108_v47, %v2107_v18  ;;  %v2150_v18 = vld [vmem:[%s7271_s5 + $0x188] sm:$0xff] }
 0x124   : > { %4081 = vmatprep.subr.bf16.mxu0 %v7319_v61  ;;  %v4088_v33 = vpack.c.bf16 %v847_v43, %v846_v21  ;;  %v2110_v21 = vld [vmem:[%s7271_s5 + $0x48] sm:$0xff] }
 0x126   : > { %1331 = vmatmul.mubr.f32.gmra.mrb[26].mxu0 %v5212_v37 }
 0x127   : > { %1335 = vmatprep.mubr.f32.mxu0 %v5558_v8  ;;  %4083 = vmatpush1.bf16.msra.mxu0 %v4082_v42  ;;  %v4612_v8 = vld [vmem:[%s4862_s15 + $0x8] sm:$0xff] }
 0x128   : > { %4084 = vmatprep.subr.bf16.mxu0 %v7319_v61  ;;  %v2126_v42 = vld [vmem:[%s7271_s5 + $0xc8] sm:$0xff] }
 0x129   : > { %v4138_v7 = vpack.c.bf16 %v2126_v42, %v2125_v6  ;;  %v5979_v6 = vld [vmem:[%s7270_s4] ss:$0 sm:$0xff] }
 0x12a   : > { %1336 = vmatmul.mubr.f32.gmra.mrb[28].mxu0 %v5229_v52 }
 0x12b   : > { %1340 = vmatprep.mubr.f32.mxu0 %v5574_v5  ;;  %4086 = vmatpush1.bf16.msra.mxu0 %v4085_v49  ;;  %v4613_v5 = vld [vmem:[%s4862_s15 + $0x18] sm:$0xff]  ;;  %v2109_v49 = vld [vmem:[%s7271_s5 + $0x40] sm:$0xff] }
 0x12c   : > { %4087 = vmatprep.subr.bf16.mxu0 %v7319_v61  ;;  %v4611_v61 = vld [vmem:[%s4862_s15] sm:$0xff]  ;;  %v4140_v43 = vpack.c.bf16 %v2110_v21, %v2109_v49 }
 0x12e   : > { %1341 = vmatmul.mubr.f32.gmra.mrb[30].mxu0 %v5242_v1 }
 0x12f   : > { %1345 = vmatprep.mubr.f32.mxu0 %v5578_v54  ;;  %4089 = vmatpush1.bf16.msra.mxu0 %v4088_v33  ;;  %v4614_v54 = vld [vmem:[%s4862_s15 + $0x20] sm:$0xff]  ;;  %v2127_v33 = vld [vmem:[%s7271_s5 + $0xd0] sm:$0xff] }
 0x132   : > { %1346 = vmatmul.mubr.f32.gmra.mrb[32].mxu0 %v5255_v15 }
 0x133   : > { %1350 = vmatprep.mubr.f32.mxu0 %v5588_v22  ;;  %v4615_v22 = vld [vmem:[%s4862_s15 + $0x30] sm:$0xff] }
 0x136   : > { %1351 = vmatmul.mubr.f32.gmra.mrb[34].mxu0 %v5261_v23 }
 0x137   : > { %1355 = vmatprep.mubr.f32.mxu0 %v5593_v14  ;;  %v4616_v14 = vld [vmem:[%s4862_s15 + $0x38] sm:$0xff] }
 0x13a   : > { %1356 = vmatmul.mubr.f32.gmra.mrb[36].mxu0 %v5424_v29 }
 0x13b   : > { %1360 = vmatprep.mubr.f32.mxu0 %v5600_v50  ;;  %v7320_v50 = vld [vmem:[#allocation12_spill] sm:$0xff] }
 0x13e   : > { %1361 = vmatmul.mubr.f32.gmra.mrb[38].mxu0 %v5449_v9 }
 0x13f   : > { %1430 = vmatprep.mubr.f32.mxu0 %v5011_v45 }
 0x142   : > { %1431 = vmatmul.mubr.f32.vlgmr.msra.gmra.mrb[0].mxu0 %v4611_v61  ;;  %v2128_v61 = vld [vmem:[%s7271_s5 + $0xd8] sm:$0xff] }
 0x143   : > { %1435 = vmatprep.mubr.f32.mxu0 %v5032_v53 }
 0x146   : > { %1436 = vmatmul.mubr.f32.gmra.mrb[2].mxu0 %v4612_v8  ;;  %v4142_v8 = vpack.c.bf16 %v2128_v61, %v2127_v33 }
 0x147   : > { %1440 = vmatprep.mubr.f32.mxu0 %v5049_v0  ;;  %v2168_v0 = vld [vmem:[%s7271_s5 + $0x218] sm:$0xff] }
 0x14a   : > { %1441 = vmatmul.mubr.f32.gmra.mrb[4].mxu0 %v4613_v5  ;;  %v2111_v5 = vld [vmem:[%s7271_s5 + $0x50] sm:$0xff] }
 0x14b   : > { %1445 = vmatprep.mubr.f32.mxu0 %v5068_v11 }
 0x14e   : > { %1446 = vmatmul.mubr.f32.gmra.mrb[6].mxu0 %v4614_v54  ;;  %v2112_v54 = vld [vmem:[%s7271_s5 + $0x58] sm:$0xff] }
 0x14f   : > { %1450 = vmatprep.mubr.f32.mxu0 %v5085_v20  ;;  %v2167_v20 = vld [vmem:[%s7271_s5 + $0x210] sm:$0xff] }
 0x152   : > { %1451 = vmatmul.mubr.f32.gmra.mrb[8].mxu0 %v4615_v22  ;;  %v4144_v22 = vpack.c.bf16 %v2112_v54, %v2111_v5 }
 0x153   : > { %1455 = vmatprep.mubr.f32.mxu0 %v5104_v30 }
 0x156   : > { %1456 = vmatmul.mubr.f32.gmra.mrb[10].mxu0 %v4616_v14 }
 0x157   : > { %1460 = vmatprep.mubr.f32.mxu0 %v5121_v36 }
 0x15a   : > { %1461 = vmatmul.mubr.f32.gmra.mrb[12].mxu0 %v5096_v25  ;;  %v7321_v25 = vld [vmem:[#allocation15_spill] sm:$0xff] }
 0x15b   : > { %1465 = vmatprep.mubr.f32.mxu0 %v5140_v44 }
 0x15e   : > { %1466 = vmatmul.mubr.f32.gmra.mrb[14].mxu0 %v5099_v27 }
 0x15f   : > { %1470 = vmatprep.mubr.f32.mxu0 %v5157_v58 }
 0x162   : > { %1471 = vmatmul.mubr.f32.gmra.mrb[16].mxu0 %v5132_v40 }
 0x163   : > { %1475 = vmatprep.mubr.f32.mxu0 %v5176_v12  ;;  %v2165_v12 = vld [vmem:[%s7271_s5 + $0x200] sm:$0xff] }
 0x166   : > { %1476 = vmatmul.mubr.f32.gmra.mrb[18].mxu0 %v5135_v41 }
 0x167   : > { %1480 = vmatprep.mubr.f32.mxu0 %v5193_v24 }
 0x16a   : > { %1481 = vmatmul.mubr.f32.gmra.mrb[20].mxu0 %v5168_v4  ;;  %v2117_v4 = vld [vmem:[%s7271_s5 + $0x80] sm:$0xff] }
 0x16b   : > { %1485 = vmatprep.mubr.f32.mxu0 %v5212_v37 }
 0x16e   : > { %1486 = vmatmul.mubr.f32.gmra.mrb[22].mxu0 %v7320_v50 }
 0x16f   : > { %1490 = vmatprep.mubr.f32.mxu0 %v5229_v52 }
 0x172   : > { %1491 = vmatmul.mubr.f32.gmra.mrb[24].mxu0 %v7321_v25  ;;  %v2129_v25 = vld [vmem:[%s7271_s5 + $0xe0] sm:$0xff] }
 0x173   : > { %1495 = vmatprep.mubr.f32.mxu0 %v5242_v1 }
 0x176   : > { %1496 = vmatmul.mubr.f32.gmra.mrb[26].mxu0 %v5207_v34  ;;  %v2118_v34 = vld [vmem:[%s7271_s5 + $0x88] sm:$0xff] }
 0x177   : > { %1500 = vmatprep.mubr.f32.mxu0 %v5255_v15 }
 0x17a   : > { %1501 = vmatmul.mubr.f32.gmra.mrb[28].mxu0 %v5234_v60 }
 0x17b   : > { %1505 = vmatprep.mubr.f32.mxu0 %v5261_v23 }
 0x17e   : > { %1506 = vmatmul.mubr.f32.gmra.mrb[30].mxu0 %v5237_v63  ;;  %v4122_v63 = vpack.c.bf16 %v2118_v34, %v2117_v4  ;;  %v2130_v4 = vld [vmem:[%s7271_s5 + $0xe8] sm:$0xff] }
 0x17f   : > { %1510 = vmatprep.mubr.f32.mxu0 %v5424_v29  ;;  %v4146_v34 = vpack.c.bf16 %v2130_v4, %v2129_v25 }
 0x180   : > { %4123 = vmatprep.subr.bf16.mxu1 %v4122_v63  ;;  %v2113_v63 = vld [vmem:[%s7271_s5 + $0x60] sm:$0xff] }
 0x182   : > { %3295 = vmatmul.mubr.msk.f32.gmra.mrb[32].mxu0 %vm507_vm3, %v5375_v59  ;;  %v2101_v59 = vld [vmem:[%s7271_s5] sm:$0xff] }
 0x183   : > { %1515 = vmatprep.mubr.f32.mxu0 %v5449_v9  ;;  %v2119_v9 = vld [vmem:[%s7271_s5 + $0x90] sm:$0xff] }
 0x186   : > { %3296 = vmatmul.mubr.msk.f32.gmra.mrb[34].mxu0 %vm507_vm3, %v5379_v31  ;;  %v2102_v31 = vld [vmem:[%s7271_s5 + $0x8] sm:$0xff] }
 0x187   : > { %1520 = vmatprep.mubr.f32.mxu0 %v5695_v13  ;;  %v4124_v29 = vpack.c.bf16 %v2102_v31, %v2101_v59  ;;  %v2103_v13 = vld [vmem:[%s7271_s5 + $0x10] sm:$0xff]  ;;  %v2114_v59 = vld [vmem:[%s7271_s5 + $0x68] sm:$0xff] }
 0x188   : > { %v4128_v51 = vpack.c.bf16 %v2104_v19, %v2103_v13  ;;  %v4148_v31 = vpack.c.bf16 %v2114_v59, %v2113_v63  ;;  %v2116_v13 = vld [vmem:[%s7271_s5 + $0x78] sm:$0xff] }
 0x189   : > { %4125 = vmatpush3.bf16.msra.mxu1 %v4124_v29  ;;  %v2131_v29 = vld [vmem:[%s7271_s5 + $0xf0] sm:$0xff] }
 0x18a   : > { %3297 = vmatmul.mubr.msk.f32.gmra.mrb[36].mxu0 %vm507_vm3, %v5671_v32  ;;  %v2120_v32 = vld [vmem:[%s7271_s5 + $0x98] sm:$0xff] }
 0x18b   : > { %1525 = vmatprep.mubr.f32.mxu0 %v5709_v35 }
 0x18e   : > { %3298 = vmatmul.mubr.msk.f32.gmra.mrb[38].mxu0 %vm507_vm3, %v5674_v10  ;;  %v4126_v10 = vpack.c.bf16 %v2120_v32, %v2119_v9  ;;  %v2132_v9 = vld [vmem:[%s7271_s5 + $0xf8] sm:$0xff] }
 0x18f   : > { %v4150_v32 = vpack.c.bf16 %v2132_v9, %v2131_v29 }
 0x190   : > { %4127 = vmatprep.subr.bf16.mxu1 %v4126_v10  ;;  %v2115_v10 = vld [vmem:[%s7271_s5 + $0x70] sm:$0xff] }
 0x191   : > { %4129 = vmatpush3.bf16.msra.mxu1 %v4128_v51  ;;  %v4152_v19 = vpack.c.bf16 %v2116_v13, %v2115_v10 }
 0x192   : > { %4131 = vmatprep.subr.bf16.mxu1 %v4130_v48 }
 0x195   : > { %4133 = vmatpush3.bf16.msra.mxu1 %v4132_v57 }
 0x196   : > { %4135 = vmatprep.subr.bf16.mxu1 %v4134_v2  ;;  %v2149_v2 = vld [vmem:[%s7271_s5 + $0x180] sm:$0xff] }
 0x197   : > { %v5834_v27 = vpop.f32.mrb[0].mxu1 }
 0x198   : > { %v5836_v40 = vpop.f32.mrb[1].mxu1 }
 0x199   : > { %4137 = vmatpush3.bf16.msra.mxu1 %v4136_v38  ;;  %v4154_v38 = vpack.c.bf16 %v2150_v18, %v2149_v2 }
 0x19a   : > { %4139 = vmatprep.subr.bf16.mxu1 %v4138_v7 }
 0x19b   : > { %v5838_v41 = vpop.f32.mrb[2].mxu1 }
 0x19c   : > { %v5846_v60 = vpop.f32.mrb[3].mxu1 }
 0x19d   : > { %4141 = vmatpush3.bf16.msra.mxu1 %v4140_v43 }
 0x19e   : > { %4143 = vmatprep.subr.bf16.mxu1 %v4142_v8 }
 0x19f   : > { %v5866_v35 = vpop.f32.mrb[4].mxu1 }
 0x1a0   : > { %v5874_v46 = vpop.f32.mrb[5].mxu1 }
 0x1a1   : > { %4145 = vmatpush3.bf16.msra.mxu1 %v4144_v22 }
 0x1a2   : > { %4147 = vmatprep.subr.bf16.mxu1 %v4146_v34 }
 0x1a3   : > { %v5894_v55 = vpop.f32.mrb[6].mxu1 }
 0x1a4   : > { %v5902_v3 = vpop.f32.mrb[7].mxu1 }
 0x1a5   : > { %4149 = vmatpush3.bf16.msra.mxu1 %v4148_v31 }
 0x1a6   : > { %4151 = vmatprep.subr.bf16.mxu1 %v4150_v32 }
 0x1a7   : > { %v5922_v14 = vpop.f32.mrb[8].mxu1 }
 0x1a8   : > { %v5924_v50 = vpop.f32.mrb[9].mxu1 }
 0x1a9   : > { %4153 = vmatpush3.bf16.msra.mxu1 %v4152_v19 }
 0x1aa   : > { %4155 = vmatprep.subr.bf16.mxu1 %v4154_v38 }
 0x1ab   : > { %v5950_v51 = vpop.f32.mrb[10].mxu1 }
 0x1ac   : > { %v5952_v16 = vpop.f32.mrb[11].mxu1 }
 0x1af   : > { %v5954_v17 = vpop.f32.mrb[12].mxu1 }
 0x1b0   : > { %v5956_v48 = vpop.f32.mrb[13].mxu1 }
 0x1b3   : > { %v5958_v39 = vpop.f32.mrb[14].mxu1 }
 0x1b4   : > { %v5960_v62 = vpop.f32.mrb[15].mxu1 }
 0x1b7   : > { %v5962_v57 = vpop.f32.mrb[16].mxu1 }
 0x1b8   : > { %v5964_v26 = vpop.f32.mrb[17].mxu1 }
 0x1dd   : > { %v5966_v28 = vpop.f32.mrb[18].mxu1 }
 0x1de   : > { %v5974_v47 = vpop.f32.mrb[19].mxu1 }
 0x215   : > { %v1432_v42 = vpop.f32.mrb[0].mxu0 }
 0x216   : > { %v4282_v7 = vadd.f32 %v5979_v6, %v1432_v42  ;;  %v1434_v49 = vpop.f32.mrb[1].mxu0 }
 0x218   : > { %v1598_v21 = vadd.f32 %v4282_v7, %v5836_v40 }
 0x219   : > { %v1437_v43 = vpop.f32.mrb[2].mxu0 }
 0x21a   : > { %v3299_v33 = vmul.f32 -1.442695, %v1598_v21  ;;  %v4283_v61 = vadd.f32 %v5979_v6, %v1437_v43  ;;  %v1439_v8 = vpop.f32.mrb[3].mxu0 }
 0x21c   : > { %4467 = vpow2.f32 %v3299_v33  ;;  %v5985_v5 = vadd.f32 %v4283_v61, %v5834_v27 }
 0x21d   : > { %v1442_v54 = vpop.f32.mrb[4].mxu0 }
 0x21e   : > { %v3300_v22 = vmul.f32 -1.442695, %v5985_v5  ;;  %v4284_v25 = vadd.f32 %v5979_v6, %v1442_v54  ;;  %v1444_v4 = vpop.f32.mrb[5].mxu0 }
 0x220   : > { %4469 = vpow2.f32 %v3300_v22  ;;  %v5990_v34 = vadd.f32 %v4284_v25, %v5846_v60 }
 0x221   : > { %v1447_v40 = vpop.f32.mrb[6].mxu0 }
 0x222   : > { %v3301_v63 = vmul.f32 -1.442695, %v5990_v34  ;;  %v4285_v59 = vadd.f32 %v5979_v6, %v1447_v40  ;;  %v1449_v31 = vpop.f32.mrb[7].mxu0 }
 0x224   : > { %4471 = vpow2.f32 %v3301_v63  ;;  %v5995_v27 = vadd.f32 %v4285_v59, %v5838_v41 }
 0x225   : > { %v1452_v29 = vpop.f32.mrb[8].mxu0 }
 0x226   : > { %v4468_v9 = vpop.eup %4467  ;;  %v3302_v32 = vmul.f32 -1.442695, %v5995_v27  ;;  %v4286_v10 = vadd.f32 %v5979_v6, %v1452_v29  ;;  %v1454_v13 = vpop.f32.mrb[9].mxu0 }
 0x227   : > { %v1756_v19 = vadd.f32 1.0, %v4468_v9 }
 0x228   : > { %4473 = vpow2.f32 %v3302_v32  ;;  %v6000_v60 = vadd.f32 %v4286_v10, %v5874_v46  ;;  %v6025_v10 = vld [vmem:[%s7271_s5 + $0x108] sm:$0xff] }
 0x229   : > { %4475 = vrcp.f32 %v1756_v19  ;;  %v1457_v2 = vpop.f32.mrb[10].mxu0 }
 0x22a   : > { %v4470_v18 = vpop.eup %4469  ;;  %v3303_v38 = vmul.f32 -1.442695, %v6000_v60  ;;  %v4287_v41 = vadd.f32 %v5979_v6, %v1457_v2  ;;  %v1459_v42 = vpop.f32.mrb[11].mxu0 }
 0x22b   : > { %v1757_v7 = vadd.f32 1.0, %v4470_v18 }
 0x22c   : > { %4477 = vpow2.f32 %v3303_v38  ;;  %v6005_v49 = vadd.f32 %v4287_v41, %v5866_v35  ;;  %v6034_v38 = vld [vmem:[%s7271_s5 + $0x190] sm:$0xff]  ;;  %v6039_v41 = vld [vmem:[%s7271_s5 + $0x198] sm:$0xff] }
 0x22d   : > { %4479 = vrcp.f32 %v1757_v7  ;;  %v1462_v43 = vpop.f32.mrb[12].mxu0 }
 0x22e   : > { %v4472_v33 = vpop.eup %4471  ;;  %v3304_v61 = vmul.f32 -1.442695, %v6005_v49  ;;  %v4288_v46 = vadd.f32 %v5979_v6, %v1462_v43  ;;  %v1464_v8 = vpop.f32.mrb[13].mxu0 }
 0x22f   : > { %v1758_v54 = vadd.f32 1.0, %v4472_v33  ;;  %v6046_v33 = vld [vmem:[%s7271_s5 + $0x110] sm:$0xff] }
 0x230   : > { %4481 = vpow2.f32 %v3304_v61  ;;  %v6010_v22 = vadd.f32 %v4288_v46, %v5902_v3  ;;  %v6020_v3 = vld [vmem:[%s7271_s5 + $0x100] sm:$0xff]  ;;  %v6051_v61 = vld [vmem:[%s7271_s5 + $0x118] sm:$0xff] }
 0x231   : > { %4483 = vrcp.f32 %v1758_v54  ;;  %v1467_v25 = vpop.f32.mrb[14].mxu0  ;;  %v6056_v46 = vld [vmem:[%s7271_s5 + $0x1a0] sm:$0xff] }
 0x232   : > { %v4474_v4 = vpop.eup %4473  ;;  %v3305_v40 = vmul.f32 -1.442695, %v6010_v22  ;;  %v4289_v35 = vadd.f32 %v5979_v6, %v1467_v25  ;;  %v1469_v63 = vpop.f32.mrb[15].mxu0  ;;  %v6065_v25 = vld [vmem:[%s7271_s5 + $0x1a8] sm:$0xff] }
 0x233   : > { %v4476_v59 = vpop.eup %4475  ;;  %v1759_v31 = vadd.f32 1.0, %v4474_v4  ;;  %v6070_v4 = vld [vmem:[%s7271_s5 + $0x120] sm:$0xff]  ;;  %v4158_v63 = vpack.c.bf16 %v6039_v41, %v6034_v38 }
 0x234   : > { %v1816_v29 = vmul.f32 %v4476_v59, %v1598_v21  ;;  %4485 = vpow2.f32 %v3305_v40  ;;  %v6015_v9 = vadd.f32 %v4289_v35, %v5894_v55  ;;  %v6075_v40 = vld [vmem:[%s7271_s5 + $0x128] sm:$0xff]  ;;  %v4156_v35 = vpack.c.bf16 %v6025_v10, %v6020_v3 }
 0x235   : > { %4487 = vrcp.f32 %v1759_v31  ;;  %v1472_v32 = vpop.f32.mrb[16].mxu0 }
 0x236   : > { %v4478_v13 = vpop.eup %4477  ;;  %v1836_v21 = vsel %vm4805_vm0, %v1816_v29, 0.0  ;;  %v3306_v55 = vmul.f32 -1.442695, %v6015_v9  ;;  %v4290_v2 = vadd.f32 %v5979_v6, %v1472_v32  ;;  %v1474_v18 = vpop.f32.mrb[17].mxu0 }
 0x237   : > { %v4480_v42 = vpop.eup %4479  ;;  %v6041_v7 = vrot.slane %v1836_v21, 7  ;;  %v1760_v43 = vadd.f32 1.0, %v4478_v13 }
 0x238   : > { %v1817_v8 = vmul.f32 %v4480_v42, %v5985_v5  ;;  %4489 = vpow2.f32 %v3306_v55  ;;  %v6060_v54 = vadd.f32 %v4290_v2, %v5924_v50 }
 0x239   : > { %4491 = vrcp.f32 %v1760_v43  ;;  %v1477_v5 = vpop.f32.mrb[18].mxu0  ;;  %v1921_v50 = vsel %vm1860_vm4, 0.0, %v6041_v7 }
 0x23a   : > { %v4482_v59 = vpop.eup %4481  ;;  %v1837_v31 = vsel %vm4805_vm0, %v1817_v8, 0.0  ;;  %v3307_v29 = vmul.f32 -1.442695, %v6060_v54  ;;  %v4291_v32 = vadd.f32 %v5979_v6, %v1477_v5  ;;  %v1479_v13 = vpop.f32.mrb[19].mxu0  ;;  %v1957_v41 = vrot.slane %v1921_v50, 1 }
 0x23b   : > { %v4484_v55 = vpop.eup %4483  ;;  %v1862_v2 = vrot.slane %v1837_v31, 7  ;;  %v1761_v18 = vadd.f32 1.0, %v4482_v59  ;;  %v2013_v8 = vrot.slane %v1921_v50, 2  ;;  %v6112_v50 = vld [vmem:[%s7271_s5 + $0x1b0] sm:$0xff] }
 0x23c   : > { %v1818_v19 = vmul.f32 %v4484_v55, %v5990_v34  ;;  %4493 = vpow2.f32 %v3307_v29  ;;  %v6095_v38 = vadd.f32 %v4291_v32, %v5922_v14 }
 0x23d   : > { %4495 = vrcp.f32 %v1761_v18  ;;  %v1482_v42 = vpop.f32.mrb[20].mxu0  ;;  %v1863_v43 = vsel %vm1860_vm4, %v6041_v7, %v1862_v2  ;;  %v1931_v5 = vsel %vm1860_vm4, %v1862_v2, 0.0  ;;  %v6117_v2 = vld [vmem:[%s7271_s5 + $0x1b8] sm:$0xff] }
 0x23e   : > { %v4486_v59 = vpop.eup %4485  ;;  %v6100_v31 = vrot.slane %v1818_v19, 7  ;;  %v3308_v13 = vmul.f32 -1.442695, %v6095_v38  ;;  %v4292_v34 = vadd.f32 %v5979_v6, %v1482_v42  ;;  %v1484_v29 = vpop.f32.mrb[21].mxu0  ;;  %v1958_v55 = vrot.slane %v1863_v43, 1 }
 0x23f   : > { %v4488_v14 = vpop.eup %4487  ;;  %v1762_v32 = vadd.f32 1.0, %v4486_v59  ;;  %v1960_v10 = vrot.slane %v1931_v5, 1  ;;  %v2014_v19 = vrot.slane %v1863_v43, 2  ;;  %v2016_v42 = vrot.slane %v1931_v5, 2 }
 0x240   : > { %v1819_v59 = vmul.f32 %v4488_v14, %v5995_v27  ;;  %4497 = vpow2.f32 %v3308_v13  ;;  %v6121_v29 = vadd.f32 %v4292_v34, %v5952_v16  ;;  %v1959_v3 = vsel %vm544_vm1, %v1957_v41, %v1958_v55 }
 0x241   : > { %4499 = vrcp.f32 %v1762_v32  ;;  %v1487_v21 = vpop.f32.mrb[22].mxu0  ;;  %2316 = vmatprep.mubr.f32.mxu1 %v1959_v3  ;;  %v1961_v15 = vsel %vm544_vm1, %v1958_v55, %v1960_v10  ;;  %v1922_v23 = vsel %vm1860_vm4, 0.0, %v6100_v31  ;;  %v6128_v52 = vsel %vm615_vm2, %v2013_v8, %v2014_v19 }
 0x242   : > { %v4490_v5 = vpop.eup %4489  ;;  %v1865_v1 = vrot.slane %v1819_v59, 7  ;;  %v3309_v27 = vmul.f32 -1.442695, %v6121_v29  ;;  %v4293_v16 = vadd.f32 %v5979_v6, %v1487_v21  ;;  %v1489_v13 = vpop.f32.mrb[23].mxu0  ;;  %3321 = vmatmul.mubr.msk.f32.vlgmr.msra.gmra.mrb[20].mxu1 %vm6105_vm5, %v6041_v7  ;;  %v4166_v3 = vpack.c.bf16 %v6117_v2, %v6112_v50 }
 0x243   : > { %v4492_v10 = vpop.eup %4491  ;;  %v1763_v41 = vadd.f32 1.0, %v4490_v5  ;;  %2321 = vmatprep.mubr.f32.mxu1 %v1961_v15  ;;  %4157 = vmatpush3.bf16.msra.mxu1 %v4156_v35  ;;  %v1962_v8 = vrot.slane %v1922_v23, 1  ;;  %v6138_v34 = vsel %vm615_vm2, %v2014_v19, %v2016_v42  ;;  %v2018_v55 = vrot.slane %v1922_v23, 2 }
 0x244   : > { %v6142_v21 = vsel %vm1860_vm4, %v6100_v31, %v1865_v1  ;;  %v1932_v14 = vsel %vm1860_vm4, %v1865_v1, 0.0  ;;  %v1820_v7 = vmul.f32 %v4492_v10, %v6000_v60  ;;  %4501 = vpow2.f32 %v3309_v27  ;;  %4159 = vmatprep.subr.bf16.mxu1 %v4158_v63 }
 0x245   : > { %4503 = vrcp.f32 %v1763_v41  ;;  %v6147_v32 = vadd.f32 %v4293_v16, %v5950_v51  ;;  %v1492_v15 = vpop.f32.mrb[24].mxu0  ;;  %v1963_v35 = vrot.slane %v6142_v21, 1  ;;  %v1965_v50 = vrot.slane %v1932_v14, 1 }
 0x246   : > { %v4494_v2 = vpop.eup %4493  ;;  %v6150_v23 = vrot.slane %v1820_v7, 7  ;;  %v4294_v19 = vadd.f32 %v5979_v6, %v1492_v15  ;;  %v1494_v42 = vpop.f32.mrb[25].mxu0  ;;  %2322 = vmatmul.mubr.f32.gmra.mrb[22].mxu1 %v1863_v43  ;;  %v2019_v1 = vrot.slane %v6142_v21, 2  ;;  %v2021_v60 = vrot.slane %v1932_v14, 2  ;;  %v2139_v43 = vld [vmem:[%s7271_s5 + $0x130] sm:$0xff] }
 0x247   : > { %v4496_v59 = vpop.eup %4495  ;;  %v1764_v63 = vadd.f32 1.0, %v4494_v2  ;;  %v3310_v5 = vmul.f32 -1.442695, %v6147_v32  ;;  %v6156_v51 = vsel %vm544_vm1, %v1962_v8, %v1963_v35  ;;  %v6159_v27 = vsel %vm544_vm1, %v1963_v35, %v1965_v50 }
 0x248   : > { %v7325_v16 = vpack.c.bf16 %v6051_v61, %v6046_v33  ;;  %v1821_v13 = vmul.f32 %v4496_v59, %v6005_v49  ;;  %v6169_v10 = vadd.f32 %v4294_v19, %v5956_v48  ;;  %2326 = vmatprep.mubr.f32.mxu1 %v6156_v51  ;;  %v6174_v41 = vsel %vm1860_vm4, 0.0, %v6150_v23  ;;  %v2140_v33 = vld [vmem:[%s7271_s5 + $0x138] sm:$0xff]  ;;  %v2157_v49 = vld [vmem:[%s7271_s5 + $0x1c0] sm:$0xff]  ;;  %v2158_v48 = vld [vmem:[%s7271_s5 + $0x1c8] sm:$0xff] }
 0x249   : > { %v7326_v8 = vpack.c.bf16 %v6065_v25, %v6056_v46  ;;  %v6189_v61 = vsel %vm615_vm2, %v2018_v55, %v2019_v1  ;;  %4505 = vrcp.f32 %v1764_v63  ;;  %v1497_v14 = vpop.f32.mrb[26].mxu0  ;;  %v6192_v46 = vsel %vm615_vm2, %v2019_v1, %v2021_v60 }
 0x24a   : > { %4161 = vmatpush3.bf16.msra.mxu1 %v7325_v16  ;;  %v4498_v25 = vpop.eup %4497  ;;  %v1868_v7 = vrot.slane %v1821_v13, 7  ;;  %4507 = vpow2.f32 %v3310_v5  ;;  %v3311_v15 = vmul.f32 -1.442695, %v6169_v10  ;;  %v4295_v35 = vadd.f32 %v5979_v6, %v1497_v14  ;;  %v1499_v50 = vpop.f32.mrb[27].mxu0  ;;  %v2141_v16 = vld [vmem:[%s7271_s5 + $0x140] sm:$0xff] }
 0x24b   : > { %4163 = vmatprep.subr.bf16.mxu1 %v7326_v8  ;;  %3323 = vmatmul.mubr.msk.f32.gmra.mrb[24].mxu1 %vm6105_vm5, %v6100_v31  ;;  %v4500_v2 = vpop.eup %4499  ;;  %v1765_v55 = vadd.f32 1.0, %v4498_v25  ;;  %v1967_v19 = vrot.slane %v6174_v41, 1  ;;  %v7327_v42 = vpack.c.bf16 %v6075_v40, %v6070_v4  ;;  %v4168_v1 = vpack.c.bf16 %v2140_v33, %v2139_v43  ;;  %v2142_v4 = vld [vmem:[%s7271_s5 + $0x148] sm:$0xff]  ;;  %v2143_v50 = vld [vmem:[%s7271_s5 + $0x150] sm:$0xff] }
 0x24c   : > { %2331 = vmatprep.mubr.f32.mxu1 %v6159_v27  ;;  %v4170_v60 = vpack.c.bf16 %v2158_v48, %v2157_v49  ;;  %v6206_v59 = vsel %vm1860_vm4, %v6150_v23, %v1868_v7  ;;  %v6209_v63 = vsel %vm1860_vm4, %v1868_v7, 0.0  ;;  %v1822_v5 = vmul.f32 %v4500_v2, %v6010_v22  ;;  %v2159_v22 = vld [vmem:[%s7271_s5 + $0x1d0] sm:$0xff] }
 0x24d   : > { %4509 = vpow2.f32 %v3311_v15  ;;  %v6219_v40 = vadd.f32 %v4295_v35, %v5954_v17  ;;  %v1502_v43 = vpop.f32.mrb[28].mxu0  ;;  %v1968_v13 = vrot.slane %v6206_v59, 1  ;;  %v1970_v8 = vrot.slane %v6209_v63, 1 }
 0x24e   : > { %4165 = vmatpush3.bf16.msra.mxu1 %v7327_v42  ;;  %4511 = vrcp.f32 %v1765_v55  ;;  %v4502_v33 = vpop.eup %4501  ;;  %v6229_v49 = vrot.slane %v1822_v5, 7  ;;  %v4296_v48 = vadd.f32 %v5979_v6, %v1502_v43  ;;  %v1504_v17 = vpop.f32.mrb[29].mxu0  ;;  %v4172_v35 = vpack.c.bf16 %v2142_v4, %v2141_v16  ;;  %v2161_v5 = vld [vmem:[%s7271_s5 + $0x1e0] sm:$0xff] }
 0x24f   : > { %4167 = vmatprep.subr.bf16.mxu1 %v4166_v3  ;;  %v2160_v3 = vld [vmem:[%s7271_s5 + $0x1d8] sm:$0xff]  ;;  %2332 = vmatmul.mubr.f32.gmra.mrb[26].mxu1 %v6142_v21  ;;  %v4504_v14 = vpop.eup %4503  ;;  %v1766_v25 = vadd.f32 1.0, %v4502_v33  ;;  %v3312_v7 = vmul.f32 -1.442695, %v6219_v40  ;;  %v6235_v15 = vsel %vm544_vm1, %v1967_v19, %v1968_v13  ;;  %v6259_v16 = vsel %vm544_vm1, %v1968_v13, %v1970_v8  ;;  %v2145_v8 = vld [vmem:[%s7271_s5 + $0x160] sm:$0xff]  ;;  %v2146_v17 = vld [vmem:[%s7271_s5 + $0x168] sm:$0xff] }
 0x250   : > { %v1823_v2 = vmul.f32 %v4504_v14, %v6015_v9  ;;  %v6242_v55 = vadd.f32 %v4296_v48, %v5960_v62  ;;  %2336 = vmatprep.mubr.f32.mxu1 %v6235_v15  ;;  %v6247_v42 = vsel %vm1860_vm4, 0.0, %v6229_v49  ;;  %v4174_v19 = vpack.c.bf16 %v2160_v3, %v2159_v22  ;;  %v2162_v62 = vld [vmem:[%s7271_s5 + $0x1e8] sm:$0xff] }
 0x251   : > { %4513 = vrcp.f32 %v1766_v25  ;;  %v1507_v9 = vpop.f32.mrb[30].mxu0  ;;  %v1972_v33 = vrot.slane %v6247_v42, 1  ;;  %v4178_v13 = vpack.c.bf16 %v2162_v62, %v2161_v5 }
 0x252   : > { %4169 = vmatpush3.bf16.msra.mxu1 %v4168_v1  ;;  %v2144_v1 = vld [vmem:[%s7271_s5 + $0x158] sm:$0xff]  ;;  %v1871_v4 = vrot.slane %v1823_v2, 7  ;;  %4515 = vpow2.f32 %v3312_v7  ;;  %v4297_v43 = vadd.f32 %v5979_v6, %v1507_v9  ;;  %v1509_v22 = vpop.f32.mrb[31].mxu0  ;;  %v2163_v9 = vld [vmem:[%s7271_s5 + $0x1f0] sm:$0xff] }
 0x253   : > { %4171 = vmatprep.subr.bf16.mxu1 %v4170_v60  ;;  %v3313_v60 = vmul.f32 -1.442695, %v6242_v55  ;;  %3325 = vmatmul.mubr.msk.f32.gmra.mrb[28].mxu1 %vm6105_vm5, %v6150_v23  ;;  %v4506_v3 = vpop.eup %4505  ;;  %v4176_v48 = vpack.c.bf16 %v2144_v1, %v2143_v50 }
 0x254   : > { %2341 = vmatprep.mubr.f32.mxu1 %v6259_v16  ;;  %v4508_v14 = vpop.eup %4507  ;;  %v6276_v25 = vsel %vm1860_vm4, %v6229_v49, %v1871_v4  ;;  %v6279_v7 = vsel %vm1860_vm4, %v1871_v4, 0.0  ;;  %v6283_v2 = vadd.f32 %v4297_v43, %v5958_v39  ;;  %v2164_v4 = vld [vmem:[%s7271_s5 + $0x1f8] sm:$0xff]  ;;  %v4180_v43 = vpack.c.bf16 %v2146_v17, %v2145_v8  ;;  %v2147_v8 = vld [vmem:[%s7271_s5 + $0x170] sm:$0xff] }
 0x255   : > { %4517 = vpow2.f32 %v3313_v60  ;;  %v1767_v50 = vadd.f32 1.0, %v4508_v14  ;;  %v1512_v1 = vpop.f32.mrb[32].mxu0  ;;  %v1973_v5 = vrot.slane %v6276_v25, 1  ;;  %v1975_v62 = vrot.slane %v6279_v7, 1  ;;  %v2148_v17 = vld [vmem:[%s7271_s5 + $0x178] sm:$0xff] }
 0x256   : > { %4173 = vmatpush3.bf16.msra.mxu1 %v4172_v35  ;;  %v1824_v35 = vmul.f32 %v4506_v3, %v6060_v54  ;;  %v1514_v39 = vpop.f32.mrb[33].mxu0  ;;  %v3314_v14 = vmul.f32 -1.442695, %v6283_v2 }
 0x257   : > { %4175 = vmatprep.subr.bf16.mxu1 %v4174_v19  ;;  %v4510_v54 = vpop.eup %4509  ;;  %v4298_v19 = vadd.f32 %v5979_v6, %v1512_v1  ;;  %2342 = vmatmul.mubr.f32.gmra.mrb[30].mxu1 %v6206_v59  ;;  %4519 = vrcp.f32 %v1767_v50  ;;  %v6299_v24 = vsel %vm544_vm1, %v1972_v33, %v1973_v5  ;;  %v4182_v1 = vpack.c.bf16 %v2164_v4, %v2163_v9 }
 0x258   : > { %v6293_v60 = vrot.slane %v1824_v35, 7  ;;  %v4512_v22 = vpop.eup %4511  ;;  %v1768_v3 = vadd.f32 1.0, %v4510_v54  ;;  %2346 = vmatprep.mubr.f32.mxu1 %v6299_v24  ;;  %v4184_v4 = vpack.c.bf16 %v2148_v17, %v2147_v8 }
 0x259   : > { %v1825_v37 = vmul.f32 %v4512_v22, %v6095_v38  ;;  %v6303_v35 = vadd.f32 %v4298_v19, %v5964_v26  ;;  %v1517_v33 = vpop.f32.mrb[34].mxu0  ;;  %v2181_v26 = vld [vmem:[%s7271_s5 + $0x280] sm:$0xff]  ;;  %v2182_v38 = vld [vmem:[%s7271_s5 + $0x288] sm:$0xff] }
 0x25a   : > { %4177 = vmatpush3.bf16.msra.mxu1 %v4176_v48  ;;  %4521 = vrcp.f32 %v1768_v3  ;;  %v6313_v48 = vsel %vm544_vm1, %v1973_v5, %v1975_v62  ;;  %v4299_v50 = vadd.f32 %v5979_v6, %v1517_v33  ;;  %v1519_v9 = vpop.f32.mrb[35].mxu0  ;;  %v6327_v5 = vsel %vm1860_vm4, 0.0, %v6293_v60 }
 0x25b   : > { %4179 = vmatprep.subr.bf16.mxu1 %v4178_v13  ;;  %v1874_v13 = vrot.slane %v1825_v37, 7  ;;  %4523 = vpow2.f32 %v3314_v14  ;;  %3327 = vmatmul.mubr.msk.f32.gmra.mrb[32].mxu1 %vm6105_vm5, %v6229_v49  ;;  %v4514_v62 = vpop.eup %4513  ;;  %v4186_v22 = vpack.c.bf16 %v2182_v38, %v2181_v26 }
 0x25c   : > { %2351 = vmatprep.mubr.f32.mxu1 %v6313_v48  ;;  %v4516_v54 = vpop.eup %4515  ;;  %v1826_v39 = vmul.f32 %v4514_v62, %v6121_v29  ;;  %v6339_v14 = vadd.f32 %v4299_v50, %v5962_v57 }
 0x25d   : > { %v6332_v37 = vsel %vm1860_vm4, %v6293_v60, %v1874_v13  ;;  %v6335_v19 = vsel %vm1860_vm4, %v1874_v13, 0.0  ;;  %v1769_v3 = vadd.f32 1.0, %v4516_v54  ;;  %v1522_v33 = vpop.f32.mrb[36].mxu0 }
 0x25e   : > { %4181 = vmatpush3.bf16.msra.mxu1 %v4180_v43  ;;  %v1977_v43 = vrot.slane %v6327_v5, 1  ;;  %v1978_v8 = vrot.slane %v6332_v37, 1  ;;  %v4300_v9 = vadd.f32 %v5979_v6, %v1522_v33  ;;  %v1524_v58 = vpop.f32.mrb[37].mxu0  ;;  %v1980_v13 = vrot.slane %v6335_v19, 1 }
 0x25f   : > { %4183 = vmatprep.subr.bf16.mxu1 %v4182_v1  ;;  %v4518_v17 = vpop.eup %4517  ;;  %2352 = vmatmul.mubr.f32.gmra.mrb[34].mxu1 %v6276_v25  ;;  %v6346_v29 = vrot.slane %v1826_v39, 7  ;;  %4525 = vrcp.f32 %v1769_v3 }
 0x260   : > { %v1770_v1 = vadd.f32 1.0, %v4518_v17  ;;  %v6349_v57 = vsel %vm544_vm1, %v1977_v43, %v1978_v8  ;;  %v6352_v26 = vadd.f32 %v4300_v9, %v5974_v47  ;;  %v6362_v47 = vsel %vm544_vm1, %v1978_v8, %v1980_v13 }
 0x261   : > { %2356 = vmatprep.mubr.f32.mxu1 %v6349_v57  ;;  %v4520_v38 = vpop.eup %4519  ;;  %v1527_v58 = vpop.f32.mrb[38].mxu0 }
 0x262   : > { %4185 = vmatpush3.bf16.msra.mxu1 %v4184_v4  ;;  %4527 = vrcp.f32 %v1770_v1  ;;  %v1827_v50 = vmul.f32 %v4520_v38, %v6147_v32  ;;  %v3317_v62 = vmul.f32 -1.442695, %v6352_v26  ;;  %v4301_v54 = vadd.f32 %v5979_v6, %v1527_v58  ;;  %v1529_v39 = vpop.f32.mrb[39].mxu0 }
 0x263   : > { %4187 = vmatprep.subr.bf16.mxu1 %v4186_v22  ;;  %3329 = vmatmul.mubr.msk.f32.gmra.mrb[36].mxu1 %vm6105_vm5, %v6293_v60  ;;  %v6367_v22 = vsel %vm1860_vm4, 0.0, %v6346_v29 }
 0x264   : > { %v4522_v4 = vpop.eup %4521  ;;  %2361 = vmatprep.mubr.f32.mxu1 %v6362_v47  ;;  %v1877_v3 = vrot.slane %v1827_v50, 7  ;;  %4529 = vpow2.f32 %v3317_v62  ;;  %v6371_v6 = vadd.f32 %v4301_v54, %v5966_v28  ;;  %v1982_v13 = vrot.slane %v6367_v22, 1 }
 0x265   : > { %v4524_v32 = vpop.eup %4523  ;;  %v1828_v33 = vmul.f32 %v4522_v4, %v6169_v10 }
 0x266   : > { %v1771_v43 = vadd.f32 1.0, %v4524_v32  ;;  %v6375_v8 = vsel %vm1860_vm4, %v6346_v29, %v1877_v3  ;;  %v6378_v17 = vsel %vm1860_vm4, %v1877_v3, 0.0  ;;  %v3318_v9 = vmul.f32 -1.442695, %v6371_v6 }
 0x267   : > { %2362 = vmatmul.mubr.f32.gmra.mrb[38].mxu1 %v6332_v37  ;;  %v1983_v10 = vrot.slane %v6375_v8, 1  ;;  %v1985_v28 = vrot.slane %v6378_v17, 1  ;;  %v6385_v1 = vrot.slane %v1828_v33, 7 }
 0x268   : > { %4531 = vrcp.f32 %v1771_v43 }
 0x269   : > { %4533 = vpow2.f32 %v3318_v9  ;;  %v4526_v38 = vpop.eup %4525  ;;  %v6388_v58 = vsel %vm544_vm1, %v1982_v13, %v1983_v10  ;;  %v6396_v54 = vsel %vm544_vm1, %v1983_v10, %v1985_v28  ;;  %v6402_v32 = vsel %vm1860_vm4, 0.0, %v6385_v1 }
 0x26a   : > { %v1829_v50 = vmul.f32 %v4526_v38, %v6219_v40  ;;  %2366 = vmatprep.mubr.f32.mxu1 %v6388_v58  ;;  %v1987_v9 = vrot.slane %v6402_v32, 1 }
 0x26b   : > { %3331 = vmatmul.mubr.msk.f32.gmra.mrb[40].mxu1 %vm6105_vm5, %v6346_v29 }
 0x26c   : > { %v4528_v62 = vpop.eup %4527  ;;  %v1880_v39 = vrot.slane %v1829_v50, 7  ;;  %2371 = vmatprep.mubr.f32.mxu1 %v6396_v54 }
 0x26d   : > { %v1830_v4 = vmul.f32 %v4528_v62, %v6242_v55 }
 0x26e   : > { %v4530_v40 = vpop.eup %4529  ;;  %v6406_v3 = vsel %vm1860_vm4, %v6385_v1, %v1880_v39  ;;  %v6409_v33 = vsel %vm1860_vm4, %v1880_v39, 0.0 }
 0x26f   : > { %v1774_v43 = vadd.f32 1.0, %v4530_v40  ;;  %2372 = vmatmul.mubr.f32.gmra.mrb[42].mxu1 %v6375_v8  ;;  %v1988_v55 = vrot.slane %v6406_v3, 1  ;;  %v1990_v13 = vrot.slane %v6409_v33, 1  ;;  %v6415_v10 = vrot.slane %v1830_v4, 7 }
 0x271   : > { %4535 = vrcp.f32 %v1774_v43  ;;  %v6418_v38 = vsel %vm544_vm1, %v1987_v9, %v1988_v55  ;;  %v6426_v40 = vsel %vm544_vm1, %v1988_v55, %v1990_v13  ;;  %v6431_v43 = vsel %vm1860_vm4, 0.0, %v6415_v10 }
 0x272   : > { %v4532_v28 = vpop.eup %4531  ;;  %2376 = vmatprep.mubr.f32.mxu1 %v6418_v38  ;;  %v1992_v55 = vrot.slane %v6431_v43, 1 }
 0x273   : > { %v4534_v50 = vpop.eup %4533  ;;  %v1831_v62 = vmul.f32 %v4532_v28, %v6283_v2  ;;  %3333 = vmatmul.mubr.msk.f32.gmra.mrb[44].mxu1 %vm6105_vm5, %v6385_v1 }
 0x274   : > { %v1775_v39 = vadd.f32 1.0, %v4534_v50  ;;  %2381 = vmatprep.mubr.f32.mxu1 %v6426_v40 }
 0x275   : > { %v1883_v4 = vrot.slane %v1831_v62, 7 }
 0x276   : > { %4537 = vrcp.f32 %v1775_v39 }
 0x277   : > { %v6435_v2 = vsel %vm1860_vm4, %v6415_v10, %v1883_v4  ;;  %v6438_v9 = vsel %vm1860_vm4, %v1883_v4, 0.0  ;;  %2382 = vmatmul.mubr.f32.gmra.mrb[46].mxu1 %v6406_v3 }
 0x278   : > { %v1993_v13 = vrot.slane %v6435_v2, 1  ;;  %v1995_v28 = vrot.slane %v6438_v9, 1 }
 0x27a   : > { %v6445_v50 = vsel %vm544_vm1, %v1992_v55, %v1993_v13  ;;  %v6452_v39 = vsel %vm544_vm1, %v1993_v13, %v1995_v28  ;;  %v2166_v55 = vld [vmem:[%s7271_s5 + $0x208] sm:$0xff]  ;;  %v2183_v13 = vld [vmem:[%s7271_s5 + $0x290] sm:$0xff] }
 0x27b   : > { %2386 = vmatprep.mubr.f32.mxu1 %v6445_v50  ;;  %v4536_v62 = vpop.eup %4535 }
 0x27c   : > { %3335 = vmatmul.mubr.msk.f32.gmra.mrb[48].mxu1 %vm6105_vm5, %v6415_v10  ;;  %v1834_v4 = vmul.f32 %v4536_v62, %v6352_v26  ;;  %v2184_v26 = vld [vmem:[%s7271_s5 + $0x298] sm:$0xff] }
 0x27d   : > { %2391 = vmatprep.mubr.f32.mxu1 %v6452_v39  ;;  %v4190_v30 = vpack.c.bf16 %v2184_v26, %v2183_v13  ;;  %v4192_v13 = vpack.c.bf16 %v2168_v0, %v2167_v20  ;;  %v2187_v0 = vld [vmem:[%s7271_s5 + $0x2b0] sm:$0xff]  ;;  %v2188_v20 = vld [vmem:[%s7271_s5 + $0x2b8] sm:$0xff] }
 0x27e   : > { %v1838_v36 = vsel %vm507_vm3, %v1834_v4, 0.0  ;;  %v4188_v4 = vpack.c.bf16 %v2166_v55, %v2165_v12  ;;  %v4198_v53 = vpack.c.bf16 %v2188_v20, %v2187_v0  ;;  %v2174_v0 = vld [vmem:[%s7271_s5 + $0x248] sm:$0xff]  ;;  %v2024_v20 = vrot.slane %v6206_v59, 2 }
 0x27f   : > { %v6470_v62 = vrot.slane %v1838_v36, 7  ;;  %v2185_v36 = vld [vmem:[%s7271_s5 + $0x2a0] sm:$0xff] }
 0x280   : > { %v4538_v28 = vpop.eup %4537  ;;  %2392 = vmatmul.mubr.f32.gmra.mrb[50].mxu1 %v6435_v2 }
 0x281   : > { %v1835_v44 = vmul.f32 %v4538_v28, %v6371_v6  ;;  %3337 = vmatprep.mubr.msk.f32.mxu1 %vm6105_vm5, %v6100_v31  ;;  %v2186_v6 = vld [vmem:[%s7271_s5 + $0x2a8] sm:$0xff]  ;;  %v1930_v31 = vsel %vm1860_vm4, 0.0, %v6470_v62  ;;  %v2169_v28 = vld [vmem:[%s7271_s5 + $0x220] sm:$0xff] }
 0x282   : > { %v4194_v26 = vpack.c.bf16 %v2186_v6, %v2185_v36  ;;  %v4196_v11 = vpack.c.bf16 %v2170_v56, %v2169_v28  ;;  %v2172_v28 = vld [vmem:[%s7271_s5 + $0x238] sm:$0xff]  ;;  %v2189_v56 = vld [vmem:[%s7271_s5 + $0x2c0] sm:$0xff] }
 0x283   : > { %v1839_v12 = vsel %vm507_vm3, %v1835_v44, 0.0 }
 0x284   : > { %v1889_v55 = vrot.slane %v1839_v12, 7  ;;  %2462 = vmatmul.mubr.f32.vlgmr.msra.gmra.mrb[52].mxu1 %v6128_v52  ;;  %v2087_v12 = vrot.slane %v1930_v31, 1 }
 0x285   : > { %2466 = vmatprep.mubr.f32.mxu1 %v6142_v21  ;;  %4189 = vmatpush3.bf16.msra.mxu1 %v4188_v4  ;;  %v2094_v21 = vrot.slane %v1930_v31, 2 }
 0x286   : > { %4191 = vmatprep.subr.bf16.mxu1 %v4190_v30  ;;  %v6503_v44 = vsel %vm1860_vm4, %v6470_v62, %v1889_v55  ;;  %v1940_v52 = vsel %vm1860_vm4, %v1889_v55, 0.0 }
 0x287   : > { %v2088_v4 = vrot.slane %v6503_v44, 1  ;;  %v2090_v36 = vrot.slane %v1940_v52, 1  ;;  %v2095_v30 = vrot.slane %v6503_v44, 2  ;;  %v2097_v6 = vrot.slane %v1940_v52, 2 }
 0x288   : > { %2467 = vmatmul.mubr.f32.gmra.mrb[54].mxu1 %v6138_v34  ;;  %v2171_v34 = vld [vmem:[%s7271_s5 + $0x230] sm:$0xff] }
 0x289   : > { %3339 = vmatprep.mubr.msk.f32.mxu1 %vm6105_vm5, %v6150_v23  ;;  %4193 = vmatpush3.bf16.msra.mxu1 %v4192_v13  ;;  %v6519_v31 = vsel %vm544_vm1, %v2087_v12, %v2088_v4  ;;  %v6522_v55 = vsel %vm544_vm1, %v2088_v4, %v2090_v36  ;;  %v6525_v45 = vsel %vm615_vm2, %v2094_v21, %v2095_v30  ;;  %v2173_v21 = vld [vmem:[%s7271_s5 + $0x240] sm:$0xff]  ;;  %v2191_v4 = vld [vmem:[%s7271_s5 + $0x2d0] sm:$0xff]  ;;  %v2023_v36 = vrot.slane %v6174_v41, 2 }
 0x28a   : > { %4195 = vmatprep.subr.bf16.mxu1 %v4194_v26  ;;  %v6534_v13 = vsel %vm615_vm2, %v2095_v30, %v2097_v6  ;;  %v2190_v26 = vld [vmem:[%s7271_s5 + $0x2c8] sm:$0xff]  ;;  %v4200_v12 = vpack.c.bf16 %v2172_v28, %v2171_v34  ;;  %v4204_v30 = vpack.c.bf16 %v2174_v0, %v2173_v21  ;;  %v3316_v6 = vmul.f32 -1.442695, %v6339_v14  ;;  %v2175_v28 = vld [vmem:[%s7271_s5 + $0x250] sm:$0xff]  ;;  %v2193_v41 = vld [vmem:[%s7271_s5 + $0x2e0] sm:$0xff] }
 0x28b   : > { %7328 = vst [vmem:[#allocation12_spill] sm:$0xff] %v6534_v13  ;;  %v4202_v52 = vpack.c.bf16 %v2190_v26, %v2189_v56  ;;  %v2176_v56 = vld [vmem:[%s7271_s5 + $0x258] sm:$0xff]  ;;  %v6571_v26 = vsel %vm615_vm2, %v2023_v36, %v2024_v20  ;;  %v2026_v13 = vrot.slane %v6209_v63, 2  ;;  %v2177_v63 = vld [vmem:[%s7271_s5 + $0x260] sm:$0xff]  ;;  %v2178_v0 = vld [vmem:[%s7271_s5 + $0x268] sm:$0xff] }
 0x28c   : > { %2472 = vmatmul.mubr.f32.gmra.mrb[56].mxu1 %v6189_v61  ;;  %v2196_v36 = vld [vmem:[%s7271_s5 + $0x2f8] sm:$0xff] }
 0x28d   : > { %2476 = vmatprep.mubr.f32.mxu1 %v6206_v59  ;;  %4197 = vmatpush3.bf16.msra.mxu1 %v4196_v11  ;;  %v2192_v11 = vld [vmem:[%s7271_s5 + $0x2d8] sm:$0xff] }
 0x28e   : > { %4199 = vmatprep.subr.bf16.mxu1 %v4198_v53  ;;  %v3315_v53 = vmul.f32 -1.442695, %v6303_v35  ;;  %v4206_v34 = vpack.c.bf16 %v2192_v11, %v2191_v4  ;;  %v6589_v4 = vsel %vm615_vm2, %v2024_v20, %v2026_v13  ;;  %v2029_v11 = vrot.slane %v6276_v25, 2 }
 0x28f   : > { %v4212_v13 = vpack.c.bf16 %v2178_v0, %v2177_v63 }
 0x290   : > { %2477 = vmatmul.mubr.f32.gmra.mrb[58].mxu1 %v6192_v46  ;;  %4539 = vpow2.f32 %v3315_v53  ;;  %v2195_v53 = vld [vmem:[%s7271_s5 + $0x2f0] sm:$0xff] }
 0x291   : > { %3341 = vmatprep.mubr.msk.f32.mxu1 %vm6105_vm5, %v6229_v49  ;;  %4201 = vmatpush3.bf16.msra.mxu1 %v4200_v12  ;;  %v2194_v12 = vld [vmem:[%s7271_s5 + $0x2e8] sm:$0xff]  ;;  %4541 = vpow2.f32 %v3316_v6  ;;  %v4214_v20 = vpack.c.bf16 %v2196_v36, %v2195_v53  ;;  %v2179_v6 = vld [vmem:[%s7271_s5 + $0x270] sm:$0xff]  ;;  %v2033_v53 = vrot.slane %v6327_v5, 2  ;;  %v2039_v5 = vrot.slane %v6375_v8, 2 }
 0x292   : > { %4203 = vmatprep.subr.bf16.mxu1 %v4202_v52  ;;  %v4208_v52 = vpack.c.bf16 %v2176_v56, %v2175_v28  ;;  %v4210_v21 = vpack.c.bf16 %v2194_v12, %v2193_v41  ;;  %v2031_v56 = vrot.slane %v6279_v7, 2  ;;  %v2214_v41 = vld [vmem:[%s7271_s5 + $0x388] sm:$0xff]  ;;  %v2034_v7 = vrot.slane %v6332_v37, 2 }
 0x294   : > { %2482 = vmatmul.mubr.f32.gmra.mrb[60].mxu1 %v6571_v26  ;;  %v6622_v63 = vsel %vm615_vm2, %v2029_v11, %v2031_v56 }
 0x295   : > { %2486 = vmatprep.mubr.f32.mxu1 %v6276_v25  ;;  %4205 = vmatpush3.bf16.msra.mxu1 %v4204_v30  ;;  %v2028_v30 = vrot.slane %v6247_v42, 2  ;;  %v2213_v42 = vld [vmem:[%s7271_s5 + $0x380] sm:$0xff] }
 0x296   : > { %4207 = vmatprep.subr.bf16.mxu1 %v4206_v34  ;;  %v2180_v34 = vld [vmem:[%s7271_s5 + $0x278] sm:$0xff] }
 0x297   : > { %v6610_v28 = vsel %vm615_vm2, %v2028_v30, %v2029_v11  ;;  %v4216_v12 = vpack.c.bf16 %v2180_v34, %v2179_v6  ;;  %v2036_v11 = vrot.slane %v6335_v19, 2  ;;  %v2038_v6 = vrot.slane %v6367_v22, 2 }
 0x298   : > { %2487 = vmatmul.mubr.f32.gmra.mrb[62].mxu1 %v6589_v4  ;;  %v2041_v34 = vrot.slane %v6378_v17, 2  ;;  %v2043_v22 = vrot.slane %v6402_v32, 2  ;;  %v2049_v32 = vrot.slane %v6435_v2, 2 }
 0x299   : > { %3343 = vmatprep.mubr.msk.f32.mxu1 %vm6105_vm5, %v6293_v60  ;;  %4209 = vmatpush3.bf16.msra.mxu1 %v4208_v52  ;;  %v4218_v52 = vpack.c.bf16 %v2214_v41, %v2213_v42  ;;  %v6646_v19 = vsel %vm615_vm2, %v2038_v6, %v2039_v5  ;;  %v2044_v42 = vrot.slane %v6406_v3, 2  ;;  %v2216_v6 = vld [vmem:[%s7271_s5 + $0x398] sm:$0xff] }
 0x29a   : > { %4211 = vmatprep.subr.bf16.mxu1 %v4210_v21  ;;  %v4540_v21 = vpop.eup %4539  ;;  %v6652_v56 = vsel %vm615_vm2, %v2039_v5, %v2041_v34  ;;  %v2215_v5 = vld [vmem:[%s7271_s5 + $0x390] sm:$0xff] }
 0x29b   : > { %v4542_v0 = vpop.eup %4541  ;;  %v1772_v36 = vadd.f32 1.0, %v4540_v21  ;;  %v2046_v21 = vrot.slane %v6409_v33, 2 }
 0x29c   : > { %2492 = vmatmul.mubr.f32.gmra.mrb[64].mxu1 %v6610_v28  ;;  %v1773_v30 = vadd.f32 1.0, %v4542_v0 }
 0x29d   : > { %2496 = vmatprep.mubr.f32.mxu1 %v6332_v37  ;;  %4213 = vmatpush3.bf16.msra.mxu1 %v4212_v13  ;;  %v6631_v13 = vsel %vm615_vm2, %v2033_v53, %v2034_v7  ;;  %4543 = vrcp.f32 %v1772_v36  ;;  %v6673_v53 = vsel %vm615_vm2, %v2044_v42, %v2046_v21  ;;  %v2051_v36 = vrot.slane %v6438_v9, 2 }
 0x29e   : > { %4215 = vmatprep.subr.bf16.mxu1 %v4214_v20  ;;  %4545 = vrcp.f32 %v1773_v30  ;;  %v6637_v20 = vsel %vm615_vm2, %v2034_v7, %v2036_v11  ;;  %v2197_v11 = vld [vmem:[%s7271_s5 + $0x300] sm:$0xff] }
 0x29f   : > { %v6701_v9 = vsel %vm615_vm2, %v2049_v32, %v2051_v36  ;;  %v2219_v36 = vld [vmem:[%s7271_s5 + $0x3b0] sm:$0xff] }
 0x2a0   : > { %2497 = vmatmul.mubr.f32.gmra.mrb[66].mxu1 %v6622_v63 }
 0x2a1   : > { %3345 = vmatprep.mubr.msk.f32.mxu1 %vm6105_vm5, %v6346_v29  ;;  %4217 = vmatpush3.bf16.msra.mxu1 %v4216_v12 }
 0x2a2   : > { %4219 = vmatprep.subr.bf16.mxu1 %v4218_v52  ;;  %v6662_v52 = vsel %vm615_vm2, %v2043_v22, %v2044_v42  ;;  %v4222_v42 = vpack.c.bf16 %v2216_v6, %v2215_v5  ;;  %v2217_v22 = vld [vmem:[%s7271_s5 + $0x3a0] sm:$0xff]  ;;  %v2204_v5 = vld [vmem:[%s7271_s5 + $0x338] sm:$0xff] }
 0x2a3   : > { %v2221_v6 = vld [vmem:[%s7271_s5 + $0x3c0] sm:$0xff] }
 0x2a4   : > { %2502 = vmatmul.mubr.f32.gmra.mrb[68].mxu1 %v6631_v13 }
 0x2a5   : > { %2506 = vmatprep.mubr.f32.mxu1 %v6375_v8 }
 0x2a7   : > { %v4544_v41 = vpop.eup %4543 }
 0x2a8   : > { %2507 = vmatmul.mubr.f32.gmra.mrb[70].mxu1 %v6637_v20  ;;  %v4546_v12 = vpop.eup %4545  ;;  %v1832_v17 = vmul.f32 %v4544_v41, %v6303_v35  ;;  %v2199_v41 = vld [vmem:[%s7271_s5 + $0x310] sm:$0xff] }
 0x2a9   : > { %3347 = vmatprep.mubr.msk.f32.mxu1 %vm6105_vm5, %v6385_v1  ;;  %v6666_v7 = vmul.f32 %v4546_v12, %v6339_v14  ;;  %v2048_v14 = vrot.slane %v6431_v43, 2  ;;  %v2198_v43 = vld [vmem:[%s7271_s5 + $0x308] sm:$0xff]  ;;  %v2200_v12 = vld [vmem:[%s7271_s5 + $0x318] sm:$0xff] }
 0x2aa   : > { %v6670_v0 = vrot.slane %v1832_v17, 7  ;;  %v4220_v34 = vpack.c.bf16 %v2198_v43, %v2197_v11  ;;  %v2218_v17 = vld [vmem:[%s7271_s5 + $0x3a8] sm:$0xff]  ;;  %v2203_v43 = vld [vmem:[%s7271_s5 + $0x330] sm:$0xff] }
 0x2ab   : > { %v1886_v35 = vrot.slane %v6666_v7, 7  ;;  %v6683_v33 = vsel %vm615_vm2, %v2048_v14, %v2049_v32  ;;  %v4226_v21 = vpack.c.bf16 %v2218_v17, %v2217_v22  ;;  %v2201_v32 = vld [vmem:[%s7271_s5 + $0x320] sm:$0xff]  ;;  %v2202_v14 = vld [vmem:[%s7271_s5 + $0x328] sm:$0xff]  ;;  %v2223_v22 = vld [vmem:[%s7271_s5 + $0x3d0] sm:$0xff] }
 0x2ac   : > { %2512 = vmatmul.mubr.f32.gmra.mrb[72].mxu1 %v6646_v19  ;;  %v2224_v17 = vld [vmem:[%s7271_s5 + $0x3d8] sm:$0xff] }
 0x2ad   : > { %2516 = vmatprep.mubr.f32.mxu1 %v6406_v3  ;;  %v6691_v30 = vsel %vm1860_vm4, %v6670_v0, %v1886_v35 }
 0x2b0   : > { %2517 = vmatmul.mubr.f32.gmra.mrb[74].mxu1 %v6652_v56 }
 0x2b1   : > { %3349 = vmatprep.mubr.msk.f32.mxu1 %vm6105_vm5, %v6415_v10 }
 0x2b4   : > { %2522 = vmatmul.mubr.f32.gmra.mrb[76].mxu1 %v6662_v52 }
 0x2b5   : > { %2526 = vmatprep.mubr.f32.mxu1 %v6435_v2 }
 0x2b8   : > { %2527 = vmatmul.mubr.f32.gmra.mrb[78].mxu1 %v6673_v53 }
 0x2b9   : > { %3351 = vmatprep.mubr.msk.f32.mxu1 %vm6105_vm5, %v6670_v0 }
 0x2bc   : > { %2532 = vmatmul.mubr.f32.gmra.mrb[80].mxu1 %v6683_v33 }
 0x2bd   : > { %2536 = vmatprep.mubr.f32.mxu1 %v6691_v30 }
 0x2c0   : > { %2537 = vmatmul.mubr.f32.gmra.mrb[82].mxu1 %v6701_v9 }
 0x2c1   : > { %2606 = vmatprep.mubr.f32.mxu1 %v6189_v61  ;;  %v4224_v61 = vpack.c.bf16 %v2200_v12, %v2199_v41  ;;  %v2205_v41 = vld [vmem:[%s7271_s5 + $0x340] sm:$0xff]  ;;  %v2206_v12 = vld [vmem:[%s7271_s5 + $0x348] sm:$0xff] }
 0x2c4   : > { %2607 = vmatmul.mubr.f32.vlgmr.msra.gmra.mrb[84].mxu1 %v6156_v51  ;;  %v2220_v51 = vld [vmem:[%s7271_s5 + $0x3b8] sm:$0xff] }
 0x2c5   : > { %2611 = vmatprep.mubr.f32.mxu1 %v6192_v46  ;;  %4221 = vmatpush3.bf16.msra.mxu1 %v4220_v34  ;;  %v4228_v46 = vpack.c.bf16 %v2202_v14, %v2201_v32  ;;  %v4230_v11 = vpack.c.bf16 %v2220_v51, %v2219_v36  ;;  %v4232_v34 = vpack.c.bf16 %v2204_v5, %v2203_v43  ;;  %v2207_v32 = vld [vmem:[%s7271_s5 + $0x350] sm:$0xff]  ;;  %v2208_v14 = vld [vmem:[%s7271_s5 + $0x358] sm:$0xff]  ;;  %v2225_v36 = vld [vmem:[%s7271_s5 + $0x3e0] sm:$0xff] }
 0x2c6   : > { %4223 = vmatprep.subr.bf16.mxu1 %v4222_v42  ;;  %v2226_v51 = vld [vmem:[%s7271_s5 + $0x3e8] sm:$0xff]  ;;  %v2209_v43 = vld [vmem:[%s7271_s5 + $0x360] sm:$0xff] }
 0x2c7   : > { %v2210_v5 = vld [vmem:[%s7271_s5 + $0x368] sm:$0xff] }
 0x2c8   : > { %2612 = vmatmul.mubr.f32.gmra.mrb[86].mxu1 %v6159_v27  ;;  %v2222_v27 = vld [vmem:[%s7271_s5 + $0x3c8] sm:$0xff] }
 0x2c9   : > { %2616 = vmatprep.mubr.f32.mxu1 %v6571_v26  ;;  %4225 = vmatpush3.bf16.msra.mxu1 %v4224_v61  ;;  %v4234_v42 = vpack.c.bf16 %v2222_v27, %v2221_v6  ;;  %v4236_v61 = vpack.c.bf16 %v2206_v12, %v2205_v41  ;;  %v2227_v6 = vld [vmem:[%s7271_s5 + $0x3f0] sm:$0xff]  ;;  %v2228_v27 = vld [vmem:[%s7271_s5 + $0x3f8] sm:$0xff] }
 0x2ca   : > { %4227 = vmatprep.subr.bf16.mxu1 %v4226_v21  ;;  %v4238_v21 = vpack.c.bf16 %v2224_v17, %v2223_v22  ;;  %v2211_v41 = vld [vmem:[%s7271_s5 + $0x370] sm:$0xff]  ;;  %v2212_v12 = vld [vmem:[%s7271_s5 + $0x378] sm:$0xff]  ;;  %v2229_v22 = vld [vmem:[%s7271_s5 + $0x400] sm:$0xff] }
 0x2cb   : > { %v2230_v17 = vld [vmem:[%s7271_s5 + $0x408] sm:$0xff] }
 0x2cc   : > { %2617 = vmatmul.mubr.f32.gmra.mrb[88].mxu1 %v6235_v15 }
 0x2cd   : > { %2621 = vmatprep.mubr.f32.mxu1 %v6589_v4  ;;  %4229 = vmatpush3.bf16.msra.mxu1 %v4228_v46  ;;  %v4240_v46 = vpack.c.bf16 %v2208_v14, %v2207_v32  ;;  %v1929_v32 = vsel %vm1860_vm4, 0.0, %v6670_v0  ;;  %v2079_v14 = vrot.slane %v6691_v30, 2 }
 0x2ce   : > { %4231 = vmatprep.subr.bf16.mxu1 %v4230_v11  ;;  %v4242_v11 = vpack.c.bf16 %v2226_v51, %v2225_v36  ;;  %v1939_v36 = vsel %vm1860_vm4, %v1886_v35, 0.0  ;;  %v2078_v51 = vrot.slane %v1929_v32, 2 }
 0x2cf   : > { %v2074_v7 = vrot.slane %v1939_v36, 1 }
 0x2d0   : > { %2622 = vmatmul.mubr.f32.gmra.mrb[90].mxu1 %v6259_v16 }
 0x2d1   : > { %2626 = vmatprep.mubr.f32.mxu1 %v6610_v28  ;;  %4233 = vmatpush3.bf16.msra.mxu1 %v4232_v34  ;;  %v4244_v34 = vpack.c.bf16 %v2210_v5, %v2209_v43  ;;  %v2081_v43 = vrot.slane %v1939_v36, 2  ;;  %v2071_v5 = vrot.slane %v1929_v32, 1  ;;  %v2240_v32 = vld [vmem:[%s7271_s5 + $0x458] sm:$0xff] }
 0x2d2   : > { %4235 = vmatprep.subr.bf16.mxu1 %v4234_v42  ;;  %v4246_v42 = vpack.c.bf16 %v2228_v27, %v2227_v6 }
 0x2d3   : > { %v6838_v35 = vsel %vm615_vm2, %v2079_v14, %v2081_v43 }
 0x2d4   : > { %2627 = vmatmul.mubr.f32.gmra.mrb[92].mxu1 %v6299_v24 }
 0x2d5   : > { %2631 = vmatprep.mubr.f32.mxu1 %v6622_v63  ;;  %4237 = vmatpush3.bf16.msra.mxu1 %v4236_v61  ;;  %v4248_v61 = vpack.c.bf16 %v2212_v12, %v2211_v41  ;;  %v2233_v12 = vld [vmem:[%s7271_s5 + $0x420] sm:$0xff] }
 0x2d6   : > { %4239 = vmatprep.subr.bf16.mxu1 %v4238_v21  ;;  %v4250_v21 = vpack.c.bf16 %v2230_v17, %v2229_v22  ;;  %v2234_v22 = vld [vmem:[%s7271_s5 + $0x428] sm:$0xff] }
 0x2d7   : > { %v4258_v17 = vpack.c.bf16 %v2234_v22, %v2233_v12 }
 0x2d8   : > { %2632 = vmatmul.mubr.f32.gmra.mrb[94].mxu1 %v6313_v48 }
 0x2d9   : > { %2636 = vmatprep.mubr.f32.mxu1 %v6631_v13  ;;  %4241 = vmatpush3.bf16.msra.mxu1 %v4240_v46  ;;  %v2072_v46 = vrot.slane %v6691_v30, 1 }
 0x2da   : > { %4243 = vmatprep.subr.bf16.mxu1 %v4242_v11  ;;  %v6830_v11 = vsel %vm615_vm2, %v2078_v51, %v2079_v14  ;;  %v2242_v14 = vld [vmem:[%s7271_s5 + $0x468] sm:$0xff]  ;;  %v2243_v51 = vld [vmem:[%s7271_s5 + $0x470] sm:$0xff] }
 0x2db   : > { %v6834_v6 = vsel %vm544_vm1, %v2071_v5, %v2072_v46  ;;  %v6842_v27 = vsel %vm544_vm1, %v2072_v46, %v2074_v7  ;;  %v2244_v46 = vld [vmem:[%s7271_s5 + $0x478] sm:$0xff] }
 0x2dc   : > { %2637 = vmatmul.mubr.f32.gmra.mrb[96].mxu1 %v6349_v57 }
 0x2dd   : > { %2641 = vmatprep.mubr.f32.mxu1 %v6637_v20  ;;  %4245 = vmatpush3.bf16.msra.mxu1 %v4244_v34  ;;  %v2231_v34 = vld [vmem:[%s7271_s5 + $0x410] sm:$0xff] }
 0x2de   : > { %4247 = vmatprep.subr.bf16.mxu1 %v4246_v42  ;;  %v2232_v42 = vld [vmem:[%s7271_s5 + $0x418] sm:$0xff] }
 0x2df   : > { %v4254_v41 = vpack.c.bf16 %v2232_v42, %v2231_v34 }
 0x2e0   : > { %2642 = vmatmul.mubr.f32.gmra.mrb[98].mxu1 %v6362_v47 }
 0x2e1   : > { %2646 = vmatprep.mubr.f32.mxu1 %v6646_v19  ;;  %4249 = vmatpush3.bf16.msra.mxu1 %v4248_v61  ;;  %v2236_v61 = vld [vmem:[%s7271_s5 + $0x438] sm:$0xff] }
 0x2e2   : > { %4251 = vmatprep.subr.bf16.mxu1 %v4250_v21 }
 0x2e4   : > { %2647 = vmatmul.mubr.f32.gmra.mrb[100].mxu1 %v6388_v58 }
 0x2e5   : > { %2651 = vmatprep.mubr.f32.mxu1 %v6652_v56 }
 0x2e8   : > { %2652 = vmatmul.mubr.f32.gmra.mrb[102].mxu1 %v6396_v54 }
 0x2e9   : > { %2656 = vmatprep.mubr.f32.mxu1 %v6662_v52 }
 0x2ec   : > { %2657 = vmatmul.mubr.f32.gmra.mrb[104].mxu1 %v6418_v38 }
 0x2ed   : > { %2661 = vmatprep.mubr.f32.mxu1 %v6673_v53 }
 0x2f0   : > { %2662 = vmatmul.mubr.f32.gmra.mrb[106].mxu1 %v6426_v40 }
 0x2f1   : > { %2666 = vmatprep.mubr.f32.mxu1 %v6683_v33 }
 0x2f4   : > { %2667 = vmatmul.mubr.f32.gmra.mrb[108].mxu1 %v6445_v50 }
 0x2f5   : > { %2671 = vmatprep.mubr.f32.mxu1 %v6701_v9 }
 0x2f8   : > { %2672 = vmatmul.mubr.f32.gmra.mrb[110].mxu1 %v6452_v39 }
 0x2f9   : > { %2676 = vmatprep.mubr.f32.mxu1 %v6830_v11 }
 0x2fc   : > { %2677 = vmatmul.mubr.f32.gmra.mrb[112].mxu1 %v6834_v6 }
 0x2fd   : > { %2681 = vmatprep.mubr.f32.mxu1 %v6838_v35 }
 0x300   : > { %2682 = vmatmul.mubr.f32.gmra.mrb[114].mxu1 %v6842_v27 }
 0x301   : > { %2751 = vmatprep.mubr.f32.mxu1 %v6235_v15  ;;  %v2235_v15 = vld [vmem:[%s7271_s5 + $0x430] sm:$0xff] }
 0x304   : > { %3353 = vmatmul.mubr.msk.f32.vlgmr.msra.gmra.mrb[116].mxu1 %vm6105_vm5, %v6150_v23  ;;  %v4262_v23 = vpack.c.bf16 %v2236_v61, %v2235_v15 }
 0x305   : > { %2756 = vmatprep.mubr.f32.mxu1 %v6259_v16  ;;  %4253 = vmatpush3.bf16.msra.mxu1 %v4250_v21  ;;  %v2237_v16 = vld [vmem:[%s7271_s5 + $0x440] sm:$0xff]  ;;  %v2238_v21 = vld [vmem:[%s7271_s5 + $0x448] sm:$0xff] }
 0x306   : > { %4255 = vmatprep.subr.bf16.mxu1 %v4254_v41 }
 0x308   : > { %2757 = vmatmul.mubr.f32.gmra.mrb[118].mxu1 %v6206_v59  ;;  %v2239_v59 = vld [vmem:[%s7271_s5 + $0x450] sm:$0xff] }
 0x309   : > { %2761 = vmatprep.mubr.f32.mxu1 %v6299_v24  ;;  %4257 = vmatpush3.bf16.msra.mxu1 %v4254_v41  ;;  %v4266_v24 = vpack.c.bf16 %v2238_v21, %v2237_v16 }
 0x30a   : > { %4259 = vmatprep.subr.bf16.mxu1 %v4258_v17 }
 0x30c   : > { %3355 = vmatmul.mubr.msk.f32.gmra.mrb[120].mxu1 %vm6105_vm5, %v6229_v49  ;;  %v4270_v49 = vpack.c.bf16 %v2240_v32, %v2239_v59 }
 0x30d   : > { %2766 = vmatprep.mubr.f32.mxu1 %v6313_v48  ;;  %4261 = vmatpush3.bf16.msra.mxu1 %v4258_v17  ;;  %v2241_v48 = vld [vmem:[%s7271_s5 + $0x460] sm:$0xff] }
 0x30e   : > { %4263 = vmatprep.subr.bf16.mxu1 %v4262_v23 }
 0x310   : > { %2767 = vmatmul.mubr.f32.gmra.mrb[122].mxu1 %v6276_v25 }
 0x311   : > { %2771 = vmatprep.mubr.f32.mxu1 %v6349_v57  ;;  %4265 = vmatpush3.bf16.msra.mxu1 %v4262_v23  ;;  %v4274_v57 = vpack.c.bf16 %v2242_v14, %v2241_v48 }
 0x312   : > { %4267 = vmatprep.subr.bf16.mxu1 %v4266_v24 }
 0x314   : > { %3357 = vmatmul.mubr.msk.f32.gmra.mrb[124].mxu1 %vm6105_vm5, %v6293_v60 }
 0x315   : > { %2776 = vmatprep.mubr.f32.mxu1 %v6362_v47  ;;  %4269 = vmatpush3.bf16.msra.mxu1 %v4266_v24  ;;  %v3460_v25 = vpop.f32.mrb[20].mxu1  ;;  %v4278_v47 = vpack.c.bf16 %v2244_v46, %v2243_v51  ;;  %v7329_v46 = vld [vmem:[#allocation12_spill] sm:$0xff] }
 0x316   : > { %4271 = vmatprep.subr.bf16.mxu1 %v4270_v49  ;;  %v3461_v36 = vpop.f32.mrb[21].mxu1 }
 0x317   : > { %v6904_v43 = vadd.f32 %v3461_v36, %v3460_v25 }
 0x318   : > { %2777 = vmatmul.mubr.f32.gmra.mrb[126].mxu1 %v6332_v37 }
 0x319   : > { %2781 = vmatprep.mubr.f32.mxu1 %v6388_v58  ;;  %4273 = vmatpush3.bf16.msra.mxu1 %v4270_v49  ;;  %v3463_v60 = vpop.f32.mrb[22].mxu1 }
 0x31a   : > { %4275 = vmatprep.subr.bf16.mxu1 %v4274_v57  ;;  %v3464_v5 = vpop.f32.mrb[23].mxu1 }
 0x31b   : > { %v6908_v7 = vadd.f32 %v3464_v5, %v3463_v60 }
 0x31c   : > { %3359 = vmatmul.mubr.msk.f32.gmra.mrb[128].mxu1 %vm6105_vm5, %v6346_v29 }
 0x31d   : > { %2786 = vmatprep.mubr.f32.mxu1 %v6396_v54  ;;  %4277 = vmatpush3.bf16.msra.mxu1 %v4274_v57 }
 0x31e   : > { %v3466_v34 = vpop.f32.mrb[24].mxu1  ;;  %4279 = vmatprep.subr.bf16.mxu1 %v4278_v47 }
 0x31f   : > { %v3467_v42 = vpop.f32.mrb[25].mxu1 }
 0x320   : > { %v6914_v37 = vadd.f32 %v3467_v42, %v3466_v34  ;;  %2787 = vmatmul.mubr.f32.gmra.mrb[130].mxu1 %v6375_v8 }
 0x321   : > { %2791 = vmatprep.mubr.f32.mxu1 %v6418_v38  ;;  %4281 = vmatpush3.bf16.msra.mxu1 %v4278_v47 }
 0x322   : > { %v3469_v58 = vpop.f32.mrb[26].mxu1 }
 0x323   : > { %v3470_v41 = vpop.f32.mrb[27].mxu1 }
 0x324   : > { %v6918_v12 = vadd.f32 %v3470_v41, %v3469_v58  ;;  %3361 = vmatmul.mubr.msk.f32.gmra.mrb[132].mxu1 %vm6105_vm5, %v6385_v1 }
 0x325   : > { %2796 = vmatprep.mubr.f32.mxu1 %v6426_v40 }
 0x326   : > { %v3472_v29 = vpop.f32.mrb[28].mxu1 }
 0x327   : > { %v3473_v54 = vpop.f32.mrb[29].mxu1 }
 0x328   : > { %v6924_v22 = vadd.f32 %v3473_v54, %v3472_v29  ;;  %2797 = vmatmul.mubr.f32.gmra.mrb[134].mxu1 %v6406_v3 }
 0x329   : > { %2801 = vmatprep.mubr.f32.mxu1 %v6445_v50 }
 0x32a   : > { %v3475_v8 = vpop.f32.mrb[30].mxu1 }
 0x32b   : > { %v3476_v38 = vpop.f32.mrb[31].mxu1 }
 0x32c   : > { %v6928_v17 = vadd.f32 %v3476_v38, %v3475_v8  ;;  %3363 = vmatmul.mubr.msk.f32.gmra.mrb[136].mxu1 %vm6105_vm5, %v6415_v10 }
 0x32d   : > { %2806 = vmatprep.mubr.f32.mxu1 %v6452_v39 }
 0x32e   : > { %v3478_v1 = vpop.f32.mrb[32].mxu1 }
 0x32f   : > { %v3479_v40 = vpop.f32.mrb[33].mxu1 }
 0x330   : > { %v6934_v15 = vadd.f32 %v3479_v40, %v3478_v1  ;;  %2807 = vmatmul.mubr.f32.gmra.mrb[138].mxu1 %v6435_v2 }
 0x331   : > { %2811 = vmatprep.mubr.f32.mxu1 %v6834_v6 }
 0x332   : > { %v3481_v3 = vpop.f32.mrb[34].mxu1 }
 0x333   : > { %v3482_v50 = vpop.f32.mrb[35].mxu1 }
 0x334   : > { %v6938_v61 = vadd.f32 %v3482_v50, %v3481_v3  ;;  %3365 = vmatmul.mubr.msk.f32.gmra.mrb[140].mxu1 %vm6105_vm5, %v6670_v0 }
 0x335   : > { %2816 = vmatprep.mubr.f32.mxu1 %v6842_v27 }
 0x336   : > { %v3484_v10 = vpop.f32.mrb[36].mxu1 }
 0x337   : > { %v3485_v39 = vpop.f32.mrb[37].mxu1 }
 0x338   : > { %v6944_v23 = vadd.f32 %v3485_v39, %v3484_v10  ;;  %2817 = vmatmul.mubr.f32.gmra.mrb[142].mxu1 %v6691_v30 }
 0x339   : > { %2821 = vmatprep.mubr.f32.mxu1 %v6519_v31 }
 0x33a   : > { %v3487_v2 = vpop.f32.mrb[38].mxu1 }
 0x33b   : > { %v3488_v6 = vpop.f32.mrb[39].mxu1 }
 0x33c   : > { %v6948_v16 = vadd.f32 %v3488_v6, %v3487_v2  ;;  %3367 = vmatmul.mubr.msk.f32.gmra.mrb[144].mxu1 %vm6105_vm5, %v6470_v62 }
 0x33d   : > { %2826 = vmatprep.mubr.f32.mxu1 %v6522_v55 }
 0x33e   : > { %v3490_v0 = vpop.f32.mrb[40].mxu1 }
 0x33f   : > { %v3491_v27 = vpop.f32.mrb[41].mxu1 }
 0x340   : > { %2827 = vmatmul.mubr.f32.gmra.mrb[146].mxu1 %v6503_v44  ;;  %v6955_v21 = vadd.f32 %v3491_v27, %v3490_v0 }
 0x341   : > { %3874 = vmatprep.mubr.f32.mxu1 %v6571_v26 }
 0x342   : > { %v3493_v30 = vpop.f32.mrb[42].mxu1 }
 0x343   : > { %v3494_v31 = vpop.f32.mrb[43].mxu1 }
 0x344   : > { %3875 = vmatmul.mubr.f32.vlgmr.msra.gmra.mrb[148].mxu1 %v6589_v4  ;;  %v6959_v24 = vadd.f32 %v3494_v31, %v3493_v30 }
 0x345   : > { %3877 = vmatprep.mubr.f32.mxu1 %v6610_v28 }
 0x346   : > { %v3496_v18 = vpop.f32.mrb[44].mxu1 }
 0x347   : > { %v3497_v62 = vpop.f32.mrb[45].mxu1 }
 0x348   : > { %3878 = vmatmul.mubr.f32.gmra.mrb[150].mxu1 %v6622_v63  ;;  %v6963_v55 = vadd.f32 %v3497_v62, %v3496_v18 }
 0x349   : > { %3880 = vmatprep.mubr.f32.mxu1 %v6631_v13 }
 0x34a   : > { %v3499_v44 = vpop.f32.mrb[46].mxu1 }
 0x34b   : > { %v3500_v59 = vpop.f32.mrb[47].mxu1 }
 0x34c   : > { %3881 = vmatmul.mubr.f32.gmra.mrb[152].mxu1 %v6637_v20  ;;  %v6967_v26 = vadd.f32 %v3500_v59, %v3499_v44  ;;  %v6981_v20 = vld [vmem:[%s7272_s6] ss:$0 sm:$0xff] }
 0x34d   : > { %3883 = vmatprep.mubr.f32.mxu1 %v6646_v19  ;;  %v2334_v5 = vadd.f32 %v6918_v12, %v6981_v20  ;;  %v2339_v58 = vadd.f32 %v6924_v22, %v6981_v20  ;;  %v2344_v8 = vadd.f32 %v6928_v17, %v6981_v20  ;;  %v2349_v3 = vadd.f32 %v6934_v15, %v6981_v20 }
 0x34e   : > { %v2354_v2 = vadd.f32 %v6938_v61, %v6981_v20  ;;  %v2359_v30 = vadd.f32 %v6944_v23, %v6981_v20  ;;  %v2364_v44 = vadd.f32 %v6948_v16, %v6981_v20 }
 0x34f   : > { %v3502_v4 = vpop.f32.mrb[48].mxu1 }
 0x350   : > { %v3503_v32 = vpop.f32.mrb[49].mxu1  ;;  %3884 = vmatmul.mubr.f32.gmra.mrb[154].mxu1 %v6652_v56  ;;  %v2319_v56 = vadd.f32 %v6904_v43, %v6981_v20 }
 0x351   : > { %v6971_v28 = vadd.f32 %v3503_v32, %v3502_v4  ;;  %3886 = vmatprep.mubr.f32.mxu1 %v6662_v52 }
 0x353   : > { %v3505_v63 = vpop.f32.mrb[50].mxu1 }
 0x354   : > { %v3506_v49 = vpop.f32.mrb[51].mxu1  ;;  %3887 = vmatmul.mubr.f32.gmra.mrb[156].mxu1 %v6673_v53 }
 0x355   : > { %v6975_v13 = vadd.f32 %v3506_v49, %v3505_v63  ;;  %3889 = vmatprep.mubr.f32.mxu1 %v6683_v33  ;;  %v2324_v33 = vadd.f32 %v6908_v7, %v6981_v20  ;;  %v2369_v63 = vadd.f32 %v6955_v21, %v6981_v20 }
 0x357   : > { %v3540_v19 = vpop.f32.mrb[52].mxu1 }
 0x358   : > { %v3541_v48 = vpop.f32.mrb[53].mxu1  ;;  %3890 = vmatmul.mubr.f32.gmra.mrb[158].mxu1 %v6701_v9 }
 0x359   : > { %v3542_v52 = vadd.f32 %v3541_v48, %v3540_v19  ;;  %3892 = vmatprep.mubr.f32.mxu1 %v6830_v11  ;;  %v2329_v11 = vadd.f32 %v6914_v37, %v6981_v20 }
 0x35b   : > { %v6987_v53 = vadd.f32 %v3542_v52, %v2319_v56  ;;  %v3543_v14 = vpop.f32.mrb[54].mxu1  ;;  %v2374_v56 = vadd.f32 %v6959_v24, %v6981_v20 }
 0x35c   : > { %v3544_v25 = vpop.f32.mrb[55].mxu1  ;;  %3893 = vmatmul.mubr.f32.gmra.mrb[160].mxu1 %v6838_v35 }
 0x35d   : > { %v3545_v57 = vadd.f32 %v3544_v25, %v3543_v14  ;;  %3895 = vmatprep.mubr.f32.mxu1 %v6525_v45 }
 0x35f   : > { %v6993_v36 = vadd.f32 %v3545_v57, %v2324_v33  ;;  %v3546_v9 = vpop.f32.mrb[56].mxu1  ;;  %v2379_v33 = vadd.f32 %v6963_v55, %v6981_v20 }
 0x360   : > { %v3547_v51 = vpop.f32.mrb[57].mxu1  ;;  %3896 = vmatmul.mubr.f32.gmra.mrb[162].mxu1 %v7329_v46  ;;  %v2384_v46 = vadd.f32 %v6967_v26, %v6981_v20 }
 0x361   : > { %v3548_v43 = vadd.f32 %v3547_v51, %v3546_v9 }
 0x363   : > { %v6998_v60 = vadd.f32 %v3548_v43, %v2329_v11  ;;  %v3549_v47 = vpop.f32.mrb[58].mxu1 }
 0x364   : > { %v3550_v35 = vpop.f32.mrb[59].mxu1 }
 0x365   : > { %v3551_v7 = vadd.f32 %v3550_v35, %v3549_v47  ;;  %v2389_v35 = vadd.f32 %v6971_v28, %v6981_v20 }
 0x367   : > { %v7002_v34 = vadd.f32 %v3551_v7, %v2334_v5  ;;  %v3552_v45 = vpop.f32.mrb[60].mxu1 }
 0x368   : > { %v3553_v42 = vpop.f32.mrb[61].mxu1 }
 0x369   : > { %v3554_v41 = vadd.f32 %v3553_v42, %v3552_v45  ;;  %v2394_v42 = vadd.f32 %v6975_v13, %v6981_v20 }
 0x36b   : > { %v7006_v29 = vadd.f32 %v3554_v41, %v2339_v58  ;;  %v3555_v37 = vpop.f32.mrb[62].mxu1 }
 0x36c   : > { %v3556_v54 = vpop.f32.mrb[63].mxu1 }
 0x36d   : > { %v3557_v38 = vadd.f32 %v3556_v54, %v3555_v37 }
 0x36f   : > { %v7010_v1 = vadd.f32 %v3557_v38, %v2344_v8  ;;  %v3558_v12 = vpop.f32.mrb[64].mxu1 }
 0x370   : > { %v3559_v40 = vpop.f32.mrb[65].mxu1 }
 0x371   : > { %v3560_v50 = vadd.f32 %v3559_v40, %v3558_v12 }
 0x373   : > { %v7014_v10 = vadd.f32 %v3560_v50, %v2349_v3  ;;  %v3561_v22 = vpop.f32.mrb[66].mxu1 }
 0x374   : > { %v3562_v39 = vpop.f32.mrb[67].mxu1 }
 0x375   : > { %v3563_v6 = vadd.f32 %v3562_v39, %v3561_v22 }
 0x377   : > { %v7018_v0 = vadd.f32 %v3563_v6, %v2354_v2  ;;  %v3564_v17 = vpop.f32.mrb[68].mxu1 }
 0x378   : > { %v3565_v27 = vpop.f32.mrb[69].mxu1 }
 0x379   : > { %v3566_v31 = vadd.f32 %v3565_v27, %v3564_v17 }
 0x37b   : > { %v7022_v18 = vadd.f32 %v3566_v31, %v2359_v30  ;;  %v3567_v15 = vpop.f32.mrb[70].mxu1 }
 0x37c   : > { %v3568_v62 = vpop.f32.mrb[71].mxu1 }
 0x37d   : > { %v3569_v59 = vadd.f32 %v3568_v62, %v3567_v15 }
 0x37f   : > { %v7026_v4 = vadd.f32 %v3569_v59, %v2364_v44  ;;  %v3570_v61 = vpop.f32.mrb[72].mxu1 }
 0x380   : > { %v3571_v32 = vpop.f32.mrb[73].mxu1 }
 0x381   : > { %v3572_v49 = vadd.f32 %v3571_v32, %v3570_v61 }
 0x383   : > { %v7030_v19 = vadd.f32 %v3572_v49, %v2369_v63  ;;  %v3573_v23 = vpop.f32.mrb[74].mxu1 }
 0x384   : > { %v3574_v48 = vpop.f32.mrb[75].mxu1 }
 0x385   : > { %v3575_v52 = vadd.f32 %v3574_v48, %v3573_v23 }
 0x387   : > { %v7034_v14 = vadd.f32 %v3575_v52, %v2374_v56  ;;  %v3576_v16 = vpop.f32.mrb[76].mxu1 }
 0x388   : > { %v3577_v25 = vpop.f32.mrb[77].mxu1 }
 0x389   : > { %v3578_v57 = vadd.f32 %v3577_v25, %v3576_v16 }
 0x38b   : > { %v7038_v9 = vadd.f32 %v3578_v57, %v2379_v33  ;;  %v3579_v21 = vpop.f32.mrb[78].mxu1 }
 0x38c   : > { %v3580_v51 = vpop.f32.mrb[79].mxu1 }
 0x38d   : > { %v3581_v11 = vadd.f32 %v3580_v51, %v3579_v21 }
 0x38f   : > { %v7042_v43 = vadd.f32 %v3581_v11, %v2384_v46  ;;  %v3582_v24 = vpop.f32.mrb[80].mxu1 }
 0x390   : > { %v3583_v47 = vpop.f32.mrb[81].mxu1 }
 0x391   : > { %v3584_v5 = vadd.f32 %v3583_v47, %v3582_v24 }
 0x393   : > { %v7046_v7 = vadd.f32 %v3584_v5, %v2389_v35  ;;  %v3585_v55 = vpop.f32.mrb[82].mxu1 }
 0x394   : > { %v3586_v45 = vpop.f32.mrb[83].mxu1 }
 0x395   : > { %v3587_v58 = vadd.f32 %v3586_v45, %v3585_v55 }
 0x397   : > { %v7050_v41 = vadd.f32 %v3587_v58, %v2394_v42  ;;  %v3620_v26 = vpop.f32.mrb[84].mxu1 }
 0x398   : > { %v3621_v37 = vpop.f32.mrb[85].mxu1 }
 0x399   : > { %v3622_v54 = vadd.f32 %v3621_v37, %v3620_v26 }
 0x39b   : > { %v7053_v8 = vadd.f32 %v3622_v54, %v6987_v53  ;;  %v3623_v38 = vpop.f32.mrb[86].mxu1 }
 0x39c   : > { %v3624_v12 = vpop.f32.mrb[87].mxu1 }
 0x39d   : > { %v3625_v28 = vadd.f32 %v3624_v12, %v3623_v38 }
 0x39f   : > { %v7056_v40 = vadd.f32 %v3625_v28, %v6993_v36  ;;  %v3626_v3 = vpop.f32.mrb[88].mxu1 }
 0x3a0   : > { %v3627_v50 = vpop.f32.mrb[89].mxu1 }
 0x3a1   : > { %v3628_v22 = vadd.f32 %v3627_v50, %v3626_v3 }
 0x3a3   : > { %v7059_v13 = vadd.f32 %v3628_v22, %v6998_v60  ;;  %v3629_v20 = vpop.f32.mrb[90].mxu1 }
 0x3a4   : > { %v3630_v39 = vpop.f32.mrb[91].mxu1 }
 0x3a5   : > { %v3631_v2 = vadd.f32 %v3630_v39, %v3629_v20 }
 0x3a7   : > { %v7062_v6 = vadd.f32 %v3631_v2, %v7002_v34  ;;  %v3632_v53 = vpop.f32.mrb[92].mxu1 }
 0x3a8   : > { %v3633_v17 = vpop.f32.mrb[93].mxu1 }
 0x3a9   : > { %v3634_v27 = vadd.f32 %v3633_v17, %v3632_v53 }
 0x3ab   : > { %v7065_v30 = vadd.f32 %v3634_v27, %v7006_v29  ;;  %v3635_v36 = vpop.f32.mrb[94].mxu1 }
 0x3ac   : > { %v3636_v31 = vpop.f32.mrb[95].mxu1 }
 0x3ad   : > { %v3637_v15 = vadd.f32 %v3636_v31, %v3635_v36 }
 0x3af   : > { %v7068_v62 = vadd.f32 %v3637_v15, %v7010_v1  ;;  %v3638_v60 = vpop.f32.mrb[96].mxu1 }
 0x3b0   : > { %v3639_v44 = vpop.f32.mrb[97].mxu1 }
 0x3b1   : > { %v3640_v59 = vadd.f32 %v3639_v44, %v3638_v60 }
 0x3b3   : > { %v7071_v61 = vadd.f32 %v3640_v59, %v7014_v10  ;;  %v3641_v34 = vpop.f32.mrb[98].mxu1 }
 0x3b4   : > { %v3642_v32 = vpop.f32.mrb[99].mxu1 }
 0x3b5   : > { %v3643_v63 = vadd.f32 %v3642_v32, %v3641_v34 }
 0x3b7   : > { %v7074_v49 = vadd.f32 %v3643_v63, %v7018_v0  ;;  %v3644_v29 = vpop.f32.mrb[100].mxu1 }
 0x3b8   : > { %v3645_v23 = vpop.f32.mrb[101].mxu1 }
 0x3b9   : > { %v3646_v48 = vadd.f32 %v3645_v23, %v3644_v29 }
 0x3bb   : > { %v7077_v56 = vadd.f32 %v3646_v48, %v7022_v18  ;;  %v3647_v1 = vpop.f32.mrb[102].mxu1 }
 0x3bc   : > { %v3648_v52 = vpop.f32.mrb[103].mxu1 }
 0x3bd   : > { %v3649_v16 = vadd.f32 %v3648_v52, %v3647_v1 }
 0x3bf   : > { %v7080_v25 = vadd.f32 %v3649_v16, %v7026_v4  ;;  %v3650_v10 = vpop.f32.mrb[104].mxu1 }
 0x3c0   : > { %v3651_v33 = vpop.f32.mrb[105].mxu1 }
 0x3c1   : > { %v3652_v57 = vadd.f32 %v3651_v33, %v3650_v10 }
 0x3c3   : > { %v7083_v21 = vadd.f32 %v3652_v57, %v7030_v19  ;;  %v3653_v0 = vpop.f32.mrb[106].mxu1 }
 0x3c4   : > { %v3654_v51 = vpop.f32.mrb[107].mxu1 }
 0x3c5   : > { %v3655_v46 = vadd.f32 %v3654_v51, %v3653_v0 }
 0x3c7   : > { %v7086_v11 = vadd.f32 %v3655_v46, %v7034_v14  ;;  %v3656_v18 = vpop.f32.mrb[108].mxu1 }
 0x3c8   : > { %v3657_v24 = vpop.f32.mrb[109].mxu1 }
 0x3c9   : > { %v3658_v47 = vadd.f32 %v3657_v24, %v3656_v18 }
 0x3cb   : > { %v7089_v35 = vadd.f32 %v3658_v47, %v7038_v9  ;;  %v3659_v4 = vpop.f32.mrb[110].mxu1 }
 0x3cc   : > { %v3660_v5 = vpop.f32.mrb[111].mxu1 }
 0x3cd   : > { %v3661_v55 = vadd.f32 %v3660_v5, %v3659_v4 }
 0x3cf   : > { %v7092_v45 = vadd.f32 %v3661_v55, %v7042_v43  ;;  %v3662_v19 = vpop.f32.mrb[112].mxu1 }
 0x3d0   : > { %v3663_v42 = vpop.f32.mrb[113].mxu1 }
 0x3d1   : > { %v3664_v58 = vadd.f32 %v3663_v42, %v3662_v19 }
 0x3d3   : > { %v7095_v26 = vadd.f32 %v3664_v58, %v7046_v7  ;;  %v3665_v14 = vpop.f32.mrb[114].mxu1 }
 0x3d4   : > { %v3666_v37 = vpop.f32.mrb[115].mxu1 }
 0x3d5   : > { %v3667_v54 = vadd.f32 %v3666_v37, %v3665_v14 }
 0x3d7   : > { %v7098_v38 = vadd.f32 %v3667_v54, %v7050_v41  ;;  %v3700_v9 = vpop.f32.mrb[116].mxu1 }
 0x3d8   : > { %v3701_v12 = vpop.f32.mrb[117].mxu1 }
 0x3d9   : > { %v3702_v28 = vadd.f32 %v3701_v12, %v3700_v9 }
 0x3db   : > { %v3703_v3 = vpop.f32.mrb[118].mxu1  ;;  %v7101_v50 = vadd.f32 %v3702_v28, %v7053_v8 }
 0x3dc   : > { %v3704_v43 = vpop.f32.mrb[119].mxu1 }
 0x3dd   : > { %v3705_v22 = vadd.f32 %v3704_v43, %v3703_v3 }
 0x3df   : > { %v3706_v20 = vpop.f32.mrb[120].mxu1  ;;  %v2759_v39 = vadd.f32 %v3705_v22, %v7056_v40 }
 0x3e0   : > { %v3707_v7 = vpop.f32.mrb[121].mxu1 }
 0x3e1   : > { %v3708_v2 = vadd.f32 %v3707_v7, %v3706_v20 }
 0x3e3   : > { %v3709_v53 = vpop.f32.mrb[122].mxu1  ;;  %v7105_v17 = vadd.f32 %v3708_v2, %v7059_v13 }
 0x3e4   : > { %v3710_v41 = vpop.f32.mrb[123].mxu1 }
 0x3e5   : > { %v3711_v27 = vadd.f32 %v3710_v41, %v3709_v53 }
 0x3e7   : > { %v3712_v36 = vpop.f32.mrb[124].mxu1  ;;  %v2769_v31 = vadd.f32 %v3711_v27, %v7062_v6 }
 0x3e8   : > { %v3713_v15 = vpop.f32.mrb[125].mxu1 }
 0x3e9   : > { %v3714_v60 = vadd.f32 %v3713_v15, %v3712_v36 }
 0x3eb   : > { %v3715_v8 = vpop.f32.mrb[126].mxu1  ;;  %v7109_v44 = vadd.f32 %v3714_v60, %v7065_v30 }
 0x3ec   : > { %v3716_v59 = vpop.f32.mrb[127].mxu1 }
 0x3ed   : > { %v3717_v34 = vadd.f32 %v3716_v59, %v3715_v8 }
 0x3ef   : > { %v3718_v40 = vpop.f32.mrb[128].mxu1  ;;  %v2779_v32 = vadd.f32 %v3717_v34, %v7068_v62 }
 0x3f0   : > { %v3719_v63 = vpop.f32.mrb[129].mxu1 }
 0x3f1   : > { %v3720_v29 = vadd.f32 %v3719_v63, %v3718_v40 }
 0x3f3   : > { %v3721_v13 = vpop.f32.mrb[130].mxu1  ;;  %v7113_v23 = vadd.f32 %v3720_v29, %v7071_v61 }
 0x3f4   : > { %v3722_v48 = vpop.f32.mrb[131].mxu1 }
 0x3f5   : > { %v3723_v1 = vadd.f32 %v3722_v48, %v3721_v13 }
 0x3f7   : > { %v3724_v6 = vpop.f32.mrb[132].mxu1  ;;  %v2789_v52 = vadd.f32 %v3723_v1, %v7074_v49 }
 0x3f8   : > { %v3725_v16 = vpop.f32.mrb[133].mxu1 }
 0x3f9   : > { %v3726_v10 = vadd.f32 %v3725_v16, %v3724_v6 }
 0x3fb   : > { %v3727_v30 = vpop.f32.mrb[134].mxu1  ;;  %v7117_v33 = vadd.f32 %v3726_v10, %v7077_v56 }
 0x3fc   : > { %v3728_v57 = vpop.f32.mrb[135].mxu1 }
 0x3fd   : > { %v3729_v0 = vadd.f32 %v3728_v57, %v3727_v30 }
 0x3ff   : > { %v3730_v62 = vpop.f32.mrb[136].mxu1  ;;  %v2799_v51 = vadd.f32 %v3729_v0, %v7080_v25 }
 0x400   : > { %v3731_v46 = vpop.f32.mrb[137].mxu1 }
 0x401   : > { %v3732_v18 = vadd.f32 %v3731_v46, %v3730_v62 }
 0x403   : > { %v3733_v61 = vpop.f32.mrb[138].mxu1  ;;  %v7121_v24 = vadd.f32 %v3732_v18, %v7083_v21 }
 0x404   : > { %v3734_v47 = vpop.f32.mrb[139].mxu1 }
 0x405   : > { %v3735_v4 = vadd.f32 %v3734_v47, %v3733_v61 }
 0x407   : > { %v3736_v49 = vpop.f32.mrb[140].mxu1  ;;  %v7124_v5 = vadd.f32 %v3735_v4, %v7086_v11 }
 0x408   : > { %v3737_v55 = vpop.f32.mrb[141].mxu1 }
 0x409   : > { %v3738_v56 = vadd.f32 %v3737_v55, %v3736_v49 }
 0x40b   : > { %v3739_v19 = vpop.f32.mrb[142].mxu1  ;;  %v7127_v42 = vadd.f32 %v3738_v56, %v7089_v35 }
 0x40c   : > { %v3740_v58 = vpop.f32.mrb[143].mxu1 }
 0x40d   : > { %v3741_v25 = vadd.f32 %v3740_v58, %v3739_v19 }
 0x40f   : > { %v3742_v14 = vpop.f32.mrb[144].mxu1  ;;  %v7130_v37 = vadd.f32 %v3741_v25, %v7092_v45 }
 0x410   : > { %v3743_v21 = vpop.f32.mrb[145].mxu1 }
 0x411   : > { %v3744_v54 = vadd.f32 %v3743_v21, %v3742_v14 }
 0x413   : > { %v3745_v9 = vpop.f32.mrb[146].mxu1  ;;  %v7133_v12 = vadd.f32 %v3744_v54, %v7095_v26 }
 0x414   : > { %v3746_v11 = vpop.f32.mrb[147].mxu1 }
 0x415   : > { %v3747_v28 = vadd.f32 %v3746_v11, %v3745_v9 }
 0x417   : > { %v3876_v3 = vpop.f32.mrb[148].mxu1  ;;  %v7136_v43 = vadd.f32 %v3747_v28, %v7098_v38 }
 0x418   : > { %v7138_v35 = vadd.f32 %v3876_v3, %v2759_v39  ;;  %v2898_v22 = vpop.f32.mrb[149].mxu1 }
 0x419   : > { %v7141_v20 = vadd.f32 %v2898_v22, %v7101_v50 }
 0x41a   : > { %v3369_v45 = vmul.f32 -1.442695, %v7138_v35 }
 0x41b   : > { %v3368_v7 = vmul.f32 -1.442695, %v7141_v20  ;;  %v3879_v2 = vpop.f32.mrb[150].mxu1 }
 0x41c   : > { %4547 = vpow2.f32 %v3369_v45  ;;  %v7145_v26 = vadd.f32 %v3879_v2, %v2769_v31  ;;  %v2908_v53 = vpop.f32.mrb[151].mxu1 }
 0x41d   : > { %4549 = vpow2.f32 %v3368_v7  ;;  %v7148_v41 = vadd.f32 %v2908_v53, %v7105_v17  ;;  %v7330_v7 = vld [vmem:[#allocation4_spill] sm:$0xff] }
 0x41e   : > { %v3371_v38 = vmul.f32 -1.442695, %v7145_v26 }
 0x41f   : > { %v3370_v39 = vmul.f32 -1.442695, %v7148_v41  ;;  %v3882_v27 = vpop.f32.mrb[152].mxu1 }
 0x420   : > { %4551 = vpow2.f32 %v3371_v38  ;;  %v7152_v50 = vadd.f32 %v3882_v27, %v2779_v32  ;;  %v2918_v36 = vpop.f32.mrb[153].mxu1 }
 0x421   : > { %4553 = vpow2.f32 %v3370_v39  ;;  %v7155_v15 = vadd.f32 %v2918_v36, %v7109_v44  ;;  %v7331_v39 = vld [vmem:[#allocation3_spill] sm:$0xff] }
 0x422   : > { %v3373_v31 = vmul.f32 -1.442695, %v7152_v50 }
 0x423   : > { %v3372_v60 = vmul.f32 -1.442695, %v7155_v15  ;;  %v3885_v8 = vpop.f32.mrb[154].mxu1 }
 0x424   : > { %4555 = vpow2.f32 %v3373_v31  ;;  %v7159_v17 = vadd.f32 %v3885_v8, %v2789_v52  ;;  %v2928_v59 = vpop.f32.mrb[155].mxu1 }
 0x425   : > { %4557 = vpow2.f32 %v3372_v60  ;;  %v7162_v34 = vadd.f32 %v2928_v59, %v7113_v23 }
 0x426   : > { %v4548_v40 = vpop.eup %4547  ;;  %v3375_v32 = vmul.f32 -1.442695, %v7159_v17 }
 0x427   : > { %v4550_v63 = vpop.eup %4549  ;;  %v3026_v29 = vadd.f32 1.0, %v4548_v40  ;;  %v3374_v44 = vmul.f32 -1.442695, %v7162_v34  ;;  %v3888_v13 = vpop.f32.mrb[156].mxu1  ;;  %v7332_v40 = vld [vmem:[#allocation6_spill] sm:$0xff] }
 0x428   : > { %v3025_v48 = vadd.f32 1.0, %v4550_v63  ;;  %4559 = vpow2.f32 %v3375_v32  ;;  %v7166_v1 = vadd.f32 %v3888_v13, %v2799_v51  ;;  %v2938_v6 = vpop.f32.mrb[157].mxu1 }
 0x429   : > { %4561 = vrcp.f32 %v3026_v29  ;;  %v7169_v52 = vadd.f32 %v2938_v6, %v7117_v33 }
 0x42a   : > { %v4552_v16 = vpop.eup %4551  ;;  %4563 = vrcp.f32 %v3025_v48  ;;  %v3377_v23 = vmul.f32 -1.442695, %v7166_v1 }
 0x42b   : > { %v4554_v10 = vpop.eup %4553  ;;  %v3028_v30 = vadd.f32 1.0, %v4552_v16  ;;  %4565 = vpow2.f32 %v3374_v44  ;;  %v3376_v57 = vmul.f32 -1.442695, %v7169_v52  ;;  %v3891_v0 = vpop.f32.mrb[158].mxu1  ;;  %v7333_v44 = vld [vmem:[#allocation5_spill] sm:$0xff] }
 0x42c   : > { %v3027_v62 = vadd.f32 1.0, %v4554_v10  ;;  %4567 = vpow2.f32 %v3377_v23  ;;  %v7174_v51 = vadd.f32 %v3891_v0, %v7124_v5  ;;  %v2948_v46 = vpop.f32.mrb[159].mxu1  ;;  %v7334_v10 = vld [vmem:[#allocation8_spill] sm:$0xff] }
 0x42d   : > { %4569 = vrcp.f32 %v3028_v30  ;;  %v7177_v33 = vadd.f32 %v2948_v46, %v7121_v24 }
 0x42e   : > { %v4556_v18 = vpop.eup %4555  ;;  %4571 = vrcp.f32 %v3027_v62  ;;  %v3379_v61 = vmul.f32 -1.442695, %v7174_v51  ;;  %v7335_v62 = vld [vmem:[#allocation7_spill] sm:$0xff] }
 0x42f   : > { %v4558_v47 = vpop.eup %4557  ;;  %v3030_v4 = vadd.f32 1.0, %v4556_v18  ;;  %4573 = vpow2.f32 %v3376_v57  ;;  %v3378_v49 = vmul.f32 -1.442695, %v7177_v33  ;;  %v3894_v55 = vpop.f32.mrb[160].mxu1 }
 0x430   : > { %v3029_v56 = vadd.f32 1.0, %v4558_v47  ;;  %4575 = vpow2.f32 %v3379_v61  ;;  %v7182_v5 = vadd.f32 %v3894_v55, %v7130_v37  ;;  %v2958_v19 = vpop.f32.mrb[161].mxu1 }
 0x431   : > { %4577 = vrcp.f32 %v3030_v4  ;;  %v7185_v24 = vadd.f32 %v2958_v19, %v7127_v42  ;;  %v7336_v4 = vld [vmem:[#allocation10_spill] sm:$0xff] }
 0x432   : > { %v4560_v58 = vpop.eup %4559  ;;  %4579 = vrcp.f32 %v3029_v56  ;;  %v3381_v25 = vmul.f32 -1.442695, %v7182_v5 }
 0x433   : > { %v4562_v14 = vpop.eup %4561  ;;  %v3032_v21 = vadd.f32 1.0, %v4560_v58  ;;  %4581 = vpow2.f32 %v3378_v49  ;;  %v3380_v54 = vmul.f32 -1.442695, %v7185_v24  ;;  %v3897_v9 = vpop.f32.mrb[162].mxu1 }
 0x434   : > { %v4564_v11 = vpop.eup %4563  ;;  %v3074_v37 = vmul.f32 %v4562_v14, %v7138_v35  ;;  %4583 = vpow2.f32 %v3381_v25  ;;  %v7192_v28 = vadd.f32 %v3897_v9, %v7136_v43  ;;  %v2968_v42 = vpop.f32.mrb[163].mxu1  ;;  %v7337_v14 = vld [vmem:[#allocation9_spill] sm:$0xff] }
 0x435   : > { %v4566_v3 = vpop.eup %4565  ;;  %v3073_v22 = vmul.f32 %v4564_v11, %v7141_v20  ;;  %4585 = vrcp.f32 %v3032_v21  ;;  %v7201_v45 = vadd.f32 %v2968_v42, %v7133_v12  ;;  %v7338_v9 = vld [vmem:[#allocation13_spill] sm:$0xff] }
 0x436   : > { %v4568_v35 = vpop.eup %4567  ;;  %v3090_v2 = vadd.f32 %v3074_v37, %v7330_v7  ;;  %v3031_v43 = vadd.f32 1.0, %v4566_v3  ;;  %4587 = vpow2.f32 %v3380_v54  ;;  %v3383_v53 = vmul.f32 -1.442695, %v7192_v28  ;;  %v7340_v7 = vld [vmem:[#allocation16_spill] sm:$0xff] }
 0x437   : > { %v4570_v38 = vpop.eup %4569  ;;  %v3089_v27 = vadd.f32 %v3073_v22, %v7331_v39  ;;  %v3034_v36 = vadd.f32 1.0, %v4568_v35  ;;  %v3382_v31 = vmul.f32 -1.442695, %v7201_v45  ;;  %v7341_v39 = vld [vmem:[#allocation14_spill] sm:$0xff] }
 0x438   : > { %v4572_v60 = vpop.eup %4571  ;;  %3106 = vst [vmem:[%s7197_s17 + $0x8] sm:$0xff] %v3090_v2  ;;  %v3076_v20 = vmul.f32 %v4570_v38, %v7145_v26  ;;  %4589 = vrcp.f32 %v3031_v43 }
 0x439   : > { %v4574_v12 = vpop.eup %4573  ;;  %3105 = vst [vmem:[%s7197_s17] sm:$0xff] %v3089_v27  ;;  %v3075_v8 = vmul.f32 %v4572_v60, %v7148_v41  ;;  %4591 = vrcp.f32 %v3034_v36  ;;  %v7343_v60 = vld [vmem:[#allocation17_spill] sm:$0xff] }
 0x43a   : > { %v4576_v59 = vpop.eup %4575  ;;  %v3092_v32 = vadd.f32 %v3076_v20, %v7332_v40  ;;  %v3033_v63 = vadd.f32 1.0, %v4574_v12  ;;  %4593 = vpow2.f32 %v3383_v53 }
 0x43b   : > { %v4578_v29 = vpop.eup %4577  ;;  %v3091_v13 = vadd.f32 %v3075_v8, %v7333_v44  ;;  %v3036_v48 = vadd.f32 1.0, %v4576_v59  ;;  %4595 = vpow2.f32 %v3382_v31 }
 0x43c   : > { %v4580_v6 = vpop.eup %4579  ;;  %3108 = vst [vmem:[%s7197_s17 + $0x18] sm:$0xff] %v3092_v32  ;;  %v3078_v26 = vmul.f32 %v4578_v29, %v7152_v50  ;;  %4597 = vrcp.f32 %v3033_v63  ;;  %v7345_v32 = vld [vmem:[#allocation19_spill] sm:$0xff] }
 0x43d   : > { %v4582_v16 = vpop.eup %4581  ;;  %3107 = vst [vmem:[%s7197_s17 + $0x10] sm:$0xff] %v3091_v13  ;;  %v3077_v41 = vmul.f32 %v4580_v6, %v7155_v15  ;;  %4599 = vrcp.f32 %v3036_v48 }
 0x43e   : > { %v4584_v23 = vpop.eup %4583  ;;  %v3094_v30 = vadd.f32 %v3078_v26, %v7334_v10  ;;  %v3035_v57 = vadd.f32 1.0, %v4582_v16 }
 0x43f   : > { %v4586_v0 = vpop.eup %4585  ;;  %v3093_v46 = vadd.f32 %v3077_v41, %v7335_v62  ;;  %v3038_v18 = vadd.f32 1.0, %v4584_v23 }
 0x440   : > { %v4588_v61 = vpop.eup %4587  ;;  %3110 = vst [vmem:[%s7197_s17 + $0x28] sm:$0xff] %v3094_v30  ;;  %v3080_v50 = vmul.f32 %v4586_v0, %v7159_v17  ;;  %4601 = vrcp.f32 %v3035_v57 }
 0x441   : > { %3109 = vst [vmem:[%s7197_s17 + $0x20] sm:$0xff] %v3093_v46  ;;  %4603 = vrcp.f32 %v3038_v18  ;;  %v3037_v47 = vadd.f32 1.0, %v4588_v61 }
 0x442   : > { %v4590_v15 = vpop.eup %4589  ;;  %v3096_v49 = vadd.f32 %v3080_v50, %v7336_v4 }
 0x443   : > { %v4592_v55 = vpop.eup %4591  ;;  %v3079_v56 = vmul.f32 %v4590_v15, %v7162_v34  ;;  %4605 = vrcp.f32 %v3037_v47 }
 0x444   : > { %v4594_v19 = vpop.eup %4593  ;;  %3112 = vst [vmem:[%s7197_s17 + $0x38] sm:$0xff] %v3096_v49  ;;  %v3082_v58 = vmul.f32 %v4592_v55, %v7166_v1  ;;  %v7339_v1 = vld [vmem:[#allocation11_spill] sm:$0xff] }
 0x445   : > { %v4596_v25 = vpop.eup %4595  ;;  %v3095_v17 = vadd.f32 %v3079_v56, %v7337_v14  ;;  %v3040_v21 = vadd.f32 1.0, %v4594_v19 }
 0x446   : > { %v4598_v54 = vpop.eup %4597  ;;  %v3098_v11 = vadd.f32 %v3082_v58, %v7338_v9  ;;  %v3039_v37 = vadd.f32 1.0, %v4596_v25 }
 0x447   : > { %v4600_v42 = vpop.eup %4599  ;;  %3111 = vst [vmem:[%s7197_s17 + $0x30] sm:$0xff] %v3095_v17  ;;  %v3081_v3 = vmul.f32 %v4598_v54, %v7169_v52  ;;  %4607 = vrcp.f32 %v3040_v21 }
 0x448   : > { %3114 = vst [vmem:[%s7197_s17 + $0x48] sm:$0xff] %v3098_v11  ;;  %v3084_v34 = vmul.f32 %v4600_v42, %v7174_v51  ;;  %4609 = vrcp.f32 %v3039_v37  ;;  %v7342_v51 = vld [vmem:[#allocation18_spill] sm:$0xff] }
 0x449   : > { %v3097_v22 = vadd.f32 %v3081_v3, %v7339_v1 }
 0x44a   : > { %v4602_v35 = vpop.eup %4601  ;;  %v3100_v2 = vadd.f32 %v3084_v34, %v7340_v7 }
 0x44b   : > { %v4604_v43 = vpop.eup %4603  ;;  %3113 = vst [vmem:[%s7197_s17 + $0x40] sm:$0xff] %v3097_v22  ;;  %v3083_v53 = vmul.f32 %v4602_v35, %v7177_v33 }
 0x44c   : > { %3116 = vst [vmem:[%s7197_s17 + $0x58] sm:$0xff] %v3100_v2  ;;  %v3086_v52 = vmul.f32 %v4604_v43, %v7182_v5  ;;  %v7344_v5 = vld [vmem:[#allocation20_spill] sm:$0xff] }
 0x44d   : > { %v4606_v38 = vpop.eup %4605  ;;  %v3099_v27 = vadd.f32 %v3083_v53, %v7341_v39 }
 0x44e   : > { %v3102_v36 = vadd.f32 %v3086_v52, %v7342_v51  ;;  %v3085_v31 = vmul.f32 %v4606_v38, %v7185_v24 }
 0x44f   : > { %3115 = vst [vmem:[%s7197_s17 + $0x50] sm:$0xff] %v3099_v27 }
 0x450   : > { %3118 = vst [vmem:[%s7197_s17 + $0x68] sm:$0xff] %v3102_v36  ;;  %v3101_v20 = vadd.f32 %v3085_v31, %v7343_v60 }
 0x451   : > { %v4608_v12 = vpop.eup %4607 }
 0x452   : > { %v4610_v8 = vpop.eup %4609  ;;  %3117 = vst [vmem:[%s7197_s17 + $0x60] sm:$0xff] %v3101_v20  ;;  %v3088_v33 = vmul.f32 %v4608_v12, %v7192_v28 }
 0x453   : > { %v3087_v59 = vmul.f32 %v4610_v8, %v7201_v45 }
 0x454   : > { %v3104_v40 = vadd.f32 %v3088_v33, %v7344_v5 }
 0x455   : > { %v3103_v63 = vadd.f32 %v3087_v59, %v7345_v32 }
 0x456   : > { %3120 = vst [vmem:[%s7197_s17 + $0x78] sm:$0xff] %v3104_v40 }
 0x457   : > { %3119 = vst [vmem:[%s7197_s17 + $0x70] sm:$0xff] %v3103_v63 }
 0x458 PF: > { %s17_s28 = sadd.s32 1, %s4655_s28   ;;  %s7346_s24 = smov %s4647_s26 }
 0x459   : > { %p14_p13 = scmp.ge.s32.totalorder %s17_s28, 6   ;;  %s7347_s25 = smov %s4651_s27 }
 0x45a   : > { %s7348_s26 = smov %s7351_s29  ;;  %s7349_s27 = smov %s7355_s30 }
 0x45b   :  { %16 = sbr.rel (!%p14_p13) target bundleno = 3 (0x3), region = 84 }

</bundles_post_ra>
